<compile_context>
chip_gen: v6e
topology: v6e:2x2x1
jax: 0.10.0
libtpu: 0.0.40
codegen_flags: <defaults>
</compile_context>

<pallas_src>
import math
from functools import partial

import jax
import jax.numpy as jnp
from jax import lax
from jax.experimental import pallas as pl
from jax.experimental.pallas import tpu as pltpu

EPS = 1e-6
NEG_INF = -1e9


# ----------------------------------------------------------------------------
# In-kernel helpers (f32 elementwise math; bf16 only as MXU operand dtype)
# ----------------------------------------------------------------------------
def _custom_layernorm(x, a, b):
    # torch reference: mean(-1), std(-1) (unbiased /(D-1)), a*(x-m)/(std+eps)+b
    d = x.shape[-1]
    mean = jnp.mean(x, axis=-1, keepdims=True)
    xc = x - mean
    var = jnp.sum(xc * xc, axis=-1, keepdims=True) / (d - 1)
    std = jnp.sqrt(var)
    return a * xc / (std + EPS) + b            # exact divide (matches torch)


def _proj(h3, w_ref):
    """(B, L, D) activations @ (D, E) bf16 weight -> (B*L, E) f32."""
    b, l, d = h3.shape
    h2 = h3.reshape(b * l, d).astype(jnp.bfloat16)
    return jnp.dot(h2, w_ref[...], preferred_element_type=jnp.float32)


def _attend(q, k, v, mask_fn, scale):
    """Single-head attention. q:(B,Tq,D) k,v:(B,Tk,D) f32; mask_fn on scores."""
    s = jnp.einsum("bqd,bkd->bqk",
                   q.astype(jnp.bfloat16), k.astype(jnp.bfloat16),
                   preferred_element_type=jnp.float32) * scale
    s = mask_fn(s)
    s = s - jnp.max(s, axis=-1, keepdims=True)
    p = jnp.exp(s)
    p = p * pl.reciprocal(jnp.sum(p, axis=-1, keepdims=True), approx=True)
    return jnp.einsum("bqk,bkd->bqd",
                      p.astype(jnp.bfloat16), v.astype(jnp.bfloat16),
                      preferred_element_type=jnp.float32)


# ----------------------------------------------------------------------------
# Fused decoder-layer kernel: one query tile (B, TQ, D) per grid step
# ----------------------------------------------------------------------------
def _decoder_layer_kernel(tlen_ref, vlen_ref,                       # SMEM prefetch
                          xf_ref, xt_ref, pt_ref, pv_ref,
                          sa_wq_ref, sa_wkv_ref, sa_wo_ref,
                          ct_wq_ref, ct_wkv_ref, ct_wo_ref,
                          cv_wq_ref, cv_wkv_ref, cv_wo_ref,
                          ff_w1_ref, ff_b1_ref, ff_w2_ref, ff_b2_ref,
                          ln0_a_ref, ln0_b_ref, ln1_a_ref, ln1_b_ref,
                          ln2_a_ref, ln2_b_ref, ln3_a_ref, ln3_b_ref,
                          fn_a_ref, fn_b_ref,
                          o_ref, *, tq, apply_final_norm):
    B, T, D = xf_ref.shape
    Lt = pt_ref.shape[1]
    Lv = pv_ref.shape[1]
    scale = 1.0 / math.sqrt(D)          # TODO(synk): single-head assumed
    q0 = pl.program_id(0) * tq          # global row offset of this query tile

    xf = xf_ref[...].astype(jnp.float32)    # (B, T, D)  full seq (K/V source)
    x = xt_ref[...].astype(jnp.float32)     # (B, TQ, D) residual stream tile

    def out_proj(ctx, wo_ref):
        c2 = ctx.reshape(B * tq, D).astype(jnp.bfloat16)
        return jnp.dot(c2, wo_ref[...],
                       preferred_element_type=jnp.float32).reshape(B, tq, D)

    # ---- masked (causal) self-attention + residual -------------------------
    h_full = _custom_layernorm(xf, ln0_a_ref[...], ln0_b_ref[...])
    h_tile = _custom_layernorm(x, ln0_a_ref[...], ln0_b_ref[...])
    q = _proj(h_tile, sa_wq_ref).reshape(B, tq, D)
    kv = _proj(h_full, sa_wkv_ref)                 # (B*T, 2D); D%128==0 -> aligned split
    k = kv[:, :D].reshape(B, T, D)
    v = kv[:, D:].reshape(B, T, D)

    def causal_mask(s):                 # generated in-kernel: no (B,T,T) DMA
        row = q0 + lax.broadcasted_iota(jnp.int32, (tq, T), 0)
        col = lax.broadcasted_iota(jnp.int32, (tq, T), 1)
        return jnp.where((col <= row)[None, :, :], s, NEG_INF)

    x = x + out_proj(_attend(q, k, v, causal_mask, scale), sa_wo_ref)

    # ---- text cross-attention + residual ------------------------------------
    h = _custom_layernorm(x, ln1_a_ref[...], ln1_b_ref[...])
    q = _proj(h, ct_wq_ref).reshape(B, tq, D)
    kvt = _proj(pt_ref[...], ct_wkv_ref)           # (B*Lt, 2D)
    kt = kvt[:, :D].reshape(B, Lt, D)
    vt = kvt[:, D:].reshape(B, Lt, D)

    def text_mask(s):                   # per-batch key lengths from SMEM
        col = lax.broadcasted_iota(jnp.int32, (tq, Lt), 1)
        return jnp.stack([jnp.where(col < tlen_ref[b], s[b], NEG_INF)
                          for b in range(B)], axis=0)

    x = x + out_proj(_attend(q, kt, vt, text_mask, scale), ct_wo_ref)

    # ---- visual cross-attention + residual ----------------------------------
    h = _custom_layernorm(x, ln2_a_ref[...], ln2_b_ref[...])
    q = _proj(h, cv_wq_ref).reshape(B, tq, D)
    kvv = _proj(pv_ref[...], cv_wkv_ref)           # (B*Lv, 2D)
    kvi = kvv[:, :D].reshape(B, Lv, D)
    vvi = kvv[:, D:].reshape(B, Lv, D)

    def vis_mask(s):
        col = lax.broadcasted_iota(jnp.int32, (tq, Lv), 1)
        return jnp.stack([jnp.where(col < vlen_ref[b], s[b], NEG_INF)
                          for b in range(B)], axis=0)

    x = x + out_proj(_attend(q, kvi, vvi, vis_mask, scale), cv_wo_ref)

    # ---- feed-forward + residual --------------------------------------------
    h = _custom_layernorm(x, ln3_a_ref[...], ln3_b_ref[...])
    h2 = h.reshape(B * tq, D).astype(jnp.bfloat16)
    a1 = jnp.dot(h2, ff_w1_ref[...],
                 preferred_element_type=jnp.float32) + ff_b1_ref[...]
    a1 = jnp.maximum(a1, 0.0)
    ffo = jnp.dot(a1.astype(jnp.bfloat16), ff_w2_ref[...],
                  preferred_element_type=jnp.float32) + ff_b2_ref[...]
    x = x + ffo.reshape(B, tq, D)

    # ---- final decoder LayerNorm (fused into the last layer) ----------------
    if apply_final_norm:
        x = _custom_layernorm(x, fn_a_ref[...], fn_b_ref[...])

    o_ref[...] = x.astype(o_ref.dtype)


_WEIGHT_ORDER = ("sa_wq", "sa_wkv", "sa_wo",
                 "ct_wq", "ct_wkv", "ct_wo",
                 "cv_wq", "cv_wkv", "cv_wo",
                 "ff_w1", "ff_b1", "ff_w2", "ff_b2",
                 "ln0_a", "ln0_b", "ln1_a", "ln1_b",
                 "ln2_a", "ln2_b", "ln3_a", "ln3_b")


def decoder_layer(x, pt, pv, tlen, vlen, lp, fn_a, fn_b, *,
                  tq, apply_final_norm, out_dtype):
    B, T, D = x.shape
    Lt = pt.shape[1]
    Lv = pv.shape[1]
    assert T % tq == 0 and tq % 16 == 0 and D % 128 == 0

    cmap3 = lambda i, *_: (0, 0, 0)
    cmap2 = lambda i, *_: (0, 0)
    full3 = lambda shp: pl.BlockSpec(shp, cmap3)
    full2 = lambda shp: pl.BlockSpec(shp, cmap2)

    in_specs = (
        [full3((B, T, D)),                                    # full seq (resident)
         pl.BlockSpec((B, tq, D), lambda i, *_: (0, i, 0)),   # query tile
         full3((B, Lt, D)),                                   # proto_text (resident)
         full3((B, Lv, D))]                                   # proto_visual (resident)
        + [full2(lp[name].shape) for name in _WEIGHT_ORDER]
        + [full2(fn_a.shape), full2(fn_b.shape)]
    )

    kernel = partial(_decoder_layer_kernel, tq=tq,
                     apply_final_norm=apply_final_norm)
    return pl.pallas_call(
        kernel,
        out_shape=jax.ShapeDtypeStruct((B, T, D), out_dtype),
        grid_spec=pltpu.PrefetchScalarGridSpec(
            num_scalar_prefetch=2,
            grid=(T // tq,),
            in_specs=in_specs,
            out_specs=pl.BlockSpec((B, tq, D), lambda i, *_: (0, i, 0)),
        ),
        compiler_params=pltpu.CompilerParams(
            dimension_semantics=("parallel",),
            # TODO(synk): sweep toward 128 MiB on v6e; keep <=~48 MiB on v7x.
            vmem_limit_bytes=32 * 1024 * 1024),
    )(tlen, vlen, x, x, pt, pv,
      *(lp[name] for name in _WEIGHT_ORDER),
      fn_a, fn_b)


# ----------------------------------------------------------------------------
# Decoder_Multimodal forward (N fused layer calls; final norm in last call)
# ----------------------------------------------------------------------------
def decoder_multimodal_forward(params, x, proto_text, proto_visual,
                               text2c_mask, visual2c_mask, multimodal_mask,
                               *, tq=16):
    # Self-attn mask regenerated in-kernel (causal); cross masks -> lengths.
    del multimodal_mask
    tlen = jnp.sum((text2c_mask[:, 0, :] != 0).astype(jnp.int32), axis=-1)
    vlen = jnp.sum((visual2c_mask[:, 0, :] != 0).astype(jnp.int32), axis=-1)

    pt = proto_text.astype(jnp.bfloat16)      # pure MXU operands -> bf16 DMA
    pv = proto_visual.astype(jnp.bfloat16)

    n = len(params["layers"])
    h = x.astype(jnp.float32)
    for li, lp in enumerate(params["layers"]):
        last = (li == n - 1)
        # Intermediate activations handed off in bf16 (halves inter-layer HBM
        # traffic); final output stays float32.
        h = decoder_layer(h, pt, pv, tlen, vlen, lp,
                          params["norm_a"], params["norm_b"],
                          tq=tq, apply_final_norm=last,
                          out_dtype=jnp.float32 if last else jnp.bfloat16)
    return h


# ----------------------------------------------------------------------------
# Deterministic parameter init (synthetic; shapes follow the module's __init__)
# Matmul weights stored in bfloat16 (MXU operand dtype); LN/bias in f32.
# ----------------------------------------------------------------------------
def init_params(key, n_layers, d_model, d_ff):
    def dense(k, shape, scale=0.05):
        return (scale * jax.random.normal(k, shape, jnp.float32)
                ).astype(jnp.bfloat16)

    layers = []
    keys = jax.random.split(key, n_layers)
    for li in range(n_layers):
        lk = jax.random.split(keys[li], 11)
        lp = {
            "sa_wq":  dense(lk[0], (d_model, d_model)),
            "sa_wkv": dense(lk[1], (d_model, 2 * d_model)),   # stacked K|V
            "sa_wo":  dense(lk[2], (d_model, d_model)),
            "ct_wq":  dense(lk[3], (d_model, d_model)),
            "ct_wkv": dense(lk[4], (d_model, 2 * d_model)),
            "ct_wo":  dense(lk[5], (d_model, d_model)),
            "cv_wq":  dense(lk[6], (d_model, d_model)),
            "cv_wkv": dense(lk[7], (d_model, 2 * d_model)),
            "cv_wo":  dense(lk[8], (d_model, d_model)),
            "ff_w1":  dense(lk[9], (d_model, d_ff)),
            "ff_b1":  jnp.zeros((1, d_ff), jnp.float32),
            "ff_w2":  dense(lk[10], (d_ff, d_model)),
            "ff_b2":  jnp.zeros((1, d_model), jnp.float32),
        }
        for s in range(4):
            lp[f"ln{s}_a"] = jnp.ones((1, d_model), jnp.float32)
            lp[f"ln{s}_b"] = jnp.zeros((1, d_model), jnp.float32)
        layers.append(lp)

    return {
        "layers": layers,
        "norm_a": jnp.ones((1, d_model), jnp.float32),   # LayerNorm.a_2
        "norm_b": jnp.zeros((1, d_model), jnp.float32),  # LayerNorm.b_2
    }


# ----------------------------------------------------------------------------
if __name__ == "__main__":
    B, T, D = 2, 32, 128        # batch, target seq, hidden (lane-dense D)
    Lt, Lv = 8, 16              # proto_text / proto_visual lengths
    N_LAYERS, D_FF = 2, 256
    TQ = 16                     # query tile -> grid (T//TQ,) "parallel"

    key = jax.random.PRNGKey(0)
    k_x, k_t, k_v, k_p = jax.random.split(key, 4)

    x = jax.random.normal(k_x, (B, T, D), jnp.float32)
    proto_text = jax.random.normal(k_t, (B, Lt, D), jnp.float32)
    proto_visual = jax.random.normal(k_v, (B, Lv, D), jnp.float32)

    # masks follow torch semantics: 1 = attend, 0 = masked_fill(-1e9)
    multimodal_mask = jnp.tril(jnp.ones((T, T), jnp.float32))[None].repeat(B, 0)
    text2c_mask = jnp.ones((B, T, Lt), jnp.float32)
    visual2c_mask = jnp.ones((B, T, Lv), jnp.float32)

    params = init_params(k_p, N_LAYERS, D, D_FF)

    out = decoder_multimodal_forward(
        params, x, proto_text, proto_visual,
        text2c_mask, visual2c_mask, multimodal_mask, tq=TQ)
    out = jax.block_until_ready(out)

    assert out.shape == (B, T, D)
    assert out.dtype == jnp.float32
    assert bool(jnp.all(jnp.isfinite(out)))
    print("KERNEL_OK")
</pallas_src>

<mosaic_0001>
module attributes {stable_mosaic.version = 11 : i64} {
  func.func @_decoder_layer_kernel(%arg0: i32, %arg1: memref<2xi32, #tpu.memory_space<smem>>, %arg2: memref<2xi32, #tpu.memory_space<smem>>, %arg3: memref<2x32x128xf32, #tpu.memory_space<vmem>>, %arg4: memref<2x16x128xf32, #tpu.memory_space<vmem>>, %arg5: memref<2x8x128xbf16, #tpu.memory_space<vmem>>, %arg6: memref<2x16x128xbf16, #tpu.memory_space<vmem>>, %arg7: memref<128x128xbf16, #tpu.memory_space<vmem>>, %arg8: memref<128x256xbf16, #tpu.memory_space<vmem>>, %arg9: memref<128x128xbf16, #tpu.memory_space<vmem>>, %arg10: memref<128x128xbf16, #tpu.memory_space<vmem>>, %arg11: memref<128x256xbf16, #tpu.memory_space<vmem>>, %arg12: memref<128x128xbf16, #tpu.memory_space<vmem>>, %arg13: memref<128x128xbf16, #tpu.memory_space<vmem>>, %arg14: memref<128x256xbf16, #tpu.memory_space<vmem>>, %arg15: memref<128x128xbf16, #tpu.memory_space<vmem>>, %arg16: memref<128x256xbf16, #tpu.memory_space<vmem>>, %arg17: memref<1x256xf32, #tpu.memory_space<vmem>>, %arg18: memref<256x128xbf16, #tpu.memory_space<vmem>>, %arg19: memref<1x128xf32, #tpu.memory_space<vmem>>, %arg20: memref<1x128xf32, #tpu.memory_space<vmem>>, %arg21: memref<1x128xf32, #tpu.memory_space<vmem>>, %arg22: memref<1x128xf32, #tpu.memory_space<vmem>>, %arg23: memref<1x128xf32, #tpu.memory_space<vmem>>, %arg24: memref<1x128xf32, #tpu.memory_space<vmem>>, %arg25: memref<1x128xf32, #tpu.memory_space<vmem>>, %arg26: memref<1x128xf32, #tpu.memory_space<vmem>>, %arg27: memref<1x128xf32, #tpu.memory_space<vmem>>, %arg28: memref<1x128xf32, #tpu.memory_space<vmem>>, %arg29: memref<1x128xf32, #tpu.memory_space<vmem>>, %arg30: memref<2x16x128xbf16, #tpu.memory_space<vmem>>) attributes {dimension_semantics = [#tpu.dimension_semantics<parallel>], iteration_bounds = array<i64: 2>, scalar_prefetch = 2 : i64, scratch_operands = 0 : i64, tpu.core_type = #tpu.core_type<tc>, window_params = [{pipeline_mode = #tpu.pipeline_mode<synchronous>, transform_indices = @transform_0, window_bounds = array<i64: 2, 32, 128>}, {transform_indices = @transform_1, window_bounds = array<i64: 2, 16, 128>}, {pipeline_mode = #tpu.pipeline_mode<synchronous>, transform_indices = @transform_2, window_bounds = array<i64: 2, 8, 128>}, {pipeline_mode = #tpu.pipeline_mode<synchronous>, transform_indices = @transform_3, window_bounds = array<i64: 2, 16, 128>}, {pipeline_mode = #tpu.pipeline_mode<synchronous>, transform_indices = @transform_4, window_bounds = array<i64: 128, 128>}, {pipeline_mode = #tpu.pipeline_mode<synchronous>, transform_indices = @transform_5, window_bounds = array<i64: 128, 256>}, {pipeline_mode = #tpu.pipeline_mode<synchronous>, transform_indices = @transform_6, window_bounds = array<i64: 128, 128>}, {pipeline_mode = #tpu.pipeline_mode<synchronous>, transform_indices = @transform_7, window_bounds = array<i64: 128, 128>}, {pipeline_mode = #tpu.pipeline_mode<synchronous>, transform_indices = @transform_8, window_bounds = array<i64: 128, 256>}, {pipeline_mode = #tpu.pipeline_mode<synchronous>, transform_indices = @transform_9, window_bounds = array<i64: 128, 128>}, {pipeline_mode = #tpu.pipeline_mode<synchronous>, transform_indices = @transform_10, window_bounds = array<i64: 128, 128>}, {pipeline_mode = #tpu.pipeline_mode<synchronous>, transform_indices = @transform_11, window_bounds = array<i64: 128, 256>}, {pipeline_mode = #tpu.pipeline_mode<synchronous>, transform_indices = @transform_12, window_bounds = array<i64: 128, 128>}, {pipeline_mode = #tpu.pipeline_mode<synchronous>, transform_indices = @transform_13, window_bounds = array<i64: 128, 256>}, {pipeline_mode = #tpu.pipeline_mode<synchronous>, transform_indices = @transform_14, window_bounds = array<i64: 1, 256>}, {pipeline_mode = #tpu.pipeline_mode<synchronous>, transform_indices = @transform_15, window_bounds = array<i64: 256, 128>}, {pipeline_mode = #tpu.pipeline_mode<synchronous>, transform_indices = @transform_16, window_bounds = array<i64: 1, 128>}, {pipeline_mode = #tpu.pipeline_mode<synchronous>, transform_indices = @transform_17, window_bounds = array<i64: 1, 128>}, {pipeline_mode = #tpu.pipeline_mode<synchronous>, transform_indices = @transform_18, window_bounds = array<i64: 1, 128>}, {pipeline_mode = #tpu.pipeline_mode<synchronous>, transform_indices = @transform_19, window_bounds = array<i64: 1, 128>}, {pipeline_mode = #tpu.pipeline_mode<synchronous>, transform_indices = @transform_20, window_bounds = array<i64: 1, 128>}, {pipeline_mode = #tpu.pipeline_mode<synchronous>, transform_indices = @transform_21, window_bounds = array<i64: 1, 128>}, {pipeline_mode = #tpu.pipeline_mode<synchronous>, transform_indices = @transform_22, window_bounds = array<i64: 1, 128>}, {pipeline_mode = #tpu.pipeline_mode<synchronous>, transform_indices = @transform_23, window_bounds = array<i64: 1, 128>}, {pipeline_mode = #tpu.pipeline_mode<synchronous>, transform_indices = @transform_24, window_bounds = array<i64: 1, 128>}, {pipeline_mode = #tpu.pipeline_mode<synchronous>, transform_indices = @transform_25, window_bounds = array<i64: 1, 128>}, {pipeline_mode = #tpu.pipeline_mode<synchronous>, transform_indices = @transform_26, window_bounds = array<i64: 1, 128>}, {transform_indices = @transform_27, window_bounds = array<i64: 2, 16, 128>}]} {
    %c16_i32 = arith.constant 16 : i32
    %0 = arith.muli %arg0, %c16_i32 : i32
    %c0 = arith.constant 0 : index
    %c0_0 = arith.constant 0 : index
    %c0_1 = arith.constant 0 : index
    %1 = vector.load %arg3[%c0, %c0_0, %c0_1] : memref<2x32x128xf32, #tpu.memory_space<vmem>>, vector<2x32x128xf32>
    %c0_2 = arith.constant 0 : index
    %c0_3 = arith.constant 0 : index
    %c0_4 = arith.constant 0 : index
    %2 = vector.load %arg4[%c0_2, %c0_3, %c0_4] : memref<2x16x128xf32, #tpu.memory_space<vmem>>, vector<2x16x128xf32>
    %c0_5 = arith.constant 0 : index
    %c0_6 = arith.constant 0 : index
    %3 = vector.load %arg20[%c0_5, %c0_6] : memref<1x128xf32, #tpu.memory_space<vmem>>, vector<1x128xf32>
    %c0_7 = arith.constant 0 : index
    %c0_8 = arith.constant 0 : index
    %4 = vector.load %arg21[%c0_7, %c0_8] : memref<1x128xf32, #tpu.memory_space<vmem>>, vector<1x128xf32>
    %cst = arith.constant dense<0.000000e+00> : vector<2x32xf32>
    %5 = vector.multi_reduction <add>, %1, %cst [2] : vector<2x32x128xf32> to vector<2x32xf32>
    %6 = vector.shape_cast %5 : vector<2x32xf32> to vector<2x32x1xf32>
    %cst_9 = arith.constant 1.280000e+02 : f32
    %7 = vector.broadcast %cst_9 : f32 to vector<2x32x1xf32>
    %8 = arith.divf %6, %7 : vector<2x32x1xf32>
    %9 = vector.broadcast %8 : vector<2x32x1xf32> to vector<2x32x128xf32>
    %10 = arith.subf %1, %9 : vector<2x32x128xf32>
    %11 = arith.mulf %10, %10 : vector<2x32x128xf32>
    %cst_10 = arith.constant dense<0.000000e+00> : vector<2x32xf32>
    %12 = vector.multi_reduction <add>, %11, %cst_10 [2] : vector<2x32x128xf32> to vector<2x32xf32>
    %13 = vector.shape_cast %12 : vector<2x32xf32> to vector<2x32x1xf32>
    %cst_11 = arith.constant 1.270000e+02 : f32
    %14 = vector.broadcast %cst_11 : f32 to vector<2x32x1xf32>
    %15 = arith.divf %13, %14 : vector<2x32x1xf32>
    %16 = math.sqrt %15 : vector<2x32x1xf32>
    %17 = vector.shape_cast %3 : vector<1x128xf32> to vector<1x1x128xf32>
    %18 = vector.broadcast %17 : vector<1x1x128xf32> to vector<2x32x128xf32>
    %19 = arith.mulf %18, %10 : vector<2x32x128xf32>
    %cst_12 = arith.constant 9.99999997E-7 : f32
    %20 = vector.broadcast %cst_12 : f32 to vector<2x32x1xf32>
    %21 = arith.addf %16, %20 : vector<2x32x1xf32>
    %22 = vector.broadcast %21 : vector<2x32x1xf32> to vector<2x32x128xf32>
    %23 = arith.divf %19, %22 : vector<2x32x128xf32>
    %24 = vector.shape_cast %4 : vector<1x128xf32> to vector<1x1x128xf32>
    %25 = vector.broadcast %24 : vector<1x1x128xf32> to vector<2x32x128xf32>
    %26 = arith.addf %23, %25 : vector<2x32x128xf32>
    %c0_13 = arith.constant 0 : index
    %c0_14 = arith.constant 0 : index
    %27 = vector.load %arg20[%c0_13, %c0_14] : memref<1x128xf32, #tpu.memory_space<vmem>>, vector<1x128xf32>
    %c0_15 = arith.constant 0 : index
    %c0_16 = arith.constant 0 : index
    %28 = vector.load %arg21[%c0_15, %c0_16] : memref<1x128xf32, #tpu.memory_space<vmem>>, vector<1x128xf32>
    %cst_17 = arith.constant dense<0.000000e+00> : vector<2x16xf32>
    %29 = vector.multi_reduction <add>, %2, %cst_17 [2] : vector<2x16x128xf32> to vector<2x16xf32>
    %30 = vector.shape_cast %29 : vector<2x16xf32> to vector<2x16x1xf32>
    %cst_18 = arith.constant 1.280000e+02 : f32
    %31 = vector.broadcast %cst_18 : f32 to vector<2x16x1xf32>
    %32 = arith.divf %30, %31 : vector<2x16x1xf32>
    %33 = vector.broadcast %32 : vector<2x16x1xf32> to vector<2x16x128xf32>
    %34 = arith.subf %2, %33 : vector<2x16x128xf32>
    %35 = arith.mulf %34, %34 : vector<2x16x128xf32>
    %cst_19 = arith.constant dense<0.000000e+00> : vector<2x16xf32>
    %36 = vector.multi_reduction <add>, %35, %cst_19 [2] : vector<2x16x128xf32> to vector<2x16xf32>
    %37 = vector.shape_cast %36 : vector<2x16xf32> to vector<2x16x1xf32>
    %cst_20 = arith.constant 1.270000e+02 : f32
    %38 = vector.broadcast %cst_20 : f32 to vector<2x16x1xf32>
    %39 = arith.divf %37, %38 : vector<2x16x1xf32>
    %40 = math.sqrt %39 : vector<2x16x1xf32>
    %41 = vector.shape_cast %27 : vector<1x128xf32> to vector<1x1x128xf32>
    %42 = vector.broadcast %41 : vector<1x1x128xf32> to vector<2x16x128xf32>
    %43 = arith.mulf %42, %34 : vector<2x16x128xf32>
    %cst_21 = arith.constant 9.99999997E-7 : f32
    %44 = vector.broadcast %cst_21 : f32 to vector<2x16x1xf32>
    %45 = arith.addf %40, %44 : vector<2x16x1xf32>
    %46 = vector.broadcast %45 : vector<2x16x1xf32> to vector<2x16x128xf32>
    %47 = arith.divf %43, %46 : vector<2x16x128xf32>
    %48 = vector.shape_cast %28 : vector<1x128xf32> to vector<1x1x128xf32>
    %49 = vector.broadcast %48 : vector<1x1x128xf32> to vector<2x16x128xf32>
    %50 = arith.addf %47, %49 : vector<2x16x128xf32>
    %51 = vector.shape_cast %50 : vector<2x16x128xf32> to vector<32x128xf32>
    %52 = arith.truncf %51 : vector<32x128xf32> to vector<32x128xbf16>
    %c0_22 = arith.constant 0 : index
    %c0_23 = arith.constant 0 : index
    %53 = vector.load %arg7[%c0_22, %c0_23] : memref<128x128xbf16, #tpu.memory_space<vmem>>, vector<128x128xbf16>
    %cst_24 = arith.constant dense<0.000000e+00> : vector<32x128xf32>
    %54 = tpu.matmul %52, %53, %cst_24 {dimension_numbers = #tpu.dot_dimension_numbers<[1], [0], [0], [1], [0, 0, 1, 1], [], []>} : vector<32x128xbf16>, vector<128x128xbf16>, vector<32x128xf32> -> vector<32x128xf32>
    %55 = vector.shape_cast %54 : vector<32x128xf32> to vector<2x16x128xf32>
    %56 = vector.shape_cast %26 : vector<2x32x128xf32> to vector<64x128xf32>
    %57 = arith.truncf %56 : vector<64x128xf32> to vector<64x128xbf16>
    %c0_25 = arith.constant 0 : index
    %c0_26 = arith.constant 0 : index
    %58 = vector.load %arg8[%c0_25, %c0_26] : memref<128x256xbf16, #tpu.memory_space<vmem>>, vector<128x256xbf16>
    %cst_27 = arith.constant dense<0.000000e+00> : vector<64x256xf32>
    %59 = tpu.matmul %57, %58, %cst_27 {dimension_numbers = #tpu.dot_dimension_numbers<[1], [0], [0], [1], [0, 0, 1, 1], [], []>} : vector<64x128xbf16>, vector<128x256xbf16>, vector<64x256xf32> -> vector<64x256xf32>
    %60 = vector.extract_strided_slice %59 {offsets = [0, 0], sizes = [64, 128], strides = [1, 1]} : vector<64x256xf32> to vector<64x128xf32>
    %61 = vector.shape_cast %60 : vector<64x128xf32> to vector<2x32x128xf32>
    %62 = vector.extract_strided_slice %59 {offsets = [0, 128], sizes = [64, 128], strides = [1, 1]} : vector<64x256xf32> to vector<64x128xf32>
    %63 = vector.shape_cast %62 : vector<64x128xf32> to vector<2x32x128xf32>
    %64 = arith.truncf %55 : vector<2x16x128xf32> to vector<2x16x128xbf16>
    %65 = arith.truncf %61 : vector<2x32x128xf32> to vector<2x32x128xbf16>
    "tpu.trace_start"() <{level = 10 : i32, message = "bqd,bkd->bqk"}> : () -> ()
    %cst_28 = arith.constant dense<0.000000e+00> : vector<2x16x32xf32>
    %66 = tpu.matmul %64, %65, %cst_28 {dimension_numbers = #tpu.dot_dimension_numbers<[2], [2], [1], [1], [0, 0, 0, 1, 1, 1], [0], [0]>} : vector<2x16x128xbf16>, vector<2x32x128xbf16>, vector<2x16x32xf32> -> vector<2x16x32xf32>
    "tpu.trace_stop"() : () -> ()
    %cst_29 = arith.constant 0.0883883461 : f32
    %67 = vector.broadcast %cst_29 : f32 to vector<2x16x32xf32>
    %68 = arith.mulf %66, %67 : vector<2x16x32xf32>
    %69 = tpu.iota {dimensions = array<i32: 0>} : vector<16x32xi32>
    %70 = vector.broadcast %0 : i32 to vector<16x32xi32>
    %71 = arith.addi %70, %69 : vector<16x32xi32>
    %72 = tpu.iota {dimensions = array<i32: 1>} : vector<16x32xi32>
    %73 = arith.cmpi sle, %72, %71 : vector<16x32xi32>
    %74 = vector.shape_cast %73 : vector<16x32xi1> to vector<1x16x32xi1>
    %cst_30 = arith.constant -1.000000e+09 : f32
    %75 = vector.shape_cast %74 : vector<1x16x32xi1> to vector<1x16x32xi1>
    %76 = vector.broadcast %75 : vector<1x16x32xi1> to vector<2x16x32xi1>
    %77 = vector.broadcast %cst_30 : f32 to vector<2x16x32xf32>
    %78 = arith.select %76, %68, %77 : vector<2x16x32xi1>, vector<2x16x32xf32>
    %cst_31 = arith.constant dense<0xFF800000> : vector<2x16xf32>
    %79 = vector.multi_reduction <maximumf>, %78, %cst_31 [2] : vector<2x16x32xf32> to vector<2x16xf32>
    %80 = vector.shape_cast %79 : vector<2x16xf32> to vector<2x16x1xf32>
    %81 = vector.broadcast %80 : vector<2x16x1xf32> to vector<2x16x32xf32>
    %82 = arith.subf %78, %81 : vector<2x16x32xf32>
    %83 = math.exp %82 : vector<2x16x32xf32>
    %cst_32 = arith.constant dense<0.000000e+00> : vector<2x16xf32>
    %84 = vector.multi_reduction <add>, %83, %cst_32 [2] : vector<2x16x32xf32> to vector<2x16xf32>
    %85 = vector.shape_cast %84 : vector<2x16xf32> to vector<2x16x1xf32>
    %86 = tpu.reciprocal %85 {approx = true} : vector<2x16x1xf32> -> vector<2x16x1xf32>
    %87 = vector.broadcast %86 : vector<2x16x1xf32> to vector<2x16x32xf32>
    %88 = arith.mulf %83, %87 : vector<2x16x32xf32>
    %89 = arith.truncf %88 : vector<2x16x32xf32> to vector<2x16x32xbf16>
    %90 = arith.truncf %63 : vector<2x32x128xf32> to vector<2x32x128xbf16>
    "tpu.trace_start"() <{level = 10 : i32, message = "bqk,bkd->bqd"}> : () -> ()
    %cst_33 = arith.constant dense<0.000000e+00> : vector<2x16x128xf32>
    %91 = tpu.matmul %89, %90, %cst_33 {dimension_numbers = #tpu.dot_dimension_numbers<[2], [1], [1], [2], [0, 0, 0, 1, 1, 2], [0], [0]>} : vector<2x16x32xbf16>, vector<2x32x128xbf16>, vector<2x16x128xf32> -> vector<2x16x128xf32>
    "tpu.trace_stop"() : () -> ()
    %92 = vector.shape_cast %91 : vector<2x16x128xf32> to vector<32x128xf32>
    %93 = arith.truncf %92 : vector<32x128xf32> to vector<32x128xbf16>
    %c0_34 = arith.constant 0 : index
    %c0_35 = arith.constant 0 : index
    %94 = vector.load %arg9[%c0_34, %c0_35] : memref<128x128xbf16, #tpu.memory_space<vmem>>, vector<128x128xbf16>
    %cst_36 = arith.constant dense<0.000000e+00> : vector<32x128xf32>
    %95 = tpu.matmul %93, %94, %cst_36 {dimension_numbers = #tpu.dot_dimension_numbers<[1], [0], [0], [1], [0, 0, 1, 1], [], []>} : vector<32x128xbf16>, vector<128x128xbf16>, vector<32x128xf32> -> vector<32x128xf32>
    %96 = vector.shape_cast %95 : vector<32x128xf32> to vector<2x16x128xf32>
    %97 = arith.addf %2, %96 : vector<2x16x128xf32>
    %c0_37 = arith.constant 0 : index
    %c0_38 = arith.constant 0 : index
    %98 = vector.load %arg22[%c0_37, %c0_38] : memref<1x128xf32, #tpu.memory_space<vmem>>, vector<1x128xf32>
    %c0_39 = arith.constant 0 : index
    %c0_40 = arith.constant 0 : index
    %99 = vector.load %arg23[%c0_39, %c0_40] : memref<1x128xf32, #tpu.memory_space<vmem>>, vector<1x128xf32>
    %cst_41 = arith.constant dense<0.000000e+00> : vector<2x16xf32>
    %100 = vector.multi_reduction <add>, %97, %cst_41 [2] : vector<2x16x128xf32> to vector<2x16xf32>
    %101 = vector.shape_cast %100 : vector<2x16xf32> to vector<2x16x1xf32>
    %cst_42 = arith.constant 1.280000e+02 : f32
    %102 = vector.broadcast %cst_42 : f32 to vector<2x16x1xf32>
    %103 = arith.divf %101, %102 : vector<2x16x1xf32>
    %104 = vector.broadcast %103 : vector<2x16x1xf32> to vector<2x16x128xf32>
    %105 = arith.subf %97, %104 : vector<2x16x128xf32>
    %106 = arith.mulf %105, %105 : vector<2x16x128xf32>
    %cst_43 = arith.constant dense<0.000000e+00> : vector<2x16xf32>
    %107 = vector.multi_reduction <add>, %106, %cst_43 [2] : vector<2x16x128xf32> to vector<2x16xf32>
    %108 = vector.shape_cast %107 : vector<2x16xf32> to vector<2x16x1xf32>
    %cst_44 = arith.constant 1.270000e+02 : f32
    %109 = vector.broadcast %cst_44 : f32 to vector<2x16x1xf32>
    %110 = arith.divf %108, %109 : vector<2x16x1xf32>
    %111 = math.sqrt %110 : vector<2x16x1xf32>
    %112 = vector.shape_cast %98 : vector<1x128xf32> to vector<1x1x128xf32>
    %113 = vector.broadcast %112 : vector<1x1x128xf32> to vector<2x16x128xf32>
    %114 = arith.mulf %113, %105 : vector<2x16x128xf32>
    %cst_45 = arith.constant 9.99999997E-7 : f32
    %115 = vector.broadcast %cst_45 : f32 to vector<2x16x1xf32>
    %116 = arith.addf %111, %115 : vector<2x16x1xf32>
    %117 = vector.broadcast %116 : vector<2x16x1xf32> to vector<2x16x128xf32>
    %118 = arith.divf %114, %117 : vector<2x16x128xf32>
    %119 = vector.shape_cast %99 : vector<1x128xf32> to vector<1x1x128xf32>
    %120 = vector.broadcast %119 : vector<1x1x128xf32> to vector<2x16x128xf32>
    %121 = arith.addf %118, %120 : vector<2x16x128xf32>
    %122 = vector.shape_cast %121 : vector<2x16x128xf32> to vector<32x128xf32>
    %123 = arith.truncf %122 : vector<32x128xf32> to vector<32x128xbf16>
    %c0_46 = arith.constant 0 : index
    %c0_47 = arith.constant 0 : index
    %124 = vector.load %arg10[%c0_46, %c0_47] : memref<128x128xbf16, #tpu.memory_space<vmem>>, vector<128x128xbf16>
    %cst_48 = arith.constant dense<0.000000e+00> : vector<32x128xf32>
    %125 = tpu.matmul %123, %124, %cst_48 {dimension_numbers = #tpu.dot_dimension_numbers<[1], [0], [0], [1], [0, 0, 1, 1], [], []>} : vector<32x128xbf16>, vector<128x128xbf16>, vector<32x128xf32> -> vector<32x128xf32>
    %126 = vector.shape_cast %125 : vector<32x128xf32> to vector<2x16x128xf32>
    %c0_49 = arith.constant 0 : index
    %c0_50 = arith.constant 0 : index
    %c0_51 = arith.constant 0 : index
    %127 = vector.load %arg5[%c0_49, %c0_50, %c0_51] : memref<2x8x128xbf16, #tpu.memory_space<vmem>>, vector<2x8x128xbf16>
    %128 = vector.shape_cast %127 : vector<2x8x128xbf16> to vector<16x128xbf16>
    %c0_52 = arith.constant 0 : index
    %c0_53 = arith.constant 0 : index
    %129 = vector.load %arg11[%c0_52, %c0_53] : memref<128x256xbf16, #tpu.memory_space<vmem>>, vector<128x256xbf16>
    %cst_54 = arith.constant dense<0.000000e+00> : vector<16x256xf32>
    %130 = tpu.matmul %128, %129, %cst_54 {dimension_numbers = #tpu.dot_dimension_numbers<[1], [0], [0], [1], [0, 0, 1, 1], [], []>} : vector<16x128xbf16>, vector<128x256xbf16>, vector<16x256xf32> -> vector<16x256xf32>
    %131 = vector.extract_strided_slice %130 {offsets = [0, 0], sizes = [16, 128], strides = [1, 1]} : vector<16x256xf32> to vector<16x128xf32>
    %132 = vector.shape_cast %131 : vector<16x128xf32> to vector<2x8x128xf32>
    %133 = vector.extract_strided_slice %130 {offsets = [0, 128], sizes = [16, 128], strides = [1, 1]} : vector<16x256xf32> to vector<16x128xf32>
    %134 = vector.shape_cast %133 : vector<16x128xf32> to vector<2x8x128xf32>
    %135 = arith.truncf %126 : vector<2x16x128xf32> to vector<2x16x128xbf16>
    %136 = arith.truncf %132 : vector<2x8x128xf32> to vector<2x8x128xbf16>
    "tpu.trace_start"() <{level = 10 : i32, message = "bqd,bkd->bqk"}> : () -> ()
    %cst_55 = arith.constant dense<0.000000e+00> : vector<2x16x8xf32>
    %137 = tpu.matmul %135, %136, %cst_55 {dimension_numbers = #tpu.dot_dimension_numbers<[2], [2], [1], [1], [0, 0, 0, 1, 1, 1], [0], [0]>} : vector<2x16x128xbf16>, vector<2x8x128xbf16>, vector<2x16x8xf32> -> vector<2x16x8xf32>
    "tpu.trace_stop"() : () -> ()
    %cst_56 = arith.constant 0.0883883461 : f32
    %138 = vector.broadcast %cst_56 : f32 to vector<2x16x8xf32>
    %139 = arith.mulf %137, %138 : vector<2x16x8xf32>
    %140 = tpu.iota {dimensions = array<i32: 1>} : vector<16x8xi32>
    %c0_57 = arith.constant 0 : index
    %141 = memref.load %arg1[%c0_57] : memref<2xi32, #tpu.memory_space<smem>>
    %142 = vector.broadcast %141 : i32 to vector<16x8xi32>
    %143 = arith.cmpi slt, %140, %142 : vector<16x8xi32>
    %144 = vector.extract_strided_slice %139 {offsets = [0, 0, 0], sizes = [1, 16, 8], strides = [1, 1, 1]} : vector<2x16x8xf32> to vector<1x16x8xf32>
    %145 = vector.shape_cast %144 : vector<1x16x8xf32> to vector<16x8xf32>
    %cst_58 = arith.constant -1.000000e+09 : f32
    %146 = vector.broadcast %cst_58 : f32 to vector<16x8xf32>
    %147 = arith.select %143, %145, %146 : vector<16x8xi1>, vector<16x8xf32>
    %c1 = arith.constant 1 : index
    %148 = memref.load %arg1[%c1] : memref<2xi32, #tpu.memory_space<smem>>
    %149 = vector.broadcast %148 : i32 to vector<16x8xi32>
    %150 = arith.cmpi slt, %140, %149 : vector<16x8xi32>
    %151 = vector.extract_strided_slice %139 {offsets = [1, 0, 0], sizes = [1, 16, 8], strides = [1, 1, 1]} : vector<2x16x8xf32> to vector<1x16x8xf32>
    %152 = vector.shape_cast %151 : vector<1x16x8xf32> to vector<16x8xf32>
    %cst_59 = arith.constant -1.000000e+09 : f32
    %153 = vector.broadcast %cst_59 : f32 to vector<16x8xf32>
    %154 = arith.select %150, %152, %153 : vector<16x8xi1>, vector<16x8xf32>
    %155 = vector.shape_cast %147 : vector<16x8xf32> to vector<1x16x8xf32>
    %156 = vector.shape_cast %154 : vector<16x8xf32> to vector<1x16x8xf32>
    %157 = tpu.concatenate %155, %156 in 0 : vector<1x16x8xf32>, vector<1x16x8xf32> -> vector<2x16x8xf32>
    %cst_60 = arith.constant dense<0xFF800000> : vector<2x16xf32>
    %158 = vector.multi_reduction <maximumf>, %157, %cst_60 [2] : vector<2x16x8xf32> to vector<2x16xf32>
    %159 = vector.shape_cast %158 : vector<2x16xf32> to vector<2x16x1xf32>
    %160 = vector.broadcast %159 : vector<2x16x1xf32> to vector<2x16x8xf32>
    %161 = arith.subf %157, %160 : vector<2x16x8xf32>
    %162 = math.exp %161 : vector<2x16x8xf32>
    %cst_61 = arith.constant dense<0.000000e+00> : vector<2x16xf32>
    %163 = vector.multi_reduction <add>, %162, %cst_61 [2] : vector<2x16x8xf32> to vector<2x16xf32>
    %164 = vector.shape_cast %163 : vector<2x16xf32> to vector<2x16x1xf32>
    %165 = tpu.reciprocal %164 {approx = true} : vector<2x16x1xf32> -> vector<2x16x1xf32>
    %166 = vector.broadcast %165 : vector<2x16x1xf32> to vector<2x16x8xf32>
    %167 = arith.mulf %162, %166 : vector<2x16x8xf32>
    %168 = arith.truncf %167 : vector<2x16x8xf32> to vector<2x16x8xbf16>
    %169 = arith.truncf %134 : vector<2x8x128xf32> to vector<2x8x128xbf16>
    "tpu.trace_start"() <{level = 10 : i32, message = "bqk,bkd->bqd"}> : () -> ()
    %cst_62 = arith.constant dense<0.000000e+00> : vector<2x16x128xf32>
    %170 = tpu.matmul %168, %169, %cst_62 {dimension_numbers = #tpu.dot_dimension_numbers<[2], [1], [1], [2], [0, 0, 0, 1, 1, 2], [0], [0]>} : vector<2x16x8xbf16>, vector<2x8x128xbf16>, vector<2x16x128xf32> -> vector<2x16x128xf32>
    "tpu.trace_stop"() : () -> ()
    %171 = vector.shape_cast %170 : vector<2x16x128xf32> to vector<32x128xf32>
    %172 = arith.truncf %171 : vector<32x128xf32> to vector<32x128xbf16>
    %c0_63 = arith.constant 0 : index
    %c0_64 = arith.constant 0 : index
    %173 = vector.load %arg12[%c0_63, %c0_64] : memref<128x128xbf16, #tpu.memory_space<vmem>>, vector<128x128xbf16>
    %cst_65 = arith.constant dense<0.000000e+00> : vector<32x128xf32>
    %174 = tpu.matmul %172, %173, %cst_65 {dimension_numbers = #tpu.dot_dimension_numbers<[1], [0], [0], [1], [0, 0, 1, 1], [], []>} : vector<32x128xbf16>, vector<128x128xbf16>, vector<32x128xf32> -> vector<32x128xf32>
    %175 = vector.shape_cast %174 : vector<32x128xf32> to vector<2x16x128xf32>
    %176 = arith.addf %97, %175 : vector<2x16x128xf32>
    %c0_66 = arith.constant 0 : index
    %c0_67 = arith.constant 0 : index
    %177 = vector.load %arg24[%c0_66, %c0_67] : memref<1x128xf32, #tpu.memory_space<vmem>>, vector<1x128xf32>
    %c0_68 = arith.constant 0 : index
    %c0_69 = arith.constant 0 : index
    %178 = vector.load %arg25[%c0_68, %c0_69] : memref<1x128xf32, #tpu.memory_space<vmem>>, vector<1x128xf32>
    %cst_70 = arith.constant dense<0.000000e+00> : vector<2x16xf32>
    %179 = vector.multi_reduction <add>, %176, %cst_70 [2] : vector<2x16x128xf32> to vector<2x16xf32>
    %180 = vector.shape_cast %179 : vector<2x16xf32> to vector<2x16x1xf32>
    %cst_71 = arith.constant 1.280000e+02 : f32
    %181 = vector.broadcast %cst_71 : f32 to vector<2x16x1xf32>
    %182 = arith.divf %180, %181 : vector<2x16x1xf32>
    %183 = vector.broadcast %182 : vector<2x16x1xf32> to vector<2x16x128xf32>
    %184 = arith.subf %176, %183 : vector<2x16x128xf32>
    %185 = arith.mulf %184, %184 : vector<2x16x128xf32>
    %cst_72 = arith.constant dense<0.000000e+00> : vector<2x16xf32>
    %186 = vector.multi_reduction <add>, %185, %cst_72 [2] : vector<2x16x128xf32> to vector<2x16xf32>
    %187 = vector.shape_cast %186 : vector<2x16xf32> to vector<2x16x1xf32>
    %cst_73 = arith.constant 1.270000e+02 : f32
    %188 = vector.broadcast %cst_73 : f32 to vector<2x16x1xf32>
    %189 = arith.divf %187, %188 : vector<2x16x1xf32>
    %190 = math.sqrt %189 : vector<2x16x1xf32>
    %191 = vector.shape_cast %177 : vector<1x128xf32> to vector<1x1x128xf32>
    %192 = vector.broadcast %191 : vector<1x1x128xf32> to vector<2x16x128xf32>
    %193 = arith.mulf %192, %184 : vector<2x16x128xf32>
    %cst_74 = arith.constant 9.99999997E-7 : f32
    %194 = vector.broadcast %cst_74 : f32 to vector<2x16x1xf32>
    %195 = arith.addf %190, %194 : vector<2x16x1xf32>
    %196 = vector.broadcast %195 : vector<2x16x1xf32> to vector<2x16x128xf32>
    %197 = arith.divf %193, %196 : vector<2x16x128xf32>
    %198 = vector.shape_cast %178 : vector<1x128xf32> to vector<1x1x128xf32>
    %199 = vector.broadcast %198 : vector<1x1x128xf32> to vector<2x16x128xf32>
    %200 = arith.addf %197, %199 : vector<2x16x128xf32>
    %201 = vector.shape_cast %200 : vector<2x16x128xf32> to vector<32x128xf32>
    %202 = arith.truncf %201 : vector<32x128xf32> to vector<32x128xbf16>
    %c0_75 = arith.constant 0 : index
    %c0_76 = arith.constant 0 : index
    %203 = vector.load %arg13[%c0_75, %c0_76] : memref<128x128xbf16, #tpu.memory_space<vmem>>, vector<128x128xbf16>
    %cst_77 = arith.constant dense<0.000000e+00> : vector<32x128xf32>
    %204 = tpu.matmul %202, %203, %cst_77 {dimension_numbers = #tpu.dot_dimension_numbers<[1], [0], [0], [1], [0, 0, 1, 1], [], []>} : vector<32x128xbf16>, vector<128x128xbf16>, vector<32x128xf32> -> vector<32x128xf32>
    %205 = vector.shape_cast %204 : vector<32x128xf32> to vector<2x16x128xf32>
    %c0_78 = arith.constant 0 : index
    %c0_79 = arith.constant 0 : index
    %c0_80 = arith.constant 0 : index
    %206 = vector.load %arg6[%c0_78, %c0_79, %c0_80] : memref<2x16x128xbf16, #tpu.memory_space<vmem>>, vector<2x16x128xbf16>
    %207 = vector.shape_cast %206 : vector<2x16x128xbf16> to vector<32x128xbf16>
    %c0_81 = arith.constant 0 : index
    %c0_82 = arith.constant 0 : index
    %208 = vector.load %arg14[%c0_81, %c0_82] : memref<128x256xbf16, #tpu.memory_space<vmem>>, vector<128x256xbf16>
    %cst_83 = arith.constant dense<0.000000e+00> : vector<32x256xf32>
    %209 = tpu.matmul %207, %208, %cst_83 {dimension_numbers = #tpu.dot_dimension_numbers<[1], [0], [0], [1], [0, 0, 1, 1], [], []>} : vector<32x128xbf16>, vector<128x256xbf16>, vector<32x256xf32> -> vector<32x256xf32>
    %210 = vector.extract_strided_slice %209 {offsets = [0, 0], sizes = [32, 128], strides = [1, 1]} : vector<32x256xf32> to vector<32x128xf32>
    %211 = vector.shape_cast %210 : vector<32x128xf32> to vector<2x16x128xf32>
    %212 = vector.extract_strided_slice %209 {offsets = [0, 128], sizes = [32, 128], strides = [1, 1]} : vector<32x256xf32> to vector<32x128xf32>
    %213 = vector.shape_cast %212 : vector<32x128xf32> to vector<2x16x128xf32>
    %214 = arith.truncf %205 : vector<2x16x128xf32> to vector<2x16x128xbf16>
    %215 = arith.truncf %211 : vector<2x16x128xf32> to vector<2x16x128xbf16>
    "tpu.trace_start"() <{level = 10 : i32, message = "bqd,bkd->bqk"}> : () -> ()
    %cst_84 = arith.constant dense<0.000000e+00> : vector<2x16x16xf32>
    %216 = tpu.matmul %214, %215, %cst_84 {dimension_numbers = #tpu.dot_dimension_numbers<[2], [2], [1], [1], [0, 0, 0, 1, 1, 1], [0], [0]>} : vector<2x16x128xbf16>, vector<2x16x128xbf16>, vector<2x16x16xf32> -> vector<2x16x16xf32>
    "tpu.trace_stop"() : () -> ()
    %cst_85 = arith.constant 0.0883883461 : f32
    %217 = vector.broadcast %cst_85 : f32 to vector<2x16x16xf32>
    %218 = arith.mulf %216, %217 : vector<2x16x16xf32>
    %219 = tpu.iota {dimensions = array<i32: 1>} : vector<16x16xi32>
    %c0_86 = arith.constant 0 : index
    %220 = memref.load %arg2[%c0_86] : memref<2xi32, #tpu.memory_space<smem>>
    %221 = vector.broadcast %220 : i32 to vector<16x16xi32>
    %222 = arith.cmpi slt, %219, %221 : vector<16x16xi32>
    %223 = vector.extract_strided_slice %218 {offsets = [0, 0, 0], sizes = [1, 16, 16], strides = [1, 1, 1]} : vector<2x16x16xf32> to vector<1x16x16xf32>
    %224 = vector.shape_cast %223 : vector<1x16x16xf32> to vector<16x16xf32>
    %cst_87 = arith.constant -1.000000e+09 : f32
    %225 = vector.broadcast %cst_87 : f32 to vector<16x16xf32>
    %226 = arith.select %222, %224, %225 : vector<16x16xi1>, vector<16x16xf32>
    %c1_88 = arith.constant 1 : index
    %227 = memref.load %arg2[%c1_88] : memref<2xi32, #tpu.memory_space<smem>>
    %228 = vector.broadcast %227 : i32 to vector<16x16xi32>
    %229 = arith.cmpi slt, %219, %228 : vector<16x16xi32>
    %230 = vector.extract_strided_slice %218 {offsets = [1, 0, 0], sizes = [1, 16, 16], strides = [1, 1, 1]} : vector<2x16x16xf32> to vector<1x16x16xf32>
    %231 = vector.shape_cast %230 : vector<1x16x16xf32> to vector<16x16xf32>
    %cst_89 = arith.constant -1.000000e+09 : f32
    %232 = vector.broadcast %cst_89 : f32 to vector<16x16xf32>
    %233 = arith.select %229, %231, %232 : vector<16x16xi1>, vector<16x16xf32>
    %234 = vector.shape_cast %226 : vector<16x16xf32> to vector<1x16x16xf32>
    %235 = vector.shape_cast %233 : vector<16x16xf32> to vector<1x16x16xf32>
    %236 = tpu.concatenate %234, %235 in 0 : vector<1x16x16xf32>, vector<1x16x16xf32> -> vector<2x16x16xf32>
    %cst_90 = arith.constant dense<0xFF800000> : vector<2x16xf32>
    %237 = vector.multi_reduction <maximumf>, %236, %cst_90 [2] : vector<2x16x16xf32> to vector<2x16xf32>
    %238 = vector.shape_cast %237 : vector<2x16xf32> to vector<2x16x1xf32>
    %239 = vector.broadcast %238 : vector<2x16x1xf32> to vector<2x16x16xf32>
    %240 = arith.subf %236, %239 : vector<2x16x16xf32>
    %241 = math.exp %240 : vector<2x16x16xf32>
    %cst_91 = arith.constant dense<0.000000e+00> : vector<2x16xf32>
    %242 = vector.multi_reduction <add>, %241, %cst_91 [2] : vector<2x16x16xf32> to vector<2x16xf32>
    %243 = vector.shape_cast %242 : vector<2x16xf32> to vector<2x16x1xf32>
    %244 = tpu.reciprocal %243 {approx = true} : vector<2x16x1xf32> -> vector<2x16x1xf32>
    %245 = vector.broadcast %244 : vector<2x16x1xf32> to vector<2x16x16xf32>
    %246 = arith.mulf %241, %245 : vector<2x16x16xf32>
    %247 = arith.truncf %246 : vector<2x16x16xf32> to vector<2x16x16xbf16>
    %248 = arith.truncf %213 : vector<2x16x128xf32> to vector<2x16x128xbf16>
    "tpu.trace_start"() <{level = 10 : i32, message = "bqk,bkd->bqd"}> : () -> ()
    %cst_92 = arith.constant dense<0.000000e+00> : vector<2x16x128xf32>
    %249 = tpu.matmul %247, %248, %cst_92 {dimension_numbers = #tpu.dot_dimension_numbers<[2], [1], [1], [2], [0, 0, 0, 1, 1, 2], [0], [0]>} : vector<2x16x16xbf16>, vector<2x16x128xbf16>, vector<2x16x128xf32> -> vector<2x16x128xf32>
    "tpu.trace_stop"() : () -> ()
    %250 = vector.shape_cast %249 : vector<2x16x128xf32> to vector<32x128xf32>
    %251 = arith.truncf %250 : vector<32x128xf32> to vector<32x128xbf16>
    %c0_93 = arith.constant 0 : index
    %c0_94 = arith.constant 0 : index
    %252 = vector.load %arg15[%c0_93, %c0_94] : memref<128x128xbf16, #tpu.memory_space<vmem>>, vector<128x128xbf16>
    %cst_95 = arith.constant dense<0.000000e+00> : vector<32x128xf32>
    %253 = tpu.matmul %251, %252, %cst_95 {dimension_numbers = #tpu.dot_dimension_numbers<[1], [0], [0], [1], [0, 0, 1, 1], [], []>} : vector<32x128xbf16>, vector<128x128xbf16>, vector<32x128xf32> -> vector<32x128xf32>
    %254 = vector.shape_cast %253 : vector<32x128xf32> to vector<2x16x128xf32>
    %255 = arith.addf %176, %254 : vector<2x16x128xf32>
    %c0_96 = arith.constant 0 : index
    %c0_97 = arith.constant 0 : index
    %256 = vector.load %arg26[%c0_96, %c0_97] : memref<1x128xf32, #tpu.memory_space<vmem>>, vector<1x128xf32>
    %c0_98 = arith.constant 0 : index
    %c0_99 = arith.constant 0 : index
    %257 = vector.load %arg27[%c0_98, %c0_99] : memref<1x128xf32, #tpu.memory_space<vmem>>, vector<1x128xf32>
    %cst_100 = arith.constant dense<0.000000e+00> : vector<2x16xf32>
    %258 = vector.multi_reduction <add>, %255, %cst_100 [2] : vector<2x16x128xf32> to vector<2x16xf32>
    %259 = vector.shape_cast %258 : vector<2x16xf32> to vector<2x16x1xf32>
    %cst_101 = arith.constant 1.280000e+02 : f32
    %260 = vector.broadcast %cst_101 : f32 to vector<2x16x1xf32>
    %261 = arith.divf %259, %260 : vector<2x16x1xf32>
    %262 = vector.broadcast %261 : vector<2x16x1xf32> to vector<2x16x128xf32>
    %263 = arith.subf %255, %262 : vector<2x16x128xf32>
    %264 = arith.mulf %263, %263 : vector<2x16x128xf32>
    %cst_102 = arith.constant dense<0.000000e+00> : vector<2x16xf32>
    %265 = vector.multi_reduction <add>, %264, %cst_102 [2] : vector<2x16x128xf32> to vector<2x16xf32>
    %266 = vector.shape_cast %265 : vector<2x16xf32> to vector<2x16x1xf32>
    %cst_103 = arith.constant 1.270000e+02 : f32
    %267 = vector.broadcast %cst_103 : f32 to vector<2x16x1xf32>
    %268 = arith.divf %266, %267 : vector<2x16x1xf32>
    %269 = math.sqrt %268 : vector<2x16x1xf32>
    %270 = vector.shape_cast %256 : vector<1x128xf32> to vector<1x1x128xf32>
    %271 = vector.broadcast %270 : vector<1x1x128xf32> to vector<2x16x128xf32>
    %272 = arith.mulf %271, %263 : vector<2x16x128xf32>
    %cst_104 = arith.constant 9.99999997E-7 : f32
    %273 = vector.broadcast %cst_104 : f32 to vector<2x16x1xf32>
    %274 = arith.addf %269, %273 : vector<2x16x1xf32>
    %275 = vector.broadcast %274 : vector<2x16x1xf32> to vector<2x16x128xf32>
    %276 = arith.divf %272, %275 : vector<2x16x128xf32>
    %277 = vector.shape_cast %257 : vector<1x128xf32> to vector<1x1x128xf32>
    %278 = vector.broadcast %277 : vector<1x1x128xf32> to vector<2x16x128xf32>
    %279 = arith.addf %276, %278 : vector<2x16x128xf32>
    %280 = vector.shape_cast %279 : vector<2x16x128xf32> to vector<32x128xf32>
    %281 = arith.truncf %280 : vector<32x128xf32> to vector<32x128xbf16>
    %c0_105 = arith.constant 0 : index
    %c0_106 = arith.constant 0 : index
    %282 = vector.load %arg16[%c0_105, %c0_106] : memref<128x256xbf16, #tpu.memory_space<vmem>>, vector<128x256xbf16>
    %cst_107 = arith.constant dense<0.000000e+00> : vector<32x256xf32>
    %283 = tpu.matmul %281, %282, %cst_107 {dimension_numbers = #tpu.dot_dimension_numbers<[1], [0], [0], [1], [0, 0, 1, 1], [], []>} : vector<32x128xbf16>, vector<128x256xbf16>, vector<32x256xf32> -> vector<32x256xf32>
    %c0_108 = arith.constant 0 : index
    %c0_109 = arith.constant 0 : index
    %284 = vector.load %arg17[%c0_108, %c0_109] : memref<1x256xf32, #tpu.memory_space<vmem>>, vector<1x256xf32>
    %285 = vector.broadcast %284 : vector<1x256xf32> to vector<32x256xf32>
    %286 = arith.addf %283, %285 : vector<32x256xf32>
    %cst_110 = arith.constant 0.000000e+00 : f32
    %287 = vector.broadcast %cst_110 : f32 to vector<32x256xf32>
    %288 = arith.maximumf %286, %287 : vector<32x256xf32>
    %289 = arith.truncf %288 : vector<32x256xf32> to vector<32x256xbf16>
    %c0_111 = arith.constant 0 : index
    %c0_112 = arith.constant 0 : index
    %290 = vector.load %arg18[%c0_111, %c0_112] : memref<256x128xbf16, #tpu.memory_space<vmem>>, vector<256x128xbf16>
    %cst_113 = arith.constant dense<0.000000e+00> : vector<32x128xf32>
    %291 = tpu.matmul %289, %290, %cst_113 {dimension_numbers = #tpu.dot_dimension_numbers<[1], [0], [0], [1], [0, 0, 1, 1], [], []>} : vector<32x256xbf16>, vector<256x128xbf16>, vector<32x128xf32> -> vector<32x128xf32>
    %c0_114 = arith.constant 0 : index
    %c0_115 = arith.constant 0 : index
    %292 = vector.load %arg19[%c0_114, %c0_115] : memref<1x128xf32, #tpu.memory_space<vmem>>, vector<1x128xf32>
    %293 = vector.broadcast %292 : vector<1x128xf32> to vector<32x128xf32>
    %294 = arith.addf %291, %293 : vector<32x128xf32>
    %295 = vector.shape_cast %294 : vector<32x128xf32> to vector<2x16x128xf32>
    %296 = arith.addf %255, %295 : vector<2x16x128xf32>
    %297 = arith.truncf %296 : vector<2x16x128xf32> to vector<2x16x128xbf16>
    %c0_116 = arith.constant 0 : index
    %c0_117 = arith.constant 0 : index
    %c0_118 = arith.constant 0 : index
    %298 = vector.load %arg30[%c0_116, %c0_117, %c0_118] : memref<2x16x128xbf16, #tpu.memory_space<vmem>>, vector<2x16x128xbf16>
    tpu.vector_store %arg30[%c0_116, %c0_117, %c0_118], %297 {strides = array<i32>} : memref<2x16x128xbf16, #tpu.memory_space<vmem>>, vector<2x16x128xbf16>,
    return
  }
  func.func @transform_0(%arg0: i32, %arg1: memref<2xi32, #tpu.memory_space<smem>>, %arg2: memref<2xi32, #tpu.memory_space<smem>>) -> (i32, i32, i32) {
    %c0_i32 = arith.constant 0 : i32
    %c0_i32_0 = arith.constant 0 : i32
    %c0_i32_1 = arith.constant 0 : i32
    %c0_i32_2 = arith.constant 0 : i32
    return %c0_i32, %c0_i32_0, %c0_i32_1 : i32, i32, i32
  }
  func.func @transform_1(%arg0: i32, %arg1: memref<2xi32, #tpu.memory_space<smem>>, %arg2: memref<2xi32, #tpu.memory_space<smem>>) -> (i32, i32, i32) {
    %c0_i32 = arith.constant 0 : i32
    %c0_i32_0 = arith.constant 0 : i32
    %c0_i32_1 = arith.constant 0 : i32
    return %c0_i32, %arg0, %c0_i32_0 : i32, i32, i32
  }
  func.func @transform_2(%arg0: i32, %arg1: memref<2xi32, #tpu.memory_space<smem>>, %arg2: memref<2xi32, #tpu.memory_space<smem>>) -> (i32, i32, i32) {
    %c0_i32 = arith.constant 0 : i32
    %c0_i32_0 = arith.constant 0 : i32
    %c0_i32_1 = arith.constant 0 : i32
    %c0_i32_2 = arith.constant 0 : i32
    return %c0_i32, %c0_i32_0, %c0_i32_1 : i32, i32, i32
  }
  func.func @transform_3(%arg0: i32, %arg1: memref<2xi32, #tpu.memory_space<smem>>, %arg2: memref<2xi32, #tpu.memory_space<smem>>) -> (i32, i32, i32) {
    %c0_i32 = arith.constant 0 : i32
    %c0_i32_0 = arith.constant 0 : i32
    %c0_i32_1 = arith.constant 0 : i32
    %c0_i32_2 = arith.constant 0 : i32
    return %c0_i32, %c0_i32_0, %c0_i32_1 : i32, i32, i32
  }
  func.func @transform_4(%arg0: i32, %arg1: memref<2xi32, #tpu.memory_space<smem>>, %arg2: memref<2xi32, #tpu.memory_space<smem>>) -> (i32, i32) {
    %c0_i32 = arith.constant 0 : i32
    %c0_i32_0 = arith.constant 0 : i32
    %c0_i32_1 = arith.constant 0 : i32
    return %c0_i32, %c0_i32_0 : i32, i32
  }
  func.func @transform_5(%arg0: i32, %arg1: memref<2xi32, #tpu.memory_space<smem>>, %arg2: memref<2xi32, #tpu.memory_space<smem>>) -> (i32, i32) {
    %c0_i32 = arith.constant 0 : i32
    %c0_i32_0 = arith.constant 0 : i32
    %c0_i32_1 = arith.constant 0 : i32
    return %c0_i32, %c0_i32_0 : i32, i32
  }
  func.func @transform_6(%arg0: i32, %arg1: memref<2xi32, #tpu.memory_space<smem>>, %arg2: memref<2xi32, #tpu.memory_space<smem>>) -> (i32, i32) {
    %c0_i32 = arith.constant 0 : i32
    %c0_i32_0 = arith.constant 0 : i32
    %c0_i32_1 = arith.constant 0 : i32
    return %c0_i32, %c0_i32_0 : i32, i32
  }
  func.func @transform_7(%arg0: i32, %arg1: memref<2xi32, #tpu.memory_space<smem>>, %arg2: memref<2xi32, #tpu.memory_space<smem>>) -> (i32, i32) {
    %c0_i32 = arith.constant 0 : i32
    %c0_i32_0 = arith.constant 0 : i32
    %c0_i32_1 = arith.constant 0 : i32
    return %c0_i32, %c0_i32_0 : i32, i32
  }
  func.func @transform_8(%arg0: i32, %arg1: memref<2xi32, #tpu.memory_space<smem>>, %arg2: memref<2xi32, #tpu.memory_space<smem>>) -> (i32, i32) {
    %c0_i32 = arith.constant 0 : i32
    %c0_i32_0 = arith.constant 0 : i32
    %c0_i32_1 = arith.constant 0 : i32
    return %c0_i32, %c0_i32_0 : i32, i32
  }
  func.func @transform_9(%arg0: i32, %arg1: memref<2xi32, #tpu.memory_space<smem>>, %arg2: memref<2xi32, #tpu.memory_space<smem>>) -> (i32, i32) {
    %c0_i32 = arith.constant 0 : i32
    %c0_i32_0 = arith.constant 0 : i32
    %c0_i32_1 = arith.constant 0 : i32
    return %c0_i32, %c0_i32_0 : i32, i32
  }
  func.func @transform_10(%arg0: i32, %arg1: memref<2xi32, #tpu.memory_space<smem>>, %arg2: memref<2xi32, #tpu.memory_space<smem>>) -> (i32, i32) {
    %c0_i32 = arith.constant 0 : i32
    %c0_i32_0 = arith.constant 0 : i32
    %c0_i32_1 = arith.constant 0 : i32
    return %c0_i32, %c0_i32_0 : i32, i32
  }
  func.func @transform_11(%arg0: i32, %arg1: memref<2xi32, #tpu.memory_space<smem>>, %arg2: memref<2xi32, #tpu.memory_space<smem>>) -> (i32, i32) {
    %c0_i32 = arith.constant 0 : i32
    %c0_i32_0 = arith.constant 0 : i32
    %c0_i32_1 = arith.constant 0 : i32
    return %c0_i32, %c0_i32_0 : i32, i32
  }
  func.func @transform_12(%arg0: i32, %arg1: memref<2xi32, #tpu.memory_space<smem>>, %arg2: memref<2xi32, #tpu.memory_space<smem>>) -> (i32, i32) {
    %c0_i32 = arith.constant 0 : i32
    %c0_i32_0 = arith.constant 0 : i32
    %c0_i32_1 = arith.constant 0 : i32
    return %c0_i32, %c0_i32_0 : i32, i32
  }
  func.func @transform_13(%arg0: i32, %arg1: memref<2xi32, #tpu.memory_space<smem>>, %arg2: memref<2xi32, #tpu.memory_space<smem>>) -> (i32, i32) {
    %c0_i32 = arith.constant 0 : i32
    %c0_i32_0 = arith.constant 0 : i32
    %c0_i32_1 = arith.constant 0 : i32
    return %c0_i32, %c0_i32_0 : i32, i32
  }
  func.func @transform_14(%arg0: i32, %arg1: memref<2xi32, #tpu.memory_space<smem>>, %arg2: memref<2xi32, #tpu.memory_space<smem>>) -> (i32, i32) {
    %c0_i32 = arith.constant 0 : i32
    %c0_i32_0 = arith.constant 0 : i32
    %c0_i32_1 = arith.constant 0 : i32
    return %c0_i32, %c0_i32_0 : i32, i32
  }
  func.func @transform_15(%arg0: i32, %arg1: memref<2xi32, #tpu.memory_space<smem>>, %arg2: memref<2xi32, #tpu.memory_space<smem>>) -> (i32, i32) {
    %c0_i32 = arith.constant 0 : i32
    %c0_i32_0 = arith.constant 0 : i32
    %c0_i32_1 = arith.constant 0 : i32
    return %c0_i32, %c0_i32_0 : i32, i32
  }
  func.func @transform_16(%arg0: i32, %arg1: memref<2xi32, #tpu.memory_space<smem>>, %arg2: memref<2xi32, #tpu.memory_space<smem>>) -> (i32, i32) {
    %c0_i32 = arith.constant 0 : i32
    %c0_i32_0 = arith.constant 0 : i32
    %c0_i32_1 = arith.constant 0 : i32
    return %c0_i32, %c0_i32_0 : i32, i32
  }
  func.func @transform_17(%arg0: i32, %arg1: memref<2xi32, #tpu.memory_space<smem>>, %arg2: memref<2xi32, #tpu.memory_space<smem>>) -> (i32, i32) {
    %c0_i32 = arith.constant 0 : i32
    %c0_i32_0 = arith.constant 0 : i32
    %c0_i32_1 = arith.constant 0 : i32
    return %c0_i32, %c0_i32_0 : i32, i32
  }
  func.func @transform_18(%arg0: i32, %arg1: memref<2xi32, #tpu.memory_space<smem>>, %arg2: memref<2xi32, #tpu.memory_space<smem>>) -> (i32, i32) {
    %c0_i32 = arith.constant 0 : i32
    %c0_i32_0 = arith.constant 0 : i32
    %c0_i32_1 = arith.constant 0 : i32
    return %c0_i32, %c0_i32_0 : i32, i32
  }
  func.func @transform_19(%arg0: i32, %arg1: memref<2xi32, #tpu.memory_space<smem>>, %arg2: memref<2xi32, #tpu.memory_space<smem>>) -> (i32, i32) {
    %c0_i32 = arith.constant 0 : i32
    %c0_i32_0 = arith.constant 0 : i32
    %c0_i32_1 = arith.constant 0 : i32
    return %c0_i32, %c0_i32_0 : i32, i32
  }
  func.func @transform_20(%arg0: i32, %arg1: memref<2xi32, #tpu.memory_space<smem>>, %arg2: memref<2xi32, #tpu.memory_space<smem>>) -> (i32, i32) {
    %c0_i32 = arith.constant 0 : i32
    %c0_i32_0 = arith.constant 0 : i32
    %c0_i32_1 = arith.constant 0 : i32
    return %c0_i32, %c0_i32_0 : i32, i32
  }
  func.func @transform_21(%arg0: i32, %arg1: memref<2xi32, #tpu.memory_space<smem>>, %arg2: memref<2xi32, #tpu.memory_space<smem>>) -> (i32, i32) {
    %c0_i32 = arith.constant 0 : i32
    %c0_i32_0 = arith.constant 0 : i32
    %c0_i32_1 = arith.constant 0 : i32
    return %c0_i32, %c0_i32_0 : i32, i32
  }
  func.func @transform_22(%arg0: i32, %arg1: memref<2xi32, #tpu.memory_space<smem>>, %arg2: memref<2xi32, #tpu.memory_space<smem>>) -> (i32, i32) {
    %c0_i32 = arith.constant 0 : i32
    %c0_i32_0 = arith.constant 0 : i32
    %c0_i32_1 = arith.constant 0 : i32
    return %c0_i32, %c0_i32_0 : i32, i32
  }
  func.func @transform_23(%arg0: i32, %arg1: memref<2xi32, #tpu.memory_space<smem>>, %arg2: memref<2xi32, #tpu.memory_space<smem>>) -> (i32, i32) {
    %c0_i32 = arith.constant 0 : i32
    %c0_i32_0 = arith.constant 0 : i32
    %c0_i32_1 = arith.constant 0 : i32
    return %c0_i32, %c0_i32_0 : i32, i32
  }
  func.func @transform_24(%arg0: i32, %arg1: memref<2xi32, #tpu.memory_space<smem>>, %arg2: memref<2xi32, #tpu.memory_space<smem>>) -> (i32, i32) {
    %c0_i32 = arith.constant 0 : i32
    %c0_i32_0 = arith.constant 0 : i32
    %c0_i32_1 = arith.constant 0 : i32
    return %c0_i32, %c0_i32_0 : i32, i32
  }
  func.func @transform_25(%arg0: i32, %arg1: memref<2xi32, #tpu.memory_space<smem>>, %arg2: memref<2xi32, #tpu.memory_space<smem>>) -> (i32, i32) {
    %c0_i32 = arith.constant 0 : i32
    %c0_i32_0 = arith.constant 0 : i32
    %c0_i32_1 = arith.constant 0 : i32
    return %c0_i32, %c0_i32_0 : i32, i32
  }
  func.func @transform_26(%arg0: i32, %arg1: memref<2xi32, #tpu.memory_space<smem>>, %arg2: memref<2xi32, #tpu.memory_space<smem>>) -> (i32, i32) {
    %c0_i32 = arith.constant 0 : i32
    %c0_i32_0 = arith.constant 0 : i32
    %c0_i32_1 = arith.constant 0 : i32
    return %c0_i32, %c0_i32_0 : i32, i32
  }
  func.func @transform_27(%arg0: i32, %arg1: memref<2xi32, #tpu.memory_space<smem>>, %arg2: memref<2xi32, #tpu.memory_space<smem>>) -> (i32, i32, i32) {
    %c0_i32 = arith.constant 0 : i32
    %c0_i32_0 = arith.constant 0 : i32
    %c0_i32_1 = arith.constant 0 : i32
    return %c0_i32, %arg0, %c0_i32_0 : i32, i32, i32
  }
}

</mosaic_0001>

<bundles_post_ra>
// kernel: tpu_custom_call.1
= control target key start
LH: loop header
LB: loop body
LE: loop exit
PB: predicated region body
PF: predicated region fallthrough
CT: control target
= control target key end

     0   :  { %s5774_s6 = smov 2   ;;  %s5775_s10 = smov 3   ;;  %s6723_s0 = inlined_call_operand.smem [shape: u32[30], index: -1, kind: input, shape index: {}] }
   0x1   :  { %s5845_s5 = sld [smem:[%s6723_s0]]   ;;  %s5776_s14 = smov 4  }
   0x2   :  { %s5850_s9 = sld [smem:[%s6723_s0 + %s5774_s6]]   ;;  %s5777_s18 = smov 5  }
   0x3   :  { %s5855_s13 = sld [smem:[%s6723_s0 + %s5775_s10]]   ;;  %s5778_s22 = smov 6  }
   0x4   :  { %s5860_s17 = sld [smem:[%s6723_s0 + %s5776_s14]]   ;;  %s5779_s26 = smov 7  }
   0x5   :  { %s5865_s21 = sld [smem:[%s6723_s0 + %s5777_s18]]   ;;  %s5780_s30 = smov 8  }
   0x6   :  { %s5870_s25 = sld [smem:[%s6723_s0 + %s5778_s22]]   ;;  %s5781_s4 = smov 9  }
   0x7   :  { %s5875_s29 = sld [smem:[%s6723_s0 + %s5779_s26]]   ;;  %s5782_s10 = smov 10  }
   0x8   :  { %s5880_s3 = sld [smem:[%s6723_s0 + %s5780_s30]]   ;;  %s5783_s15 = smov 11  }
   0x9   :  { %6740 = sst [smem:[#allocation46_spill]] %s5855_s13  ;;  %s5784_s20 = smov 12  }
   0xa   :  { %s5885_s8 = sld [smem:[%s6723_s0 + %s5781_s4]]   ;;  %s5785_s26 = smov 13  }
   0xb   :  { %6741 = sst [smem:[#allocation47_spill]] %s5865_s21  ;;  %s5786_s1 = smov 14  }
   0xc   :  { %s5890_s14 = sld [smem:[%s6723_s0 + %s5782_s10]]   ;;  %s5787_s7 = smov 15  }
   0xd   :  { %s5895_s19 = sld [smem:[%s6723_s0 + %s5783_s15]]   ;;  %s5788_s15 = smov 16  }
   0xe   :  { %s5900_s24 = sld [smem:[%s6723_s0 + %s5784_s20]]   ;;  %s5789_s22 = smov 17  }
   0xf   :  { %s5905_s30 = sld [smem:[%s6723_s0 + %s5785_s26]]   ;;  %s5790_s28 = smov 18  }
  0x10   :  { %6742 = sst [smem:[#allocation48_spill]] %s5885_s8 }
  0x11   :  { %s5910_s6 = sld [smem:[%s6723_s0 + %s5786_s1]]  }
  0x12   :  { %s5915_s12 = sld [smem:[%s6723_s0 + %s5787_s7]]   ;;  %s5791_s7 = smov 19  }
  0x13   :  { %s5920_s20 = sld [smem:[%s6723_s0 + %s5788_s15]]   ;;  %s5792_s15 = smov 20  }
  0x14   :  { %s5925_s27 = sld [smem:[%s6723_s0 + %s5789_s22]]   ;;  %s5793_s22 = smov 21  }
  0x15   :  { %s5930_s4 = sld [smem:[%s6723_s0 + %s5790_s28]]   ;;  %s5794_s28 = smov 22  }
  0x16   :  { %s5935_s13 = sld [smem:[%s6723_s0 + %s5791_s7]]   ;;  %s5795_s7 = smov 23  }
  0x17   :  { %s5945_s1 = sld [smem:[%s6723_s0 + %s5793_s22]]   ;;  %s5797_s22 = smov 25  }
  0x18   :  { %s5950_s10 = sld [smem:[%s6723_s0 + %s5794_s28]]  }
  0x19   :  { %6743 = sst [smem:[#allocation49_spill]] %s5920_s20 }
  0x1a   :  { %6744 = sst [smem:[#allocation50_spill]] %s5925_s27 }
  0x1b   :  { %6745 = sst [smem:[#allocation51_spill]] %s5930_s4  ;;  %s5798_s4 = smov 26  }
  0x1c   :  { %6746 = sst [smem:[#allocation52_spill]] %s5935_s13  ;;  %s5799_s13 = smov 29  }
  0x1d   :  { %s5940_s20 = sld [smem:[%s6723_s0 + %s5792_s15]]   ;;  %s5796_s15 = smov 24  }
  0x1e   :  { %6748 = sst [smem:[#allocation54_spill]] %s5945_s1 }
  0x1f   :  { %6749 = sst [smem:[#allocation55_spill]] %s5950_s10 }
  0x20   :  { %s5955_s16 = sld [smem:[%s6723_s0 + %s5795_s7]]  }
  0x21   :  { %s5960_s27 = sld [smem:[%s6723_s0 + %s5796_s15]]   ;;  %s5801_s15 = smov 1  }
  0x22   :  { %s5965_s1 = sld [smem:[%s6723_s0 + %s5797_s22]]  }
  0x23   :  { %6747 = sst [smem:[#allocation53_spill]] %s5940_s20  ;;  %s5800_s20 = smov [#allocation3]  }
  0x24   :  { %s5970_s10 = sld [smem:[%s6723_s0 + %s5798_s4]]  }
  0x25   :  { %65 = dma.hbm_to_smem %s5845_s5, 16, %s5800_s20, [#allocation2] }
  0x26   :  { %6750 = sst [smem:[#allocation56_spill]] %s5955_s16 }
  0x27   :  { %6751 = sst [smem:[#allocation57_spill]] %s5960_s27 }
  0x28   :  { %6752 = sst [smem:[#allocation58_spill]] %s5965_s1 }
  0x29   :  { %s5975_s16 = sld [smem:[%s6723_s0 + %s5799_s13]]  }
  0x2a   :  { %6753 = sst [smem:[#allocation59_spill]] %s5970_s10 }
  0x2b   :  { %s4203_s22 = sld [smem:[%s6723_s0 + %s5801_s15]]  }
  0x2f   :  { %6754 = sst [smem:[#allocation60_spill]] %s5975_s16 }
  0x31   :  { %s66_s23 = sshll.u32 %s4203_s22, 4  ;;  %s67_s23 = int_to_ptr.vmem [resolvable:$true] %s66_s23 }
  0x32   :  { %s5324_s26 = scalar_lea.vmem %s67_s23, 16  ;;  %p5329_p1 = scmp.lt.s32.totalorder %s67_s23, %s67_s23 }
  0x33   :  { %p5325_p0 = scmp.ne.s32.totalorder %s67_s23, %s5324_s26  ;;  %p5330_p2 = scmp.lt.s32.totalorder %s5324_s26, %s5324_s26 }
  0x35   :  { %p5331_p3 = por %p5330_p2, %p5329_p1 }
  0x37   :  { %p5332_p4 = pnand %p5331_p3, %p5325_p0 }
  0x39   :  { %5335 = shalt.err (!%p5332_p4)  }
  0x3a   :  { %s5802_s4 = smov [#allocation4]  }
  0x3b   :  { %69 = dma.vmem_to_smem %s67_s23, 16, %s5802_s4, [#allocation2] }
  0x3c   :  { %5716 = dma.done.wait [#allocation2], 32 }
  0x3d   :  { %5717 = vsyncadd [#allocation2], 4294967264 }
  0x3e   :  { %71 = sfence }
  0x3f   :  { %72 = vsyncpa [#allocation6], 0 }
  0x40   :  { %73 = vsyncpa [#allocation9], 0 }
  0x41   :  { %75 = vsyncpa [#allocation9 + $0x1], 0 }
  0x42   :  { %76 = vsyncpa [#allocation12], 0 }
  0x43   :  { %77 = vsyncpa [#allocation15], 0 }
  0x44   :  { %78 = vsyncpa [#allocation18], 0 }
  0x45   :  { %79 = vsyncpa [#allocation21], 0 }
  0x46   :  { %80 = vsyncpa [#allocation24], 0 }
  0x47   :  { %81 = vsyncpa [#allocation27], 0 }
  0x48   :  { %82 = vsyncpa [#allocation7], 0 }
  0x49   :  { %84 = vsyncpa [#allocation7 + $0x1], 0  ;;  %s5981_s0 = smov 0   ;;  %s5983_s5 = smov 0  }
  0x4a   :  { %s5985_s27 = smov 0   ;;  %s5987_s28 = smov 0  }
  0x4b LB: > { %6755 = sst [smem:[#allocation61_spill]] %s5760_s0  ;;  %s6002_s2 = sadd.s32 4294967295, %s5772_s28   ;;  %s5772_s28 = sphi %s5987_s28, %s6811_s28   ;;  %s5768_s27 = sphi %s5985_s27, %s6815_s27   ;;  %s5764_s5 = sphi %s5983_s5, %s6814_s5   ;;  %s5760_s0 = sphi %s5981_s0, %s6813_s0  }
  0x4c   : > { %s4231_s13 = sadd.s32 4294967294, %s5772_s28   ;;  %s6006_s7 = sadd.s32 1, %s5772_s28  }
  0x4d   : > { %6756 = sst [smem:[#allocation62_spill]] %s6006_s7  ;;  %s118_s11 = sadd.s32 1, %s5768_s27 }
  0x4e   : > { %s115_s20 = ssub.s32 %s5772_s28, %s6006_s7  ;;  %p125_p5 = scmp.ne.s32.totalorder %s5768_s27, %s5764_s5 }
  0x4f   : > { %p116_p6 = scmp.eq.s32.totalorder %s115_s20, 0  ;;  %p126_p7 = scmp.eq.s32.totalorder %s5772_s28, 0 }
  0x50   : > { %p131_p8 = scmp.ne.s32.totalorder %s5764_s5, %s5760_s0  ;;  %p6728_p9 = scmp.eq.s32.totalorder %s6002_s2, 0 }
  0x51   : > { %s6018_s15 = scalar_select %p116_p6, %s5768_s27, %s118_s11  }
  0x52   : > { %p6020_p10 = por %p126_p7, %p125_p5  ;;  %p6026_p11 = por %p6728_p9, %p131_p8 }
  0x53   : > { %6757 = sst [smem:[#allocation63_spill]] %s6018_s15  ;;  %p680_p12 = scmp.eq.s32.totalorder %s6002_s2, 1 }
  0x54   : > { %s6759_s22 = scalar_select %p6026_p11, 1, 0 }
  0x55   : > { %p686_p13 = scmp.eq.s32.totalorder %s4231_s13, 1  ;;  %p4232_p0 = scmp.ge.s32.totalorder %s5772_s28, 1 }
  0x56   : > { %p693_p1 = scmp.lt.s32.totalorder %s5772_s28, 3  ;;  %p6033_p2 = por %p680_p12, %p125_p5 }
  0x57   : > { %p6037_p3 = por %p686_p13, %p131_p8  ;;  %s5803_s11 = smov [#allocation11]  }
  0x58   : > { %s6760_s23 = scalar_select %p6033_p2, 1, 0 }
  0x59   : > { %s6762_s26 = scalar_select %p6037_p3, 1, 0 }
  0x5a   : > { %6761 = sst [smem:[#allocation64_spill]] %s6760_s23  ;;  %p6041_p4 = pnand %p4232_p0, %p693_p1 }
  0x5b   : > { %6763 = sst [smem:[#allocation65_spill]] %s6762_s26  ;;  %s731_s20 = sshll.u32 %s5803_s11, 4  ;;  %s732_s20 = int_to_ptr.vmem [resolvable:$true] %s731_s20 }
  0x5c   : > { %s6764_s4 = scalar_select %p6041_p4, 1, 0 }
  0x5d   : > { %p4834_p6 = pneg %p6041_p4  ;;  %s5804_s15 = smov [#allocation14]  }
  0x5e   : > { %s757_s7 = sshll.u32 %s5804_s15, 4  ;;  %s5347_s0 = scalar_lea.vmem %s732_s20, 256  ;;  %s758_s7 = int_to_ptr.vmem [resolvable:$true] %s757_s7 }
  0x5f   : > { %p6049_p7 = pnand %p4834_p6, %p6728_p9  ;;  %p5348_p8 = scmp.ne.s32.totalorder %s732_s20, %s5347_s0 }
  0x60   : > { %p5355_p0 = scmp.lt.s32.totalorder %s732_s20, %s732_s20  ;;  %p5356_p1 = scmp.lt.s32.totalorder %s5347_s0, %s5347_s0 }
  0x61   : > { %p6055_p5 = pneg %p6049_p7 }
  0x62   : > { %p5357_p6 = por %p5356_p1, %p5355_p0 }
  0x63   : > { %p5350_p12 = pnand %p5348_p8, %p6055_p5 }
  0x65   : > { %p5351_p13 = pneg %p5350_p12 }
  0x67   : > { %p5358_p9 = pnand %p5357_p6, %p5351_p13 }
  0x69   : > { %5361 = shalt.err (!%p5358_p9)
}
  0x6a   : > { %s6732_s11 = smov 64   ;;  %s6767_s21 = sld [smem:[#allocation47_spill]] }
  0x6b   : > { %s6734_s15 = smov 4   ;;  %s5373_s23 = scalar_lea.vmem %s758_s7, 2048 }
  0x6c   : > { %p5374_p3 = scmp.ne.s32.totalorder %s758_s7, %s5373_s23  ;;  %p5381_p2 = scmp.lt.s32.totalorder %s758_s7, %s758_s7 }
  0x6d   : > { %p5382_p0 = scmp.lt.s32.totalorder %s5373_s23, %s5373_s23 }
  0x6e   : > { %p5376_p8 = pnand %p5374_p3, %p6055_p5 }
  0x6f   : > { %p5383_p13 = por %p5382_p0, %p5381_p2 }
  0x70   : > { %4843 = dma.hbm_to_vmem [thread:$0]  (!%p6049_p7), %s6767_s21, 256, %s732_s20, [#allocation12], %s6732_s11, %s6732_s11, %s6734_s15  }
  0x71   : > { %p5377_p12 = pneg %p5376_p8 }
  0x73   : > { %p5384_p9 = pnand %p5383_p13, %p5377_p12 }
  0x75   : > { %5387 = shalt.err (!%p5384_p9)
}
  0x76   : > { %s6738_s0 = smov 128   ;;  %s5808_s16 = smov 8  }
  0x77   : > { %4849 = dma.hbm_to_vmem [thread:$0]  (!%p6049_p7), %s5875_s29, 2048, %s758_s7, [#allocation15], %s6738_s0, %s6738_s0, %s5808_s16  }
  0x78   : > { %s5809_s20 = smov [#allocation17]   ;;  %s5810_s15 = smov [#allocation20]  }
  0x79   : > { %s783_s11 = sshll.u32 %s5809_s20, 4  ;;  %s809_s21 = sshll.u32 %s5810_s15, 4  ;;  %s784_s11 = int_to_ptr.vmem [resolvable:$true] %s783_s11  ;;  %s810_s21 = int_to_ptr.vmem [resolvable:$true] %s809_s21 }
  0x7a   : > { %s5399_s10 = scalar_lea.vmem %s784_s11, 1024  ;;  %p5407_p6 = scmp.lt.s32.totalorder %s784_s11, %s784_s11 }
  0x7b   : > { %p5400_p3 = scmp.ne.s32.totalorder %s784_s11, %s5399_s10  ;;  %p5408_p8 = scmp.lt.s32.totalorder %s5399_s10, %s5399_s10 }
  0x7d   : > { %p5402_p2 = pnand %p5400_p3, %p6055_p5  ;;  %p5409_p12 = por %p5408_p8, %p5407_p6 }
  0x7f   : > { %p5403_p1 = pneg %p5402_p2 }
  0x81   : > { %p5410_p0 = pnand %p5409_p12, %p5403_p1 }
  0x83   : > { %5413 = shalt.err (!%p5410_p0)
}
  0x84   : > { %s6768_s23 = smov 4   ;;  %s6769_s1 = smov 64  }
  0x85   : > { %s6770_s8 = sld [smem:[#allocation48_spill]]  ;;  %s5425_s7 = scalar_lea.vmem %s810_s21, 1024 }
  0x86   : > { %p5426_p13 = scmp.ne.s32.totalorder %s810_s21, %s5425_s7  ;;  %p5433_p2 = scmp.lt.s32.totalorder %s810_s21, %s810_s21 }
  0x87   : > { %p5434_p11 = scmp.lt.s32.totalorder %s5425_s7, %s5425_s7 }
  0x88   : > { %p5428_p9 = pnand %p5426_p13, %p6055_p5 }
  0x89   : > { %p5435_p4 = por %p5434_p11, %p5433_p2 }
  0x8a   : > { %p5429_p3 = pneg %p5428_p9 }
  0x8b   : > { %4855 = dma.hbm_to_vmem [thread:$0]  (!%p6049_p7), %s6770_s8, 1024, %s784_s11, [#allocation18], %s6769_s1, %s6769_s1, %s6768_s23  }
  0x8c   : > { %p5436_p6 = pnand %p5435_p4, %p5429_p3 }
  0x8e   : > { %5439 = shalt.err (!%p5436_p6)
}
  0x8f   : > { %4861 = dma.hbm_to_vmem [thread:$0]  (!%p6049_p7), %s5895_s19, 1024, %s810_s21, [#allocation21], %s6769_s1, %s6769_s1, %s6768_s23  }
  0x90   : > { %s5811_s10 = smov [#allocation23]   ;;  %s5812_s15 = smov [#allocation26]  }
  0x91   : > { %s835_s11 = sshll.u32 %s5811_s10, 4  ;;  %s861_s20 = sshll.u32 %s5812_s15, 4  ;;  %s836_s11 = int_to_ptr.vmem [resolvable:$true] %s835_s11  ;;  %s862_s20 = int_to_ptr.vmem [resolvable:$true] %s861_s20 }
  0x92   : > { %s5451_s0 = scalar_lea.vmem %s836_s11, 2048  ;;  %p5459_p4 = scmp.lt.s32.totalorder %s836_s11, %s836_s11 }
  0x93   : > { %p5452_p1 = scmp.ne.s32.totalorder %s836_s11, %s5451_s0  ;;  %p5460_p12 = scmp.lt.s32.totalorder %s5451_s0, %s5451_s0 }
  0x95   : > { %p5454_p8 = pnand %p5452_p1, %p6055_p5  ;;  %p5461_p0 = por %p5460_p12, %p5459_p4 }
  0x97   : > { %p5455_p11 = pneg %p5454_p8 }
  0x99   : > { %p5462_p13 = pnand %p5461_p0, %p5455_p11 }
  0x9b   : > { %5465 = shalt.err (!%p5462_p13)
}
  0x9c   : > { %s6771_s7 = smov 128   ;;  %s5477_s21 = scalar_lea.vmem %s862_s20, 2048 }
  0x9d   : > { %4867 = dma.hbm_to_vmem [thread:$0]  (!%p6049_p7), %s5905_s30, 2048, %s836_s11, [#allocation24], %s6771_s7, %s6771_s7, %s5808_s16  }
  0x9e   : > { %p5478_p9 = scmp.ne.s32.totalorder %s862_s20, %s5477_s21  ;;  %p5485_p6 = scmp.lt.s32.totalorder %s862_s20, %s862_s20 }
  0x9f   : > { %p5486_p1 = scmp.lt.s32.totalorder %s5477_s21, %s5477_s21 }
  0xa0   : > { %p5480_p3 = pnand %p5478_p9, %p6055_p5 }
  0xa1   : > { %p5487_p8 = por %p5486_p1, %p5485_p6 }
  0xa2   : > { %p5481_p2 = pneg %p5480_p3 }
  0xa4   : > { %p5488_p4 = pnand %p5487_p8, %p5481_p2 }
  0xa6   : > { %5491 = shalt.err (!%p5488_p4)
}
  0xa7   : > { %4873 = dma.hbm_to_vmem [thread:$0]  (!%p6049_p7), %s5915_s12, 2048, %s862_s20, [#allocation27], %s6771_s7, %s6771_s7, %s5808_s16  }
  0xa8   : > { %s5813_s0 = smov [#allocation5]   ;;  %s5814_s11 = smov [#allocation10]  }
  0xa9   : > { %s705_s10 = sshll.u32 %s5813_s0, 4  ;;  %s718_s15 = sshll.u32 %s5814_s11, 4  ;;  %s706_s10 = int_to_ptr.vmem [resolvable:$true] %s705_s10  ;;  %s719_s15 = int_to_ptr.vmem [resolvable:$true] %s718_s15 }
  0xaa   : > { %s5503_s8 = scalar_lea.vmem %s706_s10, 1024  ;;  %p5511_p13 = scmp.lt.s32.totalorder %s706_s10, %s706_s10 }
  0xab   : > { %p5504_p11 = scmp.ne.s32.totalorder %s706_s10, %s5503_s8  ;;  %p5512_p9 = scmp.lt.s32.totalorder %s5503_s8, %s5503_s8 }
  0xad   : > { %p5506_p12 = pnand %p5504_p11, %p6055_p5  ;;  %p5513_p3 = por %p5512_p9, %p5511_p13 }
  0xaf   : > { %p5507_p0 = pneg %p5506_p12 }
  0xb1   : > { %p5514_p2 = pnand %p5513_p3, %p5507_p0 }
  0xb3   : > { %5517 = shalt.err (!%p5514_p2)
}
  0xb4   : > { %4837 = dma.hbm_to_vmem [thread:$0]  (!%p6049_p7), %s5850_s9, 1024, %s706_s10, [#allocation6], %s6771_s7, %s6771_s7, %s5808_s16  }
  0xb5   : > { %s5529_s20 = scalar_lea.vmem %s719_s15, 128  ;;  %p5537_p4 = scmp.lt.s32.totalorder %s719_s15, %s719_s15 }
  0xb6   : > { %p5530_p6 = scmp.ne.s32.totalorder %s719_s15, %s5529_s20  ;;  %p5538_p11 = scmp.lt.s32.totalorder %s5529_s20, %s5529_s20 }
  0xb8   : > { %p5532_p1 = pnand %p5530_p6, %p6055_p5  ;;  %p5539_p12 = por %p5538_p11, %p5537_p4 }
  0xba   : > { %p5533_p8 = pneg %p5532_p1 }
  0xbc   : > { %p5540_p13 = pnand %p5539_p12, %p5533_p8 }
  0xbe   : > { %5543 = shalt.err (!%p5540_p13)
}
  0xbf   : > { %4840 = dma.hbm_to_vmem [thread:$0]  (!%p6049_p7), %s5860_s17, 128, %s719_s15, [#allocation9], %s6769_s1, %s6769_s1, %s6768_s23  }
  0xc0   : > { %s5815_s8 = smov [#allocation13]   ;;  %s5816_s0 = smov [#allocation16]  }
  0xc1   : > { %s744_s21 = sshll.u32 %s5815_s8, 4  ;;  %s770_s10 = sshll.u32 %s5816_s0, 4  ;;  %s745_s21 = int_to_ptr.vmem [resolvable:$true] %s744_s21  ;;  %s771_s10 = int_to_ptr.vmem [resolvable:$true] %s770_s10 }
  0xc2   : > { %s5555_s11 = scalar_lea.vmem %s745_s21, 1024  ;;  %p5563_p2 = scmp.lt.s32.totalorder %s745_s21, %s745_s21 }
  0xc3   : > { %p5556_p0 = scmp.ne.s32.totalorder %s745_s21, %s5555_s11  ;;  %p5564_p6 = scmp.lt.s32.totalorder %s5555_s11, %s5555_s11 }
  0xc5   : > { %p5558_p9 = pnand %p5556_p0, %p6055_p5  ;;  %p5565_p1 = por %p5564_p6, %p5563_p2 }
  0xc7   : > { %p5559_p3 = pneg %p5558_p9 }
  0xc9   : > { %p5566_p8 = pnand %p5565_p1, %p5559_p3 }
  0xcb   : > { %5569 = shalt.err (!%p5566_p8)
}
  0xcc   : > { %4846 = dma.hbm_to_vmem [thread:$0]  (!%p6049_p7), %s5870_s25, 1024, %s745_s21, [#allocation12], %s6769_s1, %s6769_s1, %s6768_s23  }
  0xcd   : > { %s5581_s15 = scalar_lea.vmem %s771_s10, 1024  ;;  %p5589_p13 = scmp.lt.s32.totalorder %s771_s10, %s771_s10 }
  0xce   : > { %p5582_p4 = scmp.ne.s32.totalorder %s771_s10, %s5581_s15  ;;  %p5590_p0 = scmp.lt.s32.totalorder %s5581_s15, %s5581_s15 }
  0xd0   : > { %p5584_p11 = pnand %p5582_p4, %p6055_p5  ;;  %p5591_p9 = por %p5590_p0, %p5589_p13 }
  0xd2   : > { %p5585_p12 = pneg %p5584_p11 }
  0xd4   : > { %p5592_p2 = pnand %p5591_p9, %p5585_p12 }
  0xd6   : > { %5595 = shalt.err (!%p5592_p2)
}
  0xd7   : > { %4852 = dma.hbm_to_vmem [thread:$0]  (!%p6049_p7), %s5880_s3, 1024, %s771_s10, [#allocation15], %s6769_s1, %s6769_s1, %s6768_s23  }
  0xd8   : > { %s5817_s20 = smov [#allocation19]   ;;  %s5818_s21 = smov [#allocation22]  }
  0xd9   : > { %s796_s8 = sshll.u32 %s5817_s20, 4  ;;  %s822_s0 = sshll.u32 %s5818_s21, 4  ;;  %s797_s8 = int_to_ptr.vmem [resolvable:$true] %s796_s8  ;;  %s823_s0 = int_to_ptr.vmem [resolvable:$true] %s822_s0 }
  0xda   : > { %s5607_s11 = scalar_lea.vmem %s797_s8, 2048  ;;  %p5615_p8 = scmp.lt.s32.totalorder %s797_s8, %s797_s8 }
  0xdb   : > { %p5608_p3 = scmp.ne.s32.totalorder %s797_s8, %s5607_s11  ;;  %p5616_p4 = scmp.lt.s32.totalorder %s5607_s11, %s5607_s11 }
  0xdd   : > { %p5610_p6 = pnand %p5608_p3, %p6055_p5  ;;  %p5617_p11 = por %p5616_p4, %p5615_p8 }
  0xdf   : > { %p5611_p1 = pneg %p5610_p6 }
  0xe1   : > { %p5618_p12 = pnand %p5617_p11, %p5611_p1 }
  0xe3   : > { %5621 = shalt.err (!%p5618_p12)
}
  0xe4   : > { %4858 = dma.hbm_to_vmem [thread:$0]  (!%p6049_p7), %s5890_s14, 2048, %s797_s8, [#allocation18], %s6771_s7, %s6771_s7, %s5808_s16  }
  0xe5   : > { %s5633_s10 = scalar_lea.vmem %s823_s0, 1024  ;;  %p5641_p2 = scmp.lt.s32.totalorder %s823_s0, %s823_s0 }
  0xe6   : > { %p5634_p13 = scmp.ne.s32.totalorder %s823_s0, %s5633_s10  ;;  %p5642_p3 = scmp.lt.s32.totalorder %s5633_s10, %s5633_s10 }
  0xe8   : > { %p5636_p0 = pnand %p5634_p13, %p6055_p5  ;;  %p5643_p6 = por %p5642_p3, %p5641_p2 }
  0xea   : > { %p5637_p9 = pneg %p5636_p0 }
  0xec   : > { %p5644_p8 = pnand %p5643_p6, %p5637_p9 }
  0xee   : > { %5647 = shalt.err (!%p5644_p8)
}
  0xef   : > { %4864 = dma.hbm_to_vmem [thread:$0]  (!%p6049_p7), %s5900_s24, 1024, %s823_s0, [#allocation21], %s6769_s1, %s6769_s1, %s6768_s23  }
  0xf0   : > { %s5819_s16 = smov [#allocation25]   ;;  %s5820_s15 = smov [#allocation28]  }
  0xf1   : > { %s848_s7 = sshll.u32 %s5819_s16, 4  ;;  %s877_s20 = sshll.u32 %s5820_s15, 4  ;;  %s849_s7 = int_to_ptr.vmem [resolvable:$true] %s848_s7  ;;  %s878_s20 = int_to_ptr.vmem [resolvable:$true] %s877_s20 }
  0xf2   : > { %s5659_s8 = scalar_lea.vmem %s849_s7, 1024  ;;  %p5667_p12 = scmp.lt.s32.totalorder %s849_s7, %s849_s7 }
  0xf3   : > { %p5660_p1 = scmp.ne.s32.totalorder %s849_s7, %s5659_s8  ;;  %p5668_p13 = scmp.lt.s32.totalorder %s5659_s8, %s5659_s8 }
  0xf5   : > { %p5662_p4 = pnand %p5660_p1, %p6055_p5  ;;  %p5669_p0 = por %p5668_p13, %p5667_p12 }
  0xf7   : > { %p5663_p11 = pneg %p5662_p4 }
  0xf9   : > { %p5670_p9 = pnand %p5669_p0, %p5663_p11 }
  0xfb   : > { %5673 = shalt.err (!%p5670_p9)
}
  0xfc   : > { %4870 = dma.hbm_to_vmem [thread:$0]  (!%p6049_p7), %s5910_s6, 1024, %s849_s7, [#allocation24], %s6769_s1, %s6769_s1, %s6768_s23  }
  0xfd   : > { %s5685_s21 = scalar_lea.vmem %s878_s20, 2048  ;;  %p5693_p8 = scmp.lt.s32.totalorder %s878_s20, %s878_s20 }
  0xfe   : > { %p5686_p2 = scmp.ne.s32.totalorder %s878_s20, %s5685_s21  ;;  %p5694_p1 = scmp.lt.s32.totalorder %s5685_s21, %s5685_s21 }
 0x100   : > { %p5688_p3 = pnand %p5686_p2, %p6055_p5  ;;  %p5695_p4 = por %p5694_p1, %p5693_p8 }
 0x102   : > { %p5689_p6 = pneg %p5688_p3 }
 0x104   : > { %p5696_p12 = pnand %p5695_p4, %p5689_p6 }
 0x106   : > { %5699 = shalt.err (!%p5696_p12)
}
 0x107   : > { %s6772_s0 = sld [smem:[#allocation50_spill]]  ;;  %p4247_p11 = scmp.ge.s32.totalorder %s5772_s28, 2 }
 0x109   : > { %920 = sbr.rel (%p4247_p11) target bundleno = 284 (0x11c), region = 120 }
 0x10d   : > { %4876 = dma.hbm_to_vmem [thread:$0]  (!%p6049_p7), %s6772_s0, 2048, %s878_s20, [#allocation27], %s6769_s1, %s6769_s1, %s6768_s23  }
 0x10e   : > { %s6773_s26 = sld [smem:[#allocation46_spill]]  ;;  %s924_s11 = sand.u32 1, %s5772_s28  }
 0x10f   : > { %s926_s13 = sand.u32 1, %s5768_s27   ;;  %s4428_s16 = sshll.u32 %s5772_s28, 8 }
 0x110   : > { %s4248_s10 = sshll.u32 %s926_s13, 5  ;;  %s5821_s8 = smov 512  }
 0x111   : > { %s4789_s23 = scalar_select %p6020_p10, [#allocation0], [#allocation34] }
 0x112   : > { %s928_s7 = scalar_lea.vmem [#allocation8], %s4248_s10  ;;  %4790 = sst [smem:[#allocation31]] (%p6020_p10), %s5821_s8 }
 0x113   : > { %s947_s15 = sshll.u32 %s928_s7, 4  ;;  %s939_s20 = sld [smem:[%s4789_s23]]   ;;  %s948_s15 = int_to_ptr.vmem [resolvable:$true] %s947_s15 }
 0x114   : > { %s934_s1 = scalar_lea.hbm %s6773_s26, %s4428_s16  ;;  %s5822_s21 = smov 256  }
 0x115   : > { %4791 = sst [smem:[#allocation31 + $0x1]] (%p6020_p10), %s5822_s21  ;;  %s5823_s0 = smov 2  }
 0x116   : > { %4792 = sst [smem:[#allocation31 + $0x2]] (%p6020_p10), %s5823_s0  ;;  %s5824_s13 = smov 128  }
 0x117   : > { %4793 = sst [smem:[#allocation31 + $0x3]] (%p6020_p10), %s5824_s13  ;;  %s5825_s10 = smov 8  }
 0x118   : > { %4794 = sst [smem:[#allocation31 + $0x4]] (%p6020_p10), %s5824_s13  ;;  %s925_s23 = scalar_lea.sflag [#allocation9], %s924_s11 }
 0x119   : > { %s4251_s26 = sshll.u32 %s939_s20, 26  ;;  %4795 = sst [smem:[#allocation31 + $0x5]] (%p6020_p10), %s5825_s10 }
 0x11a   : > { %s4252_s16 = sadd.s32 134217728, %s4251_s26  ;;  %s5826_s7 = smov 131072  }
 0x11b   : > { %4796 = dma.general (%p6020_p10), %s934_s1, 512, %s948_s15, %s925_s23, %s5826_s7, [#allocation31], %s4252_s16, 0  }
 0x11c PF: > { %p6774_p7 = scmp.ne.s32.totalorder %s6764_s4, 0 }
 0x11d   : > { %p6775_p5 = scmp.eq.s32.totalorder (!%p6774_p7), %s6002_s2, 0 }
 0x11e   : > { %972 = sbr.rel (%p6774_p7) target bundleno = 5467 (0x155b), region = 128 }
 0x123   : > { %5719 = dma.done.wait (%p6775_p5), [#allocation6], 1024   ;;  %p6776_p13 = pmov %p6775_p5 }
 0x124   : > { %s978_s20 = sand.u32 1, %s6002_s2   ;;  %s6202_s8 = sand.u32 1, %s5764_s5  }
 0x125   : > { %5721 = vsyncadd (%p6776_p13), [#allocation6], 4294966272  ;;  %s4255_s11 = sshll.u32 %s6202_s8, 5  ;;  %s979_s18 = scalar_lea.sflag [#allocation9], %s978_s20 }
 0x126   : > { %s6205_s1 = scalar_lea.vmem [#allocation8], %s4255_s11  ;;  %p6777_p10 = scmp.ne.s32.totalorder %s6759_s22, 0 }
 0x128   : > { %5723 = dma.done.wait (%p6777_p10), %s979_s18, 512  }
 0x129   : > { %5725 = vsyncadd (%p6777_p10), %s979_s18, 4294966784  ;;  %p6778_p0 = pmov %p6775_p5 }
 0x12b   : > { %5727 = dma.done.wait (%p6778_p0), [#allocation9], 128   ;;  %p6779_p9 = pmov %p6778_p0 }
 0x12c   : > { %p6780_p2 = pmov %p6778_p0 }
 0x12d   : > { %5729 = vsyncadd (%p6779_p9), [#allocation9], 4294967168 }
 0x12e   : > { %5731 = dma.done.wait (%p6780_p2), [#allocation12], 1280   ;;  %p6781_p3 = pmov %p6778_p0 }
 0x12f   : > { %p6782_p6 = pmov %p6778_p0 }
 0x130   : > { %5733 = vsyncadd (%p6781_p3), [#allocation12], 4294966016 }
 0x131   : > { %5735 = dma.done.wait (%p6782_p6), [#allocation15], 3072   ;;  %p6783_p8 = pmov %p6778_p0 }
 0x132   : > { %p6784_p1 = pmov %p6778_p0 }
 0x133   : > { %5737 = vsyncadd (%p6783_p8), [#allocation15], 4294964224 }
 0x134   : > { %5739 = dma.done.wait (%p6784_p1), [#allocation18], 3072   ;;  %p6785_p4 = pmov %p6778_p0 }
 0x135   : > { %p6786_p12 = pmov %p6778_p0 }
 0x136   : > { %5741 = vsyncadd (%p6785_p4), [#allocation18], 4294964224 }
 0x137   : > { %5743 = dma.done.wait (%p6786_p12), [#allocation21], 2048   ;;  %p6787_p7 = pmov %p6778_p0 }
 0x138   : > { %p6788_p5 = pmov %p6778_p0 }
 0x139   : > { %5745 = vsyncadd (%p6787_p7), [#allocation21], 4294965248 }
 0x13a   : > { %5747 = dma.done.wait (%p6788_p5), [#allocation24], 3072   ;;  %p6789_p13 = pmov %p6778_p0 }
 0x13b   : > { %p6790_p10 = pmov %p6778_p0 }
 0x13c   : > { %5749 = vsyncadd (%p6789_p13), [#allocation24], 4294964224 }
 0x13d   : > { %5751 = dma.done.wait (%p6790_p10), [#allocation27], 4096  }
 0x13e   : > { %5753 = vsyncadd (%p6778_p0), [#allocation27], 4294963200  ;;  %v1109_v0 = vld [vmem:[#allocation5] sm:$0xff]  ;;  %v1111_v1 = vld [vmem:[#allocation5 + $0x10] sm:$0xff]  ;;  %s6791_s22 = sld [smem:[#allocation52_spill]]  ;;  %s4270_s15 = sshll.u32 %s6002_s2, 4 }
 0x13f   : > { %1123 = vadd.xlane.f32.xlu0 %v1109_v0  ;;  %1127 = vadd.xlane.f32.xlu1 %v1111_v1  ;;  %v1110_v2 = vld [vmem:[#allocation5 + $0x8] sm:$0xff]  ;;  %v1112_v3 = vld [vmem:[#allocation5 + $0x18] sm:$0xff]  ;;  %v1113_v4 = vld [vmem:[#allocation5 + $0x20] sm:$0xff]  ;;  %s6792_s4 = sld [smem:[#allocation53_spill]] }
 0x140   : > { %v1114_v5 = vld [vmem:[#allocation5 + $0x28] sm:$0xff]  ;;  %v1117_v6 = vld [vmem:[%s6205_s1] sm:$0xff]  ;;  %v1119_v8 = vld [vmem:[%s6205_s1 + $0x10] sm:$0xff]  ;;  %s6793_s21 = sld [smem:[#allocation54_spill]] }
 0x141   : > { %v1118_v7 = vld [vmem:[%s6205_s1 + $0x8] sm:$0xff]  ;;  %v1120_v9 = vld [vmem:[%s6205_s1 + $0x18] sm:$0xff]  ;;  %v1115_v10 = vld [vmem:[#allocation5 + $0x30] sm:$0xff]  ;;  %s6794_s0 = sld [smem:[#allocation55_spill]] }
 0x142   : > { %v1116_v11 = vld [vmem:[#allocation5 + $0x38] sm:$0xff]  ;;  %v5005_v60 = vld [vmem:[#allocation14 + $0x74] ss:$8 sps:$4 sm:$0xff]   ;;  %v5007_v61 = vld [vmem:[#allocation14 + $0x70] ss:$8 sps:$4 sm:$0xff]   ;;  %s2479_s13 = sld [smem:[#allocation3]] }
 0x143   : > { %1125 = vadd.xlane.f32.xlu0 %v1110_v2  ;;  %1129 = vadd.xlane.f32.xlu1 %v1112_v3  ;;  %v5008_v62 = vld [vmem:[#allocation14 + $0x64] ss:$8 sps:$4 sm:$0xff]   ;;  %v5010_v63 = vld [vmem:[#allocation14 + $0x60] ss:$8 sps:$4 sm:$0xff]   ;;  %s4334_s26 = sld [smem:[#allocation3 + $0x1]] }
 0x144   : > { %1592 = vmatprep.subr.bf16.mxu1 %v5005_v60  ;;  %s6799_s10 = sld [smem:[#allocation56_spill]] }
 0x145   : > { %1593 = vmatpush1.bf16.msra.mxu1 %v5007_v61  ;;  %s6800_s16 = sld [smem:[#allocation57_spill]] }
 0x146   : > { %1594 = vmatprep.subr.bf16.mxu1 %v5008_v62  ;;  %s3216_s23 = sld [smem:[#allocation4]] }
 0x147   : > { %1131 = vadd.xlane.f32.xlu0 %v1113_v4  ;;  %1133 = vadd.xlane.f32.xlu1 %v1114_v5  ;;  %s4373_s7 = sld [smem:[#allocation4 + $0x1]] }
 0x148   : > { %s6801_s20 = sld [smem:[#allocation58_spill]] }
 0x149   : > { %1595 = vmatpush1.bf16.msra.mxu1 %v5010_v63  ;;  %s6802_s11 = sld [smem:[#allocation59_spill]] }
 0x14a   : > { %s6803_s18 = sld [smem:[#allocation49_spill]] }
 0x14b   : > { %1297 = vadd.xlane.f32.xlu0 %v1117_v6  ;;  %1299 = vadd.xlane.f32.xlu1 %v1118_v7 }
 0x14f   : > { %1301 = vadd.xlane.f32.xlu0 %v1119_v8  ;;  %1303 = vadd.xlane.f32.xlu1 %v1120_v9 }
 0x153   : > { %1135 = vadd.xlane.f32.xlu0 %v1115_v10  ;;  %1137 = vadd.xlane.f32.xlu1 %v1116_v11 }
 0x1c8   : > { %v1124_v12 = vpop.xlane.xlu0 %1123  ;;  %v1128_v13 = vpop.xlane.xlu1 %1127 }
 0x1c9   : > { %v1140_v14 = vmul.f32 0.0078125, %v1124_v12  ;;  %v1142_v15 = vmul.f32 0.0078125, %v1128_v13  ;;  %v5028_v12 = vld [vmem:[#allocation14 + $0x10] ss:$8 sps:$4 sm:$0xff]   ;;  %v5029_v13 = vld [vmem:[#allocation13 + $0x20] sm:$0xff]  }
 0x1cb   : > { %v6243_v16 = vsub.f32 %v1109_v0, %v1140_v14  ;;  %v6245_v17 = vsub.f32 %v1111_v1, %v1142_v15  ;;  %v5011_v0 = vld [vmem:[#allocation14 + $0x54] ss:$8 sps:$4 sm:$0xff]   ;;  %v5013_v1 = vld [vmem:[#allocation14 + $0x50] ss:$8 sps:$4 sm:$0xff]   ;;  %v5030_v14 = vld [vmem:[#allocation14 + $0x4] ss:$8 sps:$4 sm:$0xff]  }
 0x1cc   : > { %v1126_v18 = vpop.xlane.xlu0 %1125  ;;  %v1130_v19 = vpop.xlane.xlu1 %1129  ;;  %1596 = vmatprep.subr.bf16.mxu1 %v5011_v0  ;;  %v5032_v15 = vld [vmem:[#allocation14] ss:$8 sps:$4 sm:$0xff]  }
 0x1cd   : > { %v1141_v20 = vmul.f32 0.0078125, %v1126_v18  ;;  %v1156_v21 = vmul.f32 %v6243_v16, %v6243_v16  ;;  %v1143_v22 = vmul.f32 0.0078125, %v1130_v19  ;;  %v1158_v24 = vmul.f32 %v6245_v17, %v6245_v17  ;;  %1597 = vmatpush1.bf16.msra.mxu1 %v5013_v1  ;;  %v5033_v18 = vld [vmem:[#allocation13 + $0x18] sm:$0xff]  }
 0x1ce   : > { %v5827_v19 = vmov 0  }
 0x1cf   : > { %v6249_v23 = vsub.f32 %v1110_v2, %v1141_v20  ;;  %1164 = vadd.xlane.f32.xlu0 %v1156_v21  ;;  %v6253_v25 = vsub.f32 %v1112_v3, %v1143_v22  ;;  %v5014_v2 = vld [vmem:[#allocation14 + $0x44] ss:$8 sps:$4 sm:$0xff]   ;;  %v5016_v3 = vld [vmem:[#allocation14 + $0x40] ss:$8 sps:$4 sm:$0xff]   ;;  %1624 = vmatprep.mubr.bf16.mxu1 %v5827_v19  ;;  %v5034_v20 = vld [vmem:[#allocation13 + $0x10] sm:$0xff]  }
 0x1d0   : > { %v1132_v26 = vpop.xlane.xlu0 %1131  ;;  %v1134_v27 = vpop.xlane.xlu1 %1133  ;;  %1598 = vmatprep.subr.bf16.mxu1 %v5014_v2  ;;  %v5035_v21 = vld [vmem:[#allocation13 + $0x8] sm:$0xff]   ;;  %v5036_v22 = vld [vmem:[#allocation13] sm:$0xff]  }
 0x1d1   : > { %v1144_v28 = vmul.f32 0.0078125, %v1132_v26  ;;  %v1157_v29 = vmul.f32 %v6249_v23, %v6249_v23  ;;  %v1145_v30 = vmul.f32 0.0078125, %v1134_v27  ;;  %v1159_v33 = vmul.f32 %v6253_v25, %v6253_v25  ;;  %1599 = vmatpush1.bf16.msra.mxu1 %v5016_v3 }
 0x1d3   : > { %v6257_v31 = vsub.f32 %v1113_v4, %v1144_v28  ;;  %1168 = vadd.xlane.f32.xlu0 %v1158_v24  ;;  %1166 = vadd.xlane.f32.xlu1 %v1157_v29  ;;  %v6259_v32 = vsub.f32 %v1114_v5, %v1145_v30  ;;  %v5017_v4 = vld [vmem:[#allocation13 + $0x38] sm:$0xff]  }
 0x1d4   : > { %v1298_v34 = vpop.xlane.xlu0 %1297  ;;  %v1300_v35 = vpop.xlane.xlu1 %1299  ;;  %v5018_v5 = vld [vmem:[#allocation14 + $0x34] ss:$8 sps:$4 sm:$0xff]   ;;  %4561 = vmatprep.subr.bf16.mxu0 %v5017_v4 }
 0x1d5   : > { %v1305_v36 = vmul.f32 0.0078125, %v1298_v34  ;;  %v1160_v37 = vmul.f32 %v6257_v31, %v6257_v31  ;;  %v1306_v38 = vmul.f32 0.0078125, %v1300_v35  ;;  %v1161_v40 = vmul.f32 %v6259_v32, %v6259_v32  ;;  %1600 = vmatprep.subr.bf16.mxu1 %v5018_v5  ;;  %4562 = vmatpush3.bf16.msra.mxu0 %v5017_v4 }
 0x1d7   : > { %v6265_v39 = vsub.f32 %v1117_v6, %v1305_v36  ;;  %1170 = vadd.xlane.f32.xlu1 %v1159_v33  ;;  %1172 = vadd.xlane.f32.xlu0 %v1160_v37  ;;  %v6269_v41 = vsub.f32 %v1118_v7, %v1306_v38  ;;  %v5020_v6 = vld [vmem:[#allocation14 + $0x30] ss:$8 sps:$4 sm:$0xff]  }
 0x1d8   : > { %v1302_v42 = vpop.xlane.xlu0 %1301  ;;  %v1304_v43 = vpop.xlane.xlu1 %1303  ;;  %1601 = vmatpush1.bf16.msra.mxu1 %v5020_v6  ;;  %v5021_v7 = vld [vmem:[#allocation13 + $0x30] sm:$0xff]  }
 0x1d9   : > { %v1307_v44 = vmul.f32 0.0078125, %v1302_v42  ;;  %v1313_v45 = vmul.f32 %v6265_v39, %v6265_v39  ;;  %v1308_v46 = vmul.f32 0.0078125, %v1304_v43  ;;  %v1314_v49 = vmul.f32 %v6269_v41, %v6269_v41  ;;  %4563 = vmatprep.subr.bf16.mxu0 %v5021_v7 }
 0x1da   : > { %4564 = vmatpush3.bf16.msra.mxu0 %v5021_v7 }
 0x1db   : > { %v6273_v47 = vsub.f32 %v1119_v8, %v1307_v44  ;;  %1174 = vadd.xlane.f32.xlu1 %v1161_v40  ;;  %1317 = vadd.xlane.f32.xlu0 %v1313_v45  ;;  %v6275_v48 = vsub.f32 %v1120_v9, %v1308_v46  ;;  %v5022_v8 = vld [vmem:[#allocation14 + $0x24] ss:$8 sps:$4 sm:$0xff]   ;;  %v5024_v9 = vld [vmem:[#allocation14 + $0x20] ss:$8 sps:$4 sm:$0xff]  }
 0x1dc   : > { %v1136_v50 = vpop.xlane.xlu0 %1135  ;;  %v1138_v51 = vpop.xlane.xlu1 %1137  ;;  %1602 = vmatprep.subr.bf16.mxu1 %v5022_v8 }
 0x1dd   : > { %v1146_v52 = vmul.f32 0.0078125, %v1136_v50  ;;  %v1315_v53 = vmul.f32 %v6273_v47, %v6273_v47  ;;  %v1147_v54 = vmul.f32 0.0078125, %v1138_v51  ;;  %v1316_v56 = vmul.f32 %v6275_v48, %v6275_v48  ;;  %1603 = vmatpush1.bf16.msra.mxu1 %v5024_v9 }
 0x1df   : > { %v6281_v55 = vsub.f32 %v1115_v10, %v1146_v52  ;;  %1319 = vadd.xlane.f32.xlu1 %v1314_v49  ;;  %1321 = vadd.xlane.f32.xlu0 %v1315_v53  ;;  %v6285_v57 = vsub.f32 %v1116_v11, %v1147_v54  ;;  %v5025_v10 = vld [vmem:[#allocation13 + $0x28] sm:$0xff]   ;;  %v5026_v11 = vld [vmem:[#allocation14 + $0x14] ss:$8 sps:$4 sm:$0xff]  }
 0x1e0   : > { %4565 = vmatprep.subr.bf16.mxu0 %v5025_v10  ;;  %1604 = vmatprep.subr.bf16.mxu1 %v5026_v11 }
 0x1e1   : > { %v1162_v58 = vmul.f32 %v6281_v55, %v6281_v55  ;;  %v1163_v59 = vmul.f32 %v6285_v57, %v6285_v57  ;;  %4566 = vmatpush3.bf16.msra.mxu0 %v5025_v10  ;;  %1605 = vmatpush1.bf16.msra.mxu1 %v5028_v12 }
 0x1e2   : > { %4567 = vmatprep.subr.bf16.mxu0 %v5029_v13  ;;  %1606 = vmatprep.subr.bf16.mxu1 %v5030_v14 }
 0x1e3   : > { %1323 = vadd.xlane.f32.xlu1 %v1316_v56  ;;  %1176 = vadd.xlane.f32.xlu0 %v1162_v58 }
 0x1e5   : > { %4568 = vmatpush3.bf16.msra.mxu0 %v5029_v13  ;;  %1607 = vmatpush1.bf16.msra.mxu1 %v5032_v15 }
 0x1e6   : > { %4569 = vmatprep.subr.bf16.mxu0 %v5033_v18 }
 0x1e7   : > { %1178 = vadd.xlane.f32.xlu1 %v1163_v59 }
 0x1e9   : > { %4570 = vmatpush3.bf16.msra.mxu0 %v5033_v18 }
 0x1ea   : > { %4571 = vmatprep.subr.bf16.mxu0 %v5034_v20 }
 0x1ed   : > { %4572 = vmatpush3.bf16.msra.mxu0 %v5034_v20 }
 0x1ee   : > { %4573 = vmatprep.subr.bf16.mxu0 %v5035_v21 }
 0x1f1   : > { %4574 = vmatpush3.bf16.msra.mxu0 %v5035_v21 }
 0x1f2   : > { %4575 = vmatprep.subr.bf16.mxu0 %v5036_v22 }
 0x1f5   : > { %4576 = vmatpush3.bf16.msra.mxu0 %v5036_v22 }
 0x258   : > { %v1165_v24 = vpop.xlane.xlu0 %1164 }
 0x259   : > { %v1181_v26 = vmul.f32 0.007874016, %v1165_v24 }
 0x25b   : > { %5168 = vrsqrt.f32 %v1181_v26  ;;  %vm1191_vm0 = vcmp.eq.f32.partialorder %v1181_v26, inf  ;;  %v1194_v51 = vand.u32 2147483648, %v1181_v26  ;;  %vm1193_vm1 = vcmp.eq.f32.partialorder %v1181_v26, 0.0 }
 0x25c   : > { %v1167_v27 = vpop.xlane.xlu1 %1166  ;;  %v1169_v28 = vpop.xlane.xlu0 %1168 }
 0x25d   : > { %v1182_v29 = vmul.f32 0.007874016, %v1167_v27  ;;  %v1183_v30 = vmul.f32 0.007874016, %v1169_v28 }
 0x25f   : > { %5170 = vrsqrt.f32 %v1182_v29  ;;  %vm1198_vm2 = vcmp.eq.f32.partialorder %v1182_v29, inf  ;;  %vm1200_vm3 = vcmp.eq.f32.partialorder %v1182_v29, 0.0  ;;  %v1201_v56 = vand.u32 2147483648, %v1182_v29 }
 0x260   : > { %5172 = vrsqrt.f32 %v1183_v30  ;;  %v1171_v33 = vpop.xlane.xlu1 %1170  ;;  %v1173_v34 = vpop.xlane.xlu0 %1172  ;;  %vm1205_vm4 = vcmp.eq.f32.partialorder %v1183_v30, inf  ;;  %vm1207_vm5 = vcmp.eq.f32.partialorder %v1183_v30, 0.0  ;;  %v1208_v0 = vand.u32 2147483648, %v1183_v30 }
 0x261   : > { %v6292_v35 = vmul.f32 0.007874016, %v1171_v33  ;;  %v6294_v36 = vmul.f32 0.007874016, %v1173_v34 }
 0x263   : > { %5174 = vrsqrt.f32 %v6292_v35  ;;  %vm1212_vm6 = vcmp.eq.f32.partialorder %v6292_v35, inf  ;;  %vm1214_vm7 = vcmp.eq.f32.partialorder %v6292_v35, 0.0  ;;  %v1215_v7 = vand.u32 2147483648, %v6292_v35 }
 0x264   : > { %5176 = vrsqrt.f32 %v6294_v36  ;;  %v1175_v37 = vpop.xlane.xlu1 %1174  ;;  %v1318_v38 = vpop.xlane.xlu0 %1317  ;;  %vm1219_vm8 = vcmp.eq.f32.partialorder %v6294_v36, inf  ;;  %vm1221_vm9 = vcmp.eq.f32.partialorder %v6294_v36, 0.0  ;;  %v1222_v18 = vand.u32 2147483648, %v6294_v36 }
 0x265   : > { %v6298_v40 = vmul.f32 0.007874016, %v1175_v37  ;;  %v6300_v42 = vmul.f32 0.007874016, %v1318_v38 }
 0x267   : > { %5178 = vrsqrt.f32 %v6298_v40  ;;  %vm1226_vm10 = vcmp.eq.f32.partialorder %v6298_v40, inf  ;;  %vm1228_vm11 = vcmp.eq.f32.partialorder %v6298_v40, 0.0  ;;  %v1229_v33 = vand.u32 2147483648, %v6298_v40 }
 0x268   : > { %v5169_v43 = vpop.eup %5168  ;;  %5180 = vrsqrt.f32 %v6300_v42  ;;  %v1320_v44 = vpop.xlane.xlu1 %1319  ;;  %vm1331_vm12 = vcmp.eq.f32.partialorder %v6300_v42, inf  ;;  %vm1333_vm13 = vcmp.eq.f32.partialorder %v6300_v42, 0.0 }
 0x269   : > { %v1322_v45 = vpop.xlane.xlu0 %1321  ;;  %v1190_v46 = vmul.f32 %v5169_v43, %v1181_v26  ;;  %v6304_v49 = vmul.f32 0.007874016, %v1320_v44 }
 0x26a   : > { %v6306_v50 = vmul.f32 0.007874016, %v1322_v45 }
 0x26b   : > { %v1192_v52 = vsel %vm1191_vm0, %v1181_v26, %v1190_v46  ;;  %5182 = vrsqrt.f32 %v6304_v49  ;;  %vm1338_vm14 = vcmp.eq.f32.partialorder %v6304_v49, inf  ;;  %vm1340_vm15 = vcmp.eq.f32.partialorder %v6304_v49, 0.0 }
 0x26c   : > { %v5171_v53 = vpop.eup %5170  ;;  %v1195_v54 = vsel %vm1193_vm1, %v1194_v51, %v1192_v52  ;;  %5184 = vrsqrt.f32 %v6306_v50  ;;  %v1324_v58 = vpop.xlane.xlu1 %1323  ;;  %v6353_v52 = vld [vmem:[%s6791_s22] ss:$0 sm:$0xff]  ;;  %vm1345_vm0 = vcmp.eq.f32.partialorder %v6306_v50, inf  ;;  %vm1347_vm1 = vcmp.eq.f32.partialorder %v6306_v50, 0.0  ;;  %s4269_s22 = sshll.u32 %s6202_s8, 4 }
 0x26d   : > { %v1177_v59 = vpop.xlane.xlu0 %1176  ;;  %v5173_v60 = vpop.eup %5172  ;;  %v1259_v61 = vadd.f32 1e-06, %v1195_v54  ;;  %v1197_v62 = vmul.f32 %v5171_v53, %v1182_v29  ;;  %v6310_v1 = vmul.f32 0.007874016, %v1324_v58  ;;  %v1341_v53 = vand.u32 2147483648, %v6304_v49 }
 0x26e   : > { %v1204_v63 = vmul.f32 %v5173_v60, %v1183_v30  ;;  %v6312_v2 = vmul.f32 0.007874016, %v1177_v59 }
 0x26f   : > { %5186 = vrcp.f32 %v1259_v61  ;;  %v1199_v3 = vsel %vm1198_vm2, %v1182_v29, %v1197_v62  ;;  %v1251_v62 = vmul.f32 %v6353_v52, %v6243_v16  ;;  %vm1352_vm2 = vcmp.eq.f32.partialorder %v6310_v1, inf }
 0x270   : > { %v5175_v4 = vpop.eup %5174  ;;  %v1202_v5 = vsel %vm1200_vm3, %v1201_v56, %v1199_v3  ;;  %v1206_v6 = vsel %vm1205_vm4, %v1183_v30, %v1204_v63  ;;  %5188 = vrsqrt.f32 %v6310_v1  ;;  %v1179_v14 = vpop.xlane.xlu1 %1178  ;;  %v1348_v56 = vand.u32 2147483648, %v6306_v50 }
 0x271   : > { %v5177_v8 = vpop.eup %5176  ;;  %v1260_v9 = vadd.f32 1e-06, %v1202_v5  ;;  %v1209_v10 = vsel %vm1207_vm5, %v1208_v0, %v1206_v6  ;;  %v1211_v11 = vmul.f32 %v5175_v4, %v6292_v35  ;;  %5190 = vrsqrt.f32 %v6312_v2 }
 0x272   : > { %v1261_v12 = vadd.f32 1e-06, %v1209_v10  ;;  %v1218_v13 = vmul.f32 %v5177_v8, %v6294_v36  ;;  %v6336_v29 = vmul.f32 0.007874016, %v1179_v14  ;;  %v1252_v3 = vmul.f32 %v6353_v52, %v6249_v23 }
 0x273   : > { %5192 = vrcp.f32 %v1260_v9  ;;  %v1213_v15 = vsel %vm1212_vm6, %v6292_v35, %v1211_v11  ;;  %vm1354_vm3 = vcmp.eq.f32.partialorder %v6310_v1, 0.0  ;;  %v6376_v9 = vld [vmem:[%s6792_s4] ss:$0 sm:$0xff]  ;;  %vm1233_vm4 = vcmp.eq.f32.partialorder %v6312_v2, inf  ;;  %s1104_s4 = scalar_lea.vmem [#allocation29], %s4269_s22 }
 0x274   : > { %v5179_v20 = vpop.eup %5178  ;;  %5194 = vrcp.f32 %v1261_v12  ;;  %v1216_v21 = vsel %vm1214_vm7, %v1215_v7, %v1213_v15  ;;  %v1220_v22 = vsel %vm1219_vm8, %v6294_v36, %v1218_v13  ;;  %v1334_v36 = vand.u32 2147483648, %v6300_v42 }
 0x275   : > { %v5181_v24 = vpop.eup %5180  ;;  %v1262_v26 = vadd.f32 1e-06, %v1216_v21  ;;  %v1223_v27 = vsel %vm1221_vm9, %v1222_v18, %v1220_v22  ;;  %v1225_v28 = vmul.f32 %v5179_v20, %v6298_v40  ;;  %v1236_v11 = vand.u32 2147483648, %v6312_v2 }
 0x276   : > { %v1263_v30 = vadd.f32 1e-06, %v1223_v27  ;;  %v1330_v34 = vmul.f32 %v5181_v24, %v6300_v42  ;;  %v1254_v13 = vmul.f32 %v6353_v52, %v6253_v25  ;;  %vm1235_vm5 = vcmp.eq.f32.partialorder %v6312_v2, 0.0 }
 0x277   : > { %5196 = vrcp.f32 %v1262_v26  ;;  %v1227_v35 = vsel %vm1226_vm10, %v6298_v40, %v1225_v28  ;;  %v1255_v26 = vmul.f32 %v6353_v52, %v6257_v31  ;;  %vm1240_vm6 = vcmp.eq.f32.partialorder %v6336_v29, inf }
 0x278   : > { %v5183_v37 = vpop.eup %5182  ;;  %5198 = vrcp.f32 %v1263_v30  ;;  %v1230_v38 = vsel %vm1228_vm11, %v1229_v33, %v1227_v35  ;;  %v1332_v43 = vsel %vm1331_vm12, %v6300_v42, %v1330_v34  ;;  %v1256_v33 = vmul.f32 %v6353_v52, %v6259_v32 }
 0x279   : > { %v5185_v44 = vpop.eup %5184  ;;  %v1264_v45 = vadd.f32 1e-06, %v1230_v38  ;;  %v1337_v46 = vmul.f32 %v5183_v37, %v6304_v49  ;;  %5200 = vrsqrt.f32 %v6336_v29  ;;  %v1335_v51 = vsel %vm1333_vm13, %v1334_v36, %v1332_v43 }
 0x27a   : > { %v1344_v40 = vmul.f32 %v5185_v44, %v6306_v50  ;;  %v1361_v54 = vadd.f32 1e-06, %v1335_v51  ;;  %v1357_v38 = vmul.f32 %v6353_v52, %v6265_v39  ;;  %vm1242_vm7 = vcmp.eq.f32.partialorder %v6336_v29, 0.0 }
 0x27b   : > { %5202 = vrcp.f32 %v1264_v45  ;;  %v1339_v42 = vsel %vm1338_vm14, %v6304_v49, %v1337_v46  ;;  %v1253_v49 = vmul.f32 %v6353_v52, %v6245_v17  ;;  %v1243_v31 = vand.u32 2147483648, %v6336_v29 }
 0x27c   : > { %v5187_v58 = vpop.eup %5186  ;;  %v1346_v59 = vsel %vm1345_vm0, %v6306_v50, %v1344_v40  ;;  %v1342_v60 = vsel %vm1340_vm15, %v1341_v53, %v1339_v42  ;;  %5204 = vrcp.f32 %v1361_v54  ;;  %v1355_v50 = vand.u32 2147483648, %v6310_v1 }
 0x27d   : > { %v5189_v61 = vpop.eup %5188  ;;  %v1349_v63 = vsel %vm1347_vm1, %v1348_v56, %v1346_v59  ;;  %v1362_v0 = vadd.f32 1e-06, %v1342_v60  ;;  %v1268_v7 = vmul.f32 %v5187_v58, %v1251_v62  ;;  %v1358_v46 = vmul.f32 %v6353_v52, %v6269_v41 }
 0x27e   : > { %v1363_v4 = vadd.f32 1e-06, %v1349_v63  ;;  %v1351_v5 = vmul.f32 %v5189_v61, %v6310_v1  ;;  %v5191_v6 = vpop.eup %5190  ;;  %v1360_v61 = vmul.f32 %v6353_v52, %v6275_v48  ;;  %v1258_v48 = vmul.f32 %v6353_v52, %v6285_v57 }
 0x27f   : > { %5206 = vrcp.f32 %v1362_v0  ;;  %v1232_v17 = vmul.f32 %v5191_v6, %v6312_v2  ;;  %v1289_v18 = vadd.f32 %v6376_v9, %v1268_v7  ;;  %v1257_v6 = vmul.f32 %v6353_v52, %v6281_v55 }
 0x280   : > { %v5193_v16 = vpop.eup %5192  ;;  %5208 = vrcp.f32 %v1363_v4  ;;  %v1353_v8 = vsel %vm1352_vm2, %v6310_v1, %v1351_v5  ;;  %vm5829_vm8 = vmmov 0   ;;  %vm1775_vm10 = vcmask 261120  }
 0x281   : > { %v5195_v23 = vpop.eup %5194  ;;  %v1356_v10 = vsel %vm1354_vm3, %v1355_v50, %v1353_v8  ;;  %v1270_v12 = vmul.f32 %v5193_v16, %v1252_v3  ;;  %v1234_v15 = vsel %vm1233_vm4, %v6312_v2, %v1232_v17  ;;  %vm2541_vm4 = vcmask 1043456  }
 0x282   : > { %v1364_v14 = vadd.f32 1e-06, %v1356_v10  ;;  %v1237_v1 = vsel %vm1235_vm5, %v1236_v11, %v1234_v15  ;;  %v1272_v21 = vmul.f32 %v5195_v23, %v1253_v49  ;;  %v5828_v10 = vmov 0.0  }
 0x283   : > { %v1290_v20 = vadd.f32 %v6376_v9, %v1270_v12  ;;  %v1265_v27 = vadd.f32 1e-06, %v1237_v1  ;;  %4581 = vmatprep.subr.bf16.mxu0 %v5828_v10 }
 0x284   : > { %v5197_v22 = vpop.eup %5196  ;;  %5210 = vrcp.f32 %v1364_v14  ;;  %v1291_v34 = vadd.f32 %v6376_v9, %v1272_v21 }
 0x285   : > { %v5199_v24 = vpop.eup %5198  ;;  %v1492_v28 = vpack.c.bf16 %v1290_v20, %v1289_v18  ;;  %v1274_v25 = vmul.f32 %v5197_v22, %v1254_v13  ;;  %5212 = vrcp.f32 %v1265_v27 }
 0x286   : > { %v5201_v30 = vpop.eup %5200  ;;  %v1276_v36 = vmul.f32 %v5199_v24, %v1255_v26 }
 0x287   : > { %v1239_v2 = vmul.f32 %v5201_v30, %v6336_v29  ;;  %1625 = vmatmul.mubr.bf16.vlgmr.msra.gmra.mxu1 %v1492_v28  ;;  %v1292_v35 = vadd.f32 %v6376_v9, %v1274_v25 }
 0x288   : > { %v5203_v37 = vpop.eup %5202  ;;  %1634 = vmatprep.mubr.bf16.mxu1 %v5827_v19  ;;  %v1293_v40 = vadd.f32 %v6376_v9, %v1276_v36 }
 0x289   : > { %v5205_v32 = vpop.eup %5204  ;;  %v1241_v43 = vsel %vm1240_vm6, %v6336_v29, %v1239_v2  ;;  %v1493_v44 = vpack.c.bf16 %v1292_v35, %v1291_v34  ;;  %v1278_v45 = vmul.f32 %v5203_v37, %v1256_v33  ;;  %v1359_v29 = vmul.f32 %v6353_v52, %v6273_v47 }
 0x28a   : > { %v1244_v51 = vsel %vm1242_vm7, %v1243_v31, %v1241_v43  ;;  %v1366_v39 = vmul.f32 %v5205_v32, %v1357_v38  ;;  %v1757_v32 = vlaneseq  ;;  %vm2489_vm7 = vcmask 64512  }
 0x28b   : > { %v1266_v53 = vadd.f32 1e-06, %v1244_v51  ;;  %v1294_v54 = vadd.f32 %v6376_v9, %v1278_v45 }
 0x28c   : > { %v5207_v42 = vpop.eup %5206  ;;  %v1373_v60 = vadd.f32 %v6376_v9, %v1366_v39  ;;  %v6442_v43 = vshrl.u32 %v1757_v32, 7 }
 0x28d   : > { %v5209_v56 = vpop.eup %5208  ;;  %5214 = vrcp.f32 %v1266_v53  ;;  %v1368_v58 = vmul.f32 %v5207_v42, %v1358_v46  ;;  %v1494_v59 = vpack.c.bf16 %v1294_v54, %v1293_v40  ;;  %v6445_v46 = vand.u32 127, %v1757_v32 }
 0x28e   : > { %v1370_v62 = vmul.f32 %v5209_v56, %v1359_v29  ;;  %v1759_v51 = vadd.s32 8, %v6442_v43 }
 0x28f   : > { %1635 = vmatmul.mubr.bf16.gmra.mxu1 %v1493_v44  ;;  %v1374_v41 = vadd.f32 %v6376_v9, %v1368_v58  ;;  %v1760_v44 = vstv %s4270_s15  ;;  %s3960_s15 = scalar_lea.sflag [#allocation7], %s6202_s8 }
 0x290   : > { %1644 = vmatprep.mubr.bf16.mxu1 %v5827_v19  ;;  %v1375_v3 = vadd.f32 %v6376_v9, %v1370_v62  ;;  %v1761_v45 = vadd.s32 %v1760_v44, %v6442_v43  ;;  %v1762_v39 = vadd.s32 %v1760_v44, %v1759_v51 }
 0x291   : > { %v5211_v63 = vpop.eup %5210  ;;  %v1377_v0 = vpack.c.bf16 %v1374_v41, %v1373_v60 }
 0x292   : > { %v1372_v49 = vmul.f32 %v5211_v63, %v1360_v61  ;;  %v5213_v47 = vpop.eup %5212  ;;  %vm1765_vm9 = vcmp.le.s32.totalorder %v6445_v46, %v1761_v45  ;;  %vm1766_vm11 = vcmp.le.s32.totalorder %v6445_v46, %v1762_v39 }
 0x293   : > { %4577 = vmatprep.mubr.bf16.mxu0 %v1377_v0  ;;  %v1280_v50 = vmul.f32 %v5213_v47, %v1257_v6 }
 0x294   : > { %v1376_v4 = vadd.f32 %v6376_v9, %v1372_v49 }
 0x295   : > { %v1295_v8 = vadd.f32 %v6376_v9, %v1280_v50 }
 0x296   : > { %v1378_v5 = vpack.c.bf16 %v1376_v4, %v1375_v3 }
 0x297   : > { %1645 = vmatmul.mubr.bf16.gmra.mxu1 %v1494_v59 }
 0x298   : > { %4578 = vmatmul.mubr.bf16.vlgmr.msra.gmra.mxu0 %v1378_v5  ;;  %1654 = vmatprep.mubr.bf16.mxu1 %v5827_v19 }
 0x299   : > { %4585 = vmatprep.mubr.msk.bf16.mxu0 %vm5829_vm8, %v5828_v10 }
 0x29a   : > { %v5215_v7 = vpop.eup %5214 }
 0x29b   : > { %v1282_v16 = vmul.f32 %v5215_v7, %v1258_v48 }
 0x29d   : > { %v1296_v17 = vadd.f32 %v6376_v9, %v1282_v16 }
 0x29f   : > { %v1495_v23 = vpack.c.bf16 %v1296_v17, %v1295_v8 }
 0x2a1   : > { %1655 = vmatmul.mubr.bf16.gmra.mxu1 %v1495_v23 }
 0x347   : > { %v1626_v55 = vpop.f32.mrf.mxu1 }
 0x349   : > { %v1628_v11 = vpop.f32.mrf.mxu1 }
 0x34b   : > { %v1630_v12 = vpop.f32.mrf.mxu1 }
 0x34c   : > { %v1667_v24 = vpack.c.bf16 %v1630_v12, %v1626_v55 }
 0x34d   : > { %v1632_v57 = vpop.f32.mrf.mxu1 }
 0x34e   : > { %v1822_v31 = vpack.c.bf16 %v1632_v57, %v1628_v11 }
 0x34f   : > { %v1636_v52 = vpop.f32.mrf.mxu1 }
 0x351   : > { %v1638_v13 = vpop.f32.mrf.mxu1 }
 0x353   : > { %v1640_v14 = vpop.f32.mrf.mxu1 }
 0x354   : > { %v1668_v15 = vpack.c.bf16 %v1640_v14, %v1636_v52 }
 0x355   : > { %v1642_v1 = vpop.f32.mrf.mxu1 }
 0x356   : > { %4582 = vmatpush3.bf16.xpose.msra.mxu0 %v1668_v15  ;;  %v1823_v38 = vpack.c.bf16 %v1642_v1, %v1638_v13 }
 0x357   : > { %v1646_v9 = vpop.f32.mrf.mxu1  ;;  %4583 = vmatprep.subr.bf16.mxu0 %v5828_v10 }
 0x358   : > { %v4579_v18 = vpop.f32.mrf.mxu0 }
 0x359   : > { %v6424_v20 = vpop.f32.mrf.mxu1 }
 0x35a   : > { %v1477_v21 = vpop.f32.mrf.mxu0 }
 0x35b   : > { %v1650_v22 = vpop.f32.mrf.mxu1 }
 0x35c   : > { %v4580_v26 = vpop.f32.mrf.mxu0  ;;  %v1669_v36 = vpack.c.bf16 %v1650_v22, %v1646_v9 }
 0x35d   : > { %v6426_v27 = vpop.f32.mrf.mxu1  ;;  %v1666_v37 = vpack.c.bf16 %v4580_v26, %v4579_v18  ;;  %v5038_v26 = vld [vmem:[#allocation16 + $0x30] sm:$0xff]  }
 0x35e   : > { %v1824_v28 = vpack.c.bf16 %v6426_v27, %v6424_v20  ;;  %4584 = vmatpush3.bf16.xpose.msra.mxu0 %v1667_v24  ;;  %v1480_v25 = vpop.f32.mrf.mxu0  ;;  %v5037_v24 = vld [vmem:[#allocation16 + $0x38] sm:$0xff]   ;;  %v5044_v20 = vld [vmem:[#allocation16] sm:$0xff]  }
 0x35f   : > { %4589 = vmatprep.subr.bf16.mxu0 %v5828_v10  ;;  %v1665_v33 = vpack.c.bf16 %v1480_v25, %v1477_v21  ;;  %4613 = vmatprep.subr.bf16.mxu1 %v5037_v24  ;;  %v5039_v25 = vld [vmem:[#allocation16 + $0x28] sm:$0xff]  }
 0x360   : > { %4614 = vmatpush3.bf16.msra.mxu1 %v5037_v24 }
 0x361   : > { %v1656_v30 = vpop.f32.mrf.mxu1  ;;  %4615 = vmatprep.subr.bf16.mxu1 %v5038_v26 }
 0x363   : > { %v6431_v2 = vpop.f32.mrf.mxu1 }
 0x364   : > { %4616 = vmatpush3.bf16.msra.mxu1 %v5038_v26 }
 0x365   : > { %v1660_v34 = vpop.f32.mrf.mxu1  ;;  %4586 = vmatmul.mubr.bf16.vlgmr.msra.gmra.mxu0 %v1665_v33  ;;  %4617 = vmatprep.subr.bf16.mxu1 %v5039_v25 }
 0x366   : > { %v1670_v35 = vpack.c.bf16 %v1660_v34, %v1656_v30  ;;  %4593 = vmatprep.mubr.msk.bf16.mxu0 %vm5829_vm8, %v5828_v10 }
 0x368   : > { %4590 = vmatpush3.bf16.xpose.msra.mxu0 %v1670_v35  ;;  %4618 = vmatpush3.bf16.msra.mxu1 %v5039_v25  ;;  %v5047_v25 = vld [vmem:[#allocation19 + $0x74] ss:$8 sps:$4 sm:$0xff]  }
 0x369   : > { %4591 = vmatprep.subr.bf16.mxu0 %v5828_v10 }
 0x370   : > { %4592 = vmatpush3.bf16.xpose.msra.mxu0 %v1669_v36 }
 0x371   : > { %4597 = vmatprep.subr.bf16.mxu0 %v5828_v10 }
 0x377   : > { %4594 = vmatmul.mubr.bf16.vlgmr.msra.gmra.mxu0 %v1666_v37  ;;  %v1662_v37 = vpop.f32.mrf.mxu1 }
 0x378   : > { %4598 = vmatpush3.bf16.msra.mxu0 %v1823_v38  ;;  %4601 = vmatprep.mubr.msk.bf16.mxu0 %vm5829_vm8, %v5828_v10  ;;  %v1825_v44 = vpack.c.bf16 %v1662_v37, %v6431_v2  ;;  %v5040_v2 = vld [vmem:[#allocation16 + $0x20] sm:$0xff]   ;;  %v5052_v37 = vld [vmem:[#allocation19 + $0x50] ss:$8 sps:$4 sm:$0xff]  }
 0x379   : > { %4599 = vmatprep.subr.bf16.mxu0 %v5828_v10  ;;  %4619 = vmatprep.subr.bf16.mxu1 %v5040_v2 }
 0x37a   : > { %4620 = vmatpush3.bf16.msra.mxu1 %v5040_v2  ;;  %v5070_v2 = vld [vmem:[#allocation19 + $0x14] ss:$8 sps:$4 sm:$0xff]  }
 0x37c   : > { %4600 = vmatpush3.bf16.msra.mxu0 %v1822_v31 }
 0x37d   : > { %4605 = vmatprep.subr.bf16.mxu0 %v5828_v10 }
 0x425   : > { %v1705_v53 = vpop.f32.mrf.mxu0 }
 0x426   : > { %v1753_v40 = vmul.f32 0.088388346, %v1705_v53 }
 0x427   : > { %v4587_v54 = vpop.f32.mrf.mxu0 }
 0x428   : > { %v1771_v42 = vsel %vm1765_vm9, %v1753_v40, -1e+09 }
 0x429   : > { %v1708_v56 = vpop.f32.mrf.mxu0  ;;  %v1776_v58 = vsel %vm1775_vm10, %v1771_v42, -inf }
 0x42a   : > { %v1754_v59 = vmul.f32 0.088388346, %v1708_v56  ;;  %1777 = vmax.xlane.f32.xlu0 %v1776_v58  ;;  %v5042_v56 = vld [vmem:[#allocation16 + $0x10] sm:$0xff]   ;;  %v5043_v58 = vld [vmem:[#allocation16 + $0x8] sm:$0xff]  }
 0x42b   : > { %v4588_v29 = vpop.f32.mrf.mxu0 }
 0x42c   : > { %v1772_v60 = vsel %vm1766_vm11, %v1754_v59, -1e+09 }
 0x42d   : > { %v1779_v41 = vsel %vm1775_vm10, %v1772_v60, -inf }
 0x42e   : > { %1780 = vmax.xlane.f32.xlu1 %v1779_v41 }
 0x437   : > { %v1746_v61 = vpop.f32.mrf.mxu0 }
 0x438   : > { %v1755_v62 = vmul.f32 0.088388346, %v1746_v61 }
 0x439   : > { %v4595_v63 = vpop.f32.mrf.mxu0 }
 0x43a   : > { %v1773_v0 = vsel %vm1765_vm9, %v1755_v62, -1e+09 }
 0x43b   : > { %v1749_v49 = vpop.f32.mrf.mxu0  ;;  %v1782_v3 = vsel %vm1775_vm10, %v1773_v0, -inf }
 0x43c   : > { %v1756_v4 = vmul.f32 0.088388346, %v1749_v49  ;;  %1783 = vmax.xlane.f32.xlu0 %v1782_v3 }
 0x43d   : > { %v4596_v47 = vpop.f32.mrf.mxu0 }
 0x43e   : > { %v1774_v5 = vsel %vm1766_vm11, %v1756_v4, -1e+09  ;;  %v5312_v4 = vld [vmem:[%s6205_s1] sm:$0xff] }
 0x43f   : > { %v1785_v6 = vsel %vm1775_vm10, %v1774_v5, -inf }
 0x440   : > { %1786 = vmax.xlane.f32.xlu1 %v1785_v6 }
 0x4b3   : > { %v1778_v48 = vpop.xlane.xlu0 %1777 }
 0x4b4   : > { %v1788_v50 = vsub.f32 %v1771_v42, %v1778_v48  ;;  %v5041_v42 = vld [vmem:[#allocation16 + $0x18] sm:$0xff]  }
 0x4b5   : > { %4621 = vmatprep.subr.bf16.mxu1 %v5041_v42  ;;  %v5313_v48 = vld [vmem:[%s6205_s1 + $0x10] sm:$0xff] }
 0x4b6   : > { %v1792_v7 = vmul.f32 1.442695, %v1788_v50  ;;  %4622 = vmatpush3.bf16.msra.mxu1 %v5041_v42  ;;  %v5068_v42 = vld [vmem:[#allocation19 + $0x10] ss:$8 sps:$4 sm:$0xff]  }
 0x4b7   : > { %v1781_v16 = vpop.xlane.xlu1 %1780  ;;  %4623 = vmatprep.subr.bf16.mxu1 %v5042_v56 }
 0x4b8   : > { %5216 = vpow2.f32 %v1792_v7  ;;  %v1789_v8 = vsub.f32 %v1772_v60, %v1781_v16  ;;  %v5314_v7 = vld [vmem:[%s6205_s1 + $0x8] sm:$0xff] }
 0x4ba   : > { %v1794_v17 = vmul.f32 1.442695, %v1789_v8  ;;  %4624 = vmatpush3.bf16.msra.mxu1 %v5042_v56  ;;  %v5315_v8 = vld [vmem:[%s6205_s1 + $0x18] sm:$0xff]  ;;  %v5071_v56 = vld [vmem:[#allocation17 + $0x10] sm:$0xff]   ;;  %s6804_s1 = sld [smem:[#allocation51_spill]] }
 0x4bb   : > { %4625 = vmatprep.subr.bf16.mxu1 %v5043_v58 }
 0x4bc   : > { %5218 = vpow2.f32 %v1794_v17 }
 0x4be   : > { %4626 = vmatpush3.bf16.msra.mxu1 %v5043_v58  ;;  %v5074_v58 = vld [vmem:[#allocation19 + $0x4] ss:$8 sps:$4 sm:$0xff]  }
 0x4bf   : > { %4627 = vmatprep.subr.bf16.mxu1 %v5044_v20 }
 0x4c2   : > { %4628 = vmatpush3.bf16.msra.mxu1 %v5044_v20  ;;  %v5072_v20 = vld [vmem:[#allocation19] ss:$8 sps:$4 sm:$0xff]  }
 0x4c3   : > { %2346 = vmatprep.subr.bf16.mxu1 %v5047_v25 }
 0x4c5   : > { %v5217_v23 = vpop.eup %5216  ;;  %v1784_v55 = vpop.xlane.xlu0 %1783 }
 0x4c6   : > { %v1790_v11 = vsub.f32 %v1773_v0, %v1784_v55  ;;  %v1800_v12 = vsel %vm1775_vm10, %v5217_v23, 0.0 }
 0x4c7   : > { %1801 = vadd.xlane.f32.xlu0 %v1800_v12 }
 0x4c8   : > { %v1796_v57 = vmul.f32 1.442695, %v1790_v11 }
 0x4c9   : > { %v5219_v52 = vpop.eup %5218  ;;  %v1787_v13 = vpop.xlane.xlu1 %1786 }
 0x4ca   : > { %5220 = vpow2.f32 %v1796_v57  ;;  %v1791_v14 = vsub.f32 %v1774_v5, %v1787_v13  ;;  %v1803_v15 = vsel %vm1775_vm10, %v5219_v52, 0.0 }
 0x4cb   : > { %1804 = vadd.xlane.f32.xlu1 %v1803_v15 }
 0x4cc   : > { %v1798_v1 = vmul.f32 1.442695, %v1791_v14 }
 0x4ce   : > { %5222 = vpow2.f32 %v1798_v1 }
 0x4d7   : > { %v5221_v9 = vpop.eup %5220 }
 0x4d8   : > { %v1806_v18 = vsel %vm1775_vm10, %v5221_v9, 0.0 }
 0x4d9   : > { %1807 = vadd.xlane.f32.xlu0 %v1806_v18 }
 0x4db   : > { %v5223_v21 = vpop.eup %5222 }
 0x4dc   : > { %v1809_v22 = vsel %vm1775_vm10, %v5223_v21, 0.0 }
 0x4dd   : > { %1810 = vadd.xlane.f32.xlu1 %v1809_v22 }
 0x550   : > { %v1802_v30 = vpop.xlane.xlu0 %1801 }
 0x551   : > { %5224 = vrcp.f32 %v1802_v30  ;;  %v5045_v30 = vld [vmem:[#allocation19 + $0x70] ss:$8 sps:$4 sm:$0xff]  }
 0x554   : > { %v1805_v33 = vpop.xlane.xlu1 %1804 }
 0x555   : > { %5226 = vrcp.f32 %v1805_v33  ;;  %v5050_v33 = vld [vmem:[#allocation19 + $0x64] ss:$8 sps:$4 sm:$0xff]  }
 0x55e   : > { %v5225_v34 = vpop.eup %5224 }
 0x55f   : > { %v1816_v38 = vmul.f32 %v5225_v34, %v5217_v23  ;;  %v5048_v34 = vld [vmem:[#allocation19 + $0x60] ss:$8 sps:$4 sm:$0xff]  }
 0x562   : > { %v5227_v35 = vpop.eup %5226  ;;  %v1808_v36 = vpop.xlane.xlu0 %1807 }
 0x563   : > { %v1817_v31 = vmul.f32 %v5227_v35, %v5219_v52  ;;  %5228 = vrcp.f32 %v1808_v36  ;;  %v5051_v35 = vld [vmem:[#allocation17 + $0x38] sm:$0xff]  }
 0x564   : > { %v5054_v36 = vld [vmem:[#allocation19 + $0x54] ss:$8 sps:$4 sm:$0xff]  }
 0x565   : > { %v1820_v32 = vpack.c.bf16 %v1817_v31, %v1816_v38  ;;  %v5055_v38 = vld [vmem:[#allocation17 + $0x30] sm:$0xff]   ;;  %v5058_v31 = vld [vmem:[#allocation19 + $0x44] ss:$8 sps:$4 sm:$0xff]  }
 0x566   : > { %v1811_v45 = vpop.xlane.xlu1 %1810 }
 0x567   : > { %5230 = vrcp.f32 %v1811_v45  ;;  %4602 = vmatmul.mubr.msk.bf16.vlgmr.msra.gmra.mxu0 %vm1775_vm10, %v1820_v32  ;;  %v5056_v32 = vld [vmem:[#allocation19 + $0x40] ss:$8 sps:$4 sm:$0xff]   ;;  %v5062_v45 = vld [vmem:[#allocation19 + $0x34] ss:$8 sps:$4 sm:$0xff]  }
 0x568   : > { %4606 = vmatpush3.bf16.msra.mxu0 %v1825_v44  ;;  %4609 = vmatprep.mubr.msk.bf16.mxu0 %vm5829_vm8, %v5828_v10  ;;  %v5059_v44 = vld [vmem:[#allocation17 + $0x28] sm:$0xff]  }
 0x569   : > { %4607 = vmatprep.subr.bf16.mxu0 %v5828_v10 }
 0x56c   : > { %4608 = vmatpush3.bf16.msra.mxu0 %v1824_v28 }
 0x56d   : > { %4633 = vmatprep.subr.bf16.mxu0 %v5051_v35 }
 0x570   : > { %v5229_v51 = vpop.eup %5228 }
 0x571   : > { %v1818_v39 = vmul.f32 %v5229_v51, %v5221_v9  ;;  %v5060_v51 = vld [vmem:[#allocation19 + $0x30] ss:$8 sps:$4 sm:$0xff]  }
 0x574   : > { %v5231_v53 = vpop.eup %5230 }
 0x575   : > { %v1819_v40 = vmul.f32 %v5231_v53, %v5223_v21  ;;  %v5063_v53 = vld [vmem:[#allocation17 + $0x20] sm:$0xff]  }
 0x577   : > { %v1821_v54 = vpack.c.bf16 %v1819_v40, %v1818_v39  ;;  %v5064_v39 = vld [vmem:[#allocation19 + $0x20] ss:$8 sps:$4 sm:$0xff]   ;;  %v5066_v40 = vld [vmem:[#allocation19 + $0x24] ss:$8 sps:$4 sm:$0xff]  }
 0x579   : > { %4610 = vmatmul.mubr.msk.bf16.vlgmr.msra.gmra.mxu0 %vm1775_vm10, %v1821_v54  ;;  %v5067_v54 = vld [vmem:[#allocation17 + $0x18] sm:$0xff]  }
 0x57a   : > { %4634 = vmatpush3.bf16.msra.mxu0 %v5051_v35 }
 0x57b   : > { %4635 = vmatprep.subr.bf16.mxu0 %v5055_v38 }
 0x57e   : > { %4636 = vmatpush3.bf16.msra.mxu0 %v5055_v38 }
 0x57f   : > { %4637 = vmatprep.subr.bf16.mxu0 %v5059_v44 }
 0x582   : > { %4638 = vmatpush3.bf16.msra.mxu0 %v5059_v44 }
 0x583   : > { %4639 = vmatprep.subr.bf16.mxu0 %v5063_v53 }
 0x586   : > { %4640 = vmatpush3.bf16.msra.mxu0 %v5063_v53 }
 0x587   : > { %4641 = vmatprep.subr.bf16.mxu0 %v5067_v54 }
 0x58a   : > { %4642 = vmatpush3.bf16.msra.mxu0 %v5067_v54 }
 0x58b   : > { %4643 = vmatprep.subr.bf16.mxu0 %v5071_v56 }
 0x58e   : > { %4644 = vmatpush3.bf16.msra.mxu0 %v5071_v56 }
 0x627   : > { %v1863_v27 = vpop.f32.mrf.mxu0 }
 0x629   : > { %v4603_v28 = vpop.f32.mrf.mxu0 }
 0x62a   : > { %v5076_v28 = vld [vmem:[#allocation10] sm:$0xff]  }
 0x62b   : > { %v1866_v59 = vpop.f32.mrf.mxu0 }
 0x62c   : > { %v1914_v29 = vpack.c.bf16 %v1866_v59, %v1863_v27  ;;  %v5075_v27 = vld [vmem:[#allocation17 + $0x8] sm:$0xff]   ;;  %v5077_v59 = vld [vmem:[#allocation17] sm:$0xff]  }
 0x62d   : > { %v4604_v60 = vpop.f32.mrf.mxu0  ;;  %4645 = vmatprep.subr.bf16.mxu0 %v5075_v27 }
 0x62e   : > { %4629 = vmatprep.mubr.bf16.mxu1 %v1914_v29  ;;  %4646 = vmatpush3.bf16.msra.mxu0 %v5075_v27 }
 0x62f   : > { %4647 = vmatprep.subr.bf16.mxu0 %v5077_v59 }
 0x632   : > { %4648 = vmatpush3.bf16.msra.mxu0 %v5077_v59 }
 0x633   : > { %4659 = vmatprep.subr.bf16.mxu0 %v5828_v10 }
 0x639   : > { %v1907_v41 = vpop.f32.mrf.mxu0 }
 0x63b   : > { %v4611_v61 = vpop.f32.mrf.mxu0 }
 0x63d   : > { %v1910_v62 = vpop.f32.mrf.mxu0 }
 0x63e   : > { %v1915_v63 = vpack.c.bf16 %v1910_v62, %v1907_v41 }
 0x63f   : > { %v4612_v0 = vpop.f32.mrf.mxu0 }
 0x640   : > { %4630 = vmatmul.mubr.bf16.vlgmr.msra.gmra.mxu1 %v1915_v63 }
 0x641   : > { %2378 = vmatprep.mubr.bf16.mxu1 %v5827_v19  ;;  %2347 = vmatpush1.bf16.msra.mxu1 %v5045_v30 }
 0x642   : > { %2348 = vmatprep.subr.bf16.mxu1 %v5050_v33 }
 0x645   : > { %2349 = vmatpush1.bf16.msra.mxu1 %v5048_v34 }
 0x646   : > { %2350 = vmatprep.subr.bf16.mxu1 %v5054_v36  ;;  %v4307_v36 = vld [vmem:[%s6793_s21] ss:$0 sm:$0xff] }
 0x649   : > { %2351 = vmatpush1.bf16.msra.mxu1 %v5052_v37 }
 0x64a   : > { %2352 = vmatprep.subr.bf16.mxu1 %v5058_v31 }
 0x64d   : > { %2353 = vmatpush1.bf16.msra.mxu1 %v5056_v32 }
 0x64e   : > { %2354 = vmatprep.subr.bf16.mxu1 %v5062_v45 }
 0x651   : > { %2355 = vmatpush1.bf16.msra.mxu1 %v5060_v51  ;;  %v4308_v51 = vld [vmem:[%s6794_s0] ss:$0 sm:$0xff] }
 0x652   : > { %2356 = vmatprep.subr.bf16.mxu1 %v5066_v40 }
 0x655   : > { %2357 = vmatpush1.bf16.msra.mxu1 %v5064_v39 }
 0x656   : > { %2358 = vmatprep.subr.bf16.mxu1 %v5070_v2 }
 0x659   : > { %2359 = vmatpush1.bf16.msra.mxu1 %v5068_v42 }
 0x65a   : > { %2360 = vmatprep.subr.bf16.mxu1 %v5074_v58 }
 0x65d   : > { %2361 = vmatpush1.bf16.msra.mxu1 %v5072_v20 }
 0x65e   : > { %4653 = vmatprep.subr.bf16.mxu1 %v5828_v10 }
 0x660   : > { %2379 = vmatmul.mubr.bf16.vlgmr.msra.gmra.mxu1 %v5076_v28 }
 0x661   : > { %4655 = vmatprep.mubr.msk.bf16.mxu1 %vm5829_vm8, %v5828_v10 }
 0x700   : > { %v4631_v49 = vpop.f32.mrf.mxu1 }
 0x701   : > { %v6481_v50 = vadd.f32 %v5313_v48, %v4631_v49 }
 0x702   : > { %v2014_v3 = vpop.f32.mrf.mxu1 }
 0x703   : > { %v6477_v47 = vadd.f32 %v5312_v4, %v2014_v3 }
 0x704   : > { %v4632_v5 = vpop.f32.mrf.mxu1 }
 0x705   : > { %2035 = vadd.xlane.f32.xlu0 %v6477_v47  ;;  %v6489_v17 = vadd.f32 %v5315_v8, %v4632_v5 }
 0x706   : > { %v2017_v6 = vpop.f32.mrf.mxu1 }
 0x707   : > { %v6484_v16 = vadd.f32 %v5314_v7, %v2017_v6 }
 0x709   : > { %2039 = vadd.xlane.f32.xlu0 %v6481_v50  ;;  %2037 = vadd.xlane.f32.xlu1 %v6484_v16 }
 0x70d   : > { %2041 = vadd.xlane.f32.xlu1 %v6489_v17 }
 0x78e   : > { %v2036_v23 = vpop.xlane.xlu0 %2035 }
 0x78f   : > { %v2043_v55 = vmul.f32 0.0078125, %v2036_v23 }
 0x791   : > { %v6493_v11 = vsub.f32 %v6477_v47, %v2043_v55 }
 0x792   : > { %v2040_v12 = vpop.xlane.xlu0 %2039  ;;  %v2038_v57 = vpop.xlane.xlu1 %2037 }
 0x793   : > { %v2045_v52 = vmul.f32 0.0078125, %v2040_v12  ;;  %v2044_v13 = vmul.f32 0.0078125, %v2038_v57  ;;  %v2051_v14 = vmul.f32 %v6493_v11, %v6493_v11  ;;  %v2101_v38 = vmul.f32 %v4307_v36, %v6493_v11 }
 0x795   : > { %v6498_v15 = vsub.f32 %v6481_v50, %v2045_v52  ;;  %v6501_v1 = vsub.f32 %v6484_v16, %v2044_v13  ;;  %2055 = vadd.xlane.f32.xlu0 %v2051_v14 }
 0x796   : > { %v2042_v9 = vpop.xlane.xlu1 %2041 }
 0x797   : > { %v2046_v18 = vmul.f32 0.0078125, %v2042_v9  ;;  %v2053_v21 = vmul.f32 %v6498_v15, %v6498_v15  ;;  %v2052_v22 = vmul.f32 %v6501_v1, %v6501_v1  ;;  %v2102_v32 = vmul.f32 %v4307_v36, %v6501_v1  ;;  %v2380_v1 = vpop.f32.mrf.mxu1 }
 0x798   : > { %v2103_v53 = vmul.f32 %v4307_v36, %v6498_v15  ;;  %v2391_v59 = vpack.c.bf16 %v2380_v1, %v2380_v1 }
 0x799   : > { %v6508_v24 = vsub.f32 %v6489_v17, %v2046_v18  ;;  %2059 = vadd.xlane.f32.xlu0 %v2053_v21  ;;  %2057 = vadd.xlane.f32.xlu1 %v2052_v22  ;;  %v2382_v15 = vpop.f32.mrf.mxu1 }
 0x79a   : > { %4654 = vmatpush3.bf16.xpose.msra.mxu1 %v2391_v59 }
 0x79b   : > { %v2054_v26 = vmul.f32 %v6508_v24, %v6508_v24  ;;  %v2104_v40 = vmul.f32 %v4307_v36, %v6508_v24 }
 0x79d   : > { %2061 = vadd.xlane.f32.xlu1 %v2054_v26 }
 0x81e   : > { %v2056_v29 = vpop.xlane.xlu0 %2055 }
 0x81f   : > { %v2063_v60 = vmul.f32 0.007874016, %v2056_v29  ;;  %v2384_v29 = vpop.f32.mrf.mxu1 }
 0x820   : > { %v2392_v24 = vpack.c.bf16 %v2384_v29, %v2384_v29  ;;  %v5079_v29 = vld [vmem:[#allocation20 + $0x30] sm:$0xff]  }
 0x821   : > { %5232 = vrsqrt.f32 %v2063_v60  ;;  %vm2069_vm12 = vcmp.eq.f32.partialorder %v2063_v60, inf  ;;  %v2072_v5 = vand.u32 2147483648, %v2063_v60  ;;  %vm2071_vm13 = vcmp.eq.f32.partialorder %v2063_v60, 0.0 }
 0x822   : > { %v2060_v41 = vpop.xlane.xlu0 %2059  ;;  %v2058_v62 = vpop.xlane.xlu1 %2057 }
 0x823   : > { %v2065_v61 = vmul.f32 0.007874016, %v2060_v41  ;;  %v2064_v63 = vmul.f32 0.007874016, %v2058_v62 }
 0x825   : > { %5234 = vrsqrt.f32 %v2065_v61  ;;  %vm2083_vm14 = vcmp.eq.f32.partialorder %v2065_v61, inf  ;;  %v2086_v12 = vand.u32 2147483648, %v2065_v61  ;;  %vm2085_vm15 = vcmp.eq.f32.partialorder %v2065_v61, 0.0 }
 0x826   : > { %5236 = vrsqrt.f32 %v2064_v63  ;;  %v2062_v0 = vpop.xlane.xlu1 %2061  ;;  %vm2076_vm0 = vcmp.eq.f32.partialorder %v2064_v63, inf  ;;  %v2079_v13 = vand.u32 2147483648, %v2064_v63  ;;  %vm2078_vm1 = vcmp.eq.f32.partialorder %v2064_v63, 0.0 }
 0x827   : > { %v2066_v49 = vmul.f32 0.007874016, %v2062_v0 }
 0x829   : > { %5238 = vrsqrt.f32 %v2066_v49  ;;  %vm2090_vm2 = vcmp.eq.f32.partialorder %v2066_v49, inf  ;;  %v2093_v30 = vand.u32 2147483648, %v2066_v49  ;;  %vm2092_vm3 = vcmp.eq.f32.partialorder %v2066_v49, 0.0 }
 0x82e   : > { %v5233_v3 = vpop.eup %5232 }
 0x82f   : > { %v2068_v4 = vmul.f32 %v5233_v3, %v2063_v60 }
 0x831   : > { %v2070_v6 = vsel %vm2069_vm12, %v2063_v60, %v2068_v4  ;;  %v2480_v4 = vstv %s2479_s13 }
 0x832   : > { %v5235_v48 = vpop.eup %5234  ;;  %v2073_v7 = vsel %vm2071_vm13, %v2072_v5, %v2070_v6  ;;  %v6529_v5 = vpop.f32.mrf.mxu1  ;;  %vm6532_vm5 = vcmp.lt.s32.totalorder %v6445_v46, %v2480_v4 }
 0x833   : > { %v5237_v8 = vpop.eup %5236  ;;  %v2105_v23 = vadd.f32 1e-06, %v2073_v7  ;;  %v2082_v55 = vmul.f32 %v5235_v48, %v2065_v61  ;;  %v2485_v48 = vstv %s4334_s26  ;;  %v2537_v4 = vpack.c.bf16 %v6529_v5, %v6529_v5  ;;  %v5084_v5 = vld [vmem:[#allocation20 + $0x8] sm:$0xff]  }
 0x834   : > { %v2075_v57 = vmul.f32 %v5237_v8, %v2064_v63  ;;  %vm6537_vm6 = vcmp.lt.s32.totalorder %v6445_v46, %v2485_v48 }
 0x835   : > { %v2084_v52 = vsel %vm2083_vm14, %v2065_v61, %v2082_v55  ;;  %5240 = vrcp.f32 %v2105_v23  ;;  %v2536_v61 = vpack.c.bf16 %v2382_v15, %v2382_v15  ;;  %v5078_v15 = vld [vmem:[#allocation20 + $0x38] sm:$0xff]   ;;  %v2590_v23 = vsel %vm2541_vm4, %v2537_v4, 0  ;;  %v5106_v4 = vld [vmem:[#allocation23 + $0x24] ss:$8 sps:$4 sm:$0xff]  }
 0x836   : > { %v2087_v14 = vsel %vm2085_vm15, %v2086_v12, %v2084_v52  ;;  %v2077_v9 = vsel %vm2076_vm0, %v2064_v63, %v2075_v57  ;;  %v5239_v18 = vpop.eup %5238  ;;  %4677 = vmatprep.subr.bf16.mxu1 %v5078_v15 }
 0x837   : > { %v2107_v21 = vadd.f32 1e-06, %v2087_v14  ;;  %v2080_v22 = vsel %vm2078_vm1, %v2079_v13, %v2077_v9  ;;  %v2089_v25 = vmul.f32 %v5239_v18, %v2066_v49  ;;  %v5083_v13 = vld [vmem:[#allocation20 + $0x10] sm:$0xff]  }
 0x838   : > { %v2106_v26 = vadd.f32 1e-06, %v2080_v22 }
 0x839   : > { %5242 = vrcp.f32 %v2107_v21  ;;  %v2091_v33 = vsel %vm2090_vm2, %v2066_v49, %v2089_v25  ;;  %v2543_v49 = vsel %vm2541_vm4, %v2536_v61, 0  ;;  %vm3226_vm2 = vcmask 130048  }
 0x83a   : > { %5244 = vrcp.f32 %v2106_v26  ;;  %v2094_v34 = vsel %vm2092_vm3, %v2093_v30, %v2091_v33 }
 0x83b   : > { %v2108_v35 = vadd.f32 1e-06, %v2094_v34 }
 0x83d   : > { %5246 = vrcp.f32 %v2108_v35 }
 0x842   : > { %v5241_v37 = vpop.eup %5240 }
 0x843   : > { %v2110_v44 = vmul.f32 %v5241_v37, %v2101_v38 }
 0x845   : > { %v2123_v54 = vadd.f32 %v4308_v51, %v2110_v44 }
 0x846   : > { %v5243_v31 = vpop.eup %5242 }
 0x847   : > { %v5245_v45 = vpop.eup %5244  ;;  %v2114_v42 = vmul.f32 %v5243_v31, %v2103_v53 }
 0x848   : > { %v2112_v39 = vmul.f32 %v5245_v45, %v2102_v32 }
 0x849   : > { %v2125_v27 = vadd.f32 %v4308_v51, %v2114_v42 }
 0x84a   : > { %v2124_v2 = vadd.f32 %v4308_v51, %v2112_v39  ;;  %v5247_v56 = vpop.eup %5246 }
 0x84b   : > { %v2116_v20 = vmul.f32 %v5247_v56, %v2104_v40 }
 0x84c   : > { %v2127_v58 = vpack.c.bf16 %v2124_v2, %v2123_v54 }
 0x84d   : > { %v2126_v11 = vadd.f32 %v4308_v51, %v2116_v20 }
 0x84e   : > { %4649 = vmatprep.mubr.bf16.mxu0 %v2127_v58 }
 0x84f   : > { %v2128_v28 = vpack.c.bf16 %v2126_v11, %v2125_v27 }
 0x851   : > { %4650 = vmatmul.mubr.bf16.vlgmr.msra.gmra.mxu0 %v2128_v28 }
 0x852   : > { %4661 = vmatprep.mubr.msk.bf16.mxu0 %vm5829_vm8, %v5828_v10  ;;  %4660 = vmatpush3.bf16.xpose.msra.mxu0 %v2392_v24  ;;  %v5080_v24 = vld [vmem:[#allocation20 + $0x28] sm:$0xff]  }
 0x853   : > { %4665 = vmatprep.subr.bf16.mxu0 %v5828_v10 }
 0x911   : > { %v4651_v60 = vpop.f32.mrf.mxu0 }
 0x913   : > { %v2227_v41 = vpop.f32.mrf.mxu0 }
 0x915   : > { %v4652_v62 = vpop.f32.mrf.mxu0 }
 0x916   : > { %v2390_v63 = vpack.c.bf16 %v4652_v62, %v4651_v60  ;;  %v5081_v60 = vld [vmem:[#allocation20 + $0x20] sm:$0xff]  }
 0x917   : > { %v2230_v0 = vpop.f32.mrf.mxu0 }
 0x918   : > { %v2389_v3 = vpack.c.bf16 %v2230_v0, %v2227_v41  ;;  %4662 = vmatmul.mubr.bf16.vlgmr.msra.gmra.mxu0 %v2390_v63  ;;  %v5082_v41 = vld [vmem:[#allocation20 + $0x18] sm:$0xff]  }
 0x919   : > { %4666 = vmatpush3.bf16.msra.mxu0 %v2543_v49  ;;  %4667 = vmatprep.mubr.msk.bf16.mxu0 %vm5829_vm8, %v5828_v10 }
 0x91a   : > { %4656 = vmatmul.mubr.bf16.vlgmr.msra.gmra.mxu1 %v2389_v3  ;;  %4671 = vmatprep.subr.bf16.mxu0 %v5828_v10 }
 0x91b   : > { %4678 = vmatpush3.bf16.msra.mxu1 %v5078_v15  ;;  %v5091_v15 = vld [vmem:[#allocation23 + $0x64] ss:$8 sps:$4 sm:$0xff]  }
 0x91c   : > { %4679 = vmatprep.subr.bf16.mxu1 %v5079_v29 }
 0x91f   : > { %4680 = vmatpush3.bf16.msra.mxu1 %v5079_v29  ;;  %v5089_v29 = vld [vmem:[#allocation23 + $0x60] ss:$8 sps:$4 sm:$0xff]  }
 0x920   : > { %4681 = vmatprep.subr.bf16.mxu1 %v5080_v24 }
 0x923   : > { %4682 = vmatpush3.bf16.msra.mxu1 %v5080_v24  ;;  %v5094_v24 = vld [vmem:[#allocation23 + $0x54] ss:$8 sps:$4 sm:$0xff]  }
 0x924   : > { %4683 = vmatprep.subr.bf16.mxu1 %v5081_v60 }
 0x927   : > { %4684 = vmatpush3.bf16.msra.mxu1 %v5081_v60  ;;  %v5092_v60 = vld [vmem:[#allocation23 + $0x50] ss:$8 sps:$4 sm:$0xff]  }
 0x928   : > { %4685 = vmatprep.subr.bf16.mxu1 %v5082_v41 }
 0x92b   : > { %4686 = vmatpush3.bf16.msra.mxu1 %v5082_v41  ;;  %v5095_v41 = vld [vmem:[#allocation22 + $0x38] sm:$0xff]  }
 0x92c   : > { %4687 = vmatprep.subr.bf16.mxu1 %v5083_v13 }
 0x92f   : > { %4688 = vmatpush3.bf16.msra.mxu1 %v5083_v13  ;;  %v5117_v13 = vld [vmem:[#allocation22 + $0x8] sm:$0xff]  }
 0x930   : > { %4689 = vmatprep.subr.bf16.mxu1 %v5084_v5 }
 0x933   : > { %4690 = vmatpush3.bf16.msra.mxu1 %v5084_v5  ;;  %v5118_v5 = vld [vmem:[#allocation22] sm:$0xff]  }
 0x9d8   : > { %v2468_v6 = vpop.f32.mrf.mxu0 }
 0x9d9   : > { %v2477_v55 = vmul.f32 0.088388346, %v2468_v6 }
 0x9da   : > { %v2427_v7 = vpop.f32.mrf.mxu1  ;;  %v4663_v8 = vpop.f32.mrf.mxu0 }
 0x9db   : > { %v2475_v12 = vmul.f32 0.088388346, %v2427_v7  ;;  %v2487_v25 = vsel %vm6537_vm6, %v2477_v55, -1e+09 }
 0x9dc   : > { %v4657_v57 = vpop.f32.mrf.mxu1  ;;  %v2471_v52 = vpop.f32.mrf.mxu0  ;;  %v2496_v34 = vsel %vm2489_vm7, %v2487_v25, -inf }
 0x9dd   : > { %v2482_v14 = vsel %vm6532_vm5, %v2475_v12, -1e+09  ;;  %v2478_v22 = vmul.f32 0.088388346, %v2471_v52 }
 0x9de   : > { %v2430_v9 = vpop.f32.mrf.mxu1  ;;  %v4664_v18 = vpop.f32.mrf.mxu0  ;;  %v2490_v21 = vsel %vm2489_vm7, %v2482_v14, -inf }
 0x9df   : > { %v2476_v26 = vmul.f32 0.088388346, %v2430_v9  ;;  %2491 = vmax.xlane.f32.xlu0 %v2490_v21  ;;  %v2488_v36 = vsel %vm6537_vm6, %v2478_v22, -1e+09 }
 0x9e0   : > { %v4658_v30 = vpop.f32.mrf.mxu1  ;;  %v2499_v37 = vsel %vm2489_vm7, %v2488_v36, -inf }
 0x9e1   : > { %v2483_v33 = vsel %vm6532_vm5, %v2476_v26, -1e+09 }
 0x9e2   : > { %v2493_v35 = vsel %vm2489_vm7, %v2483_v33, -inf }
 0x9e3   : > { %2497 = vmax.xlane.f32.xlu0 %v2496_v34  ;;  %2494 = vmax.xlane.f32.xlu1 %v2493_v35 }
 0x9e7   : > { %2500 = vmax.xlane.f32.xlu1 %v2499_v37 }
 0xa68   : > { %v2492_v38 = vpop.xlane.xlu0 %2491 }
 0xa69   : > { %v2502_v31 = vsub.f32 %v2482_v14, %v2492_v38  ;;  %v5085_v14 = vld [vmem:[#allocation20] sm:$0xff]  }
 0xa6a   : > { %4691 = vmatprep.subr.bf16.mxu1 %v5085_v14 }
 0xa6b   : > { %v2506_v32 = vmul.f32 1.442695, %v2502_v31  ;;  %4692 = vmatpush3.bf16.msra.mxu1 %v5085_v14  ;;  %v5119_v14 = vld [vmem:[#allocation11 + $0x8] sm:$0xff]  }
 0xa6c   : > { %v2498_v44 = vpop.xlane.xlu0 %2497  ;;  %v2495_v45 = vpop.xlane.xlu1 %2494 }
 0xa6d   : > { %5248 = vpow2.f32 %v2506_v32  ;;  %v2504_v51 = vsub.f32 %v2487_v25, %v2498_v44  ;;  %v2503_v53 = vsub.f32 %v2483_v33, %v2495_v45 }
 0xa6f   : > { %v2510_v39 = vmul.f32 1.442695, %v2504_v51  ;;  %v2508_v40 = vmul.f32 1.442695, %v2503_v53 }
 0xa70   : > { %v2501_v54 = vpop.xlane.xlu1 %2500 }
 0xa71   : > { %5250 = vpow2.f32 %v2510_v39  ;;  %v2505_v2 = vsub.f32 %v2488_v36, %v2501_v54 }
 0xa72   : > { %5252 = vpow2.f32 %v2508_v40 }
 0xa73   : > { %v2512_v42 = vmul.f32 1.442695, %v2505_v2 }
 0xa75   : > { %5254 = vpow2.f32 %v2512_v42 }
 0xa7a   : > { %v5249_v56 = vpop.eup %5248 }
 0xa7b   : > { %v2514_v58 = vsel %vm2489_vm7, %v5249_v56, 0.0 }
 0xa7c   : > { %2515 = vadd.xlane.f32.xlu0 %v2514_v58 }
 0xa7e   : > { %v5251_v20 = vpop.eup %5250 }
 0xa7f   : > { %v5253_v27 = vpop.eup %5252  ;;  %v2520_v11 = vsel %vm2489_vm7, %v5251_v20, 0.0 }
 0xa80   : > { %2521 = vadd.xlane.f32.xlu0 %v2520_v11  ;;  %v2517_v28 = vsel %vm2489_vm7, %v5253_v27, 0.0 }
 0xa81   : > { %2518 = vadd.xlane.f32.xlu1 %v2517_v28 }
 0xa82   : > { %v5255_v1 = vpop.eup %5254 }
 0xa83   : > { %v2523_v59 = vsel %vm2489_vm7, %v5255_v1, 0.0 }
 0xa85   : > { %2524 = vadd.xlane.f32.xlu1 %v2523_v59  ;;  %v5086_v59 = vld [vmem:[#allocation23 + $0x70] ss:$8 sps:$4 sm:$0xff]  }
 0xb05   : > { %v2516_v61 = vpop.xlane.xlu0 %2515 }
 0xb06   : > { %5256 = vrcp.f32 %v2516_v61  ;;  %v5098_v61 = vld [vmem:[#allocation23 + $0x44] ss:$8 sps:$4 sm:$0xff]  }
 0xb09   : > { %v2522_v63 = vpop.xlane.xlu0 %2521 }
 0xb0a   : > { %v2519_v62 = vpop.xlane.xlu1 %2518 }
 0xb0b   : > { %5258 = vrcp.f32 %v2519_v62  ;;  %v5096_v62 = vld [vmem:[#allocation23 + $0x40] ss:$8 sps:$4 sm:$0xff]  }
 0xb0e   : > { %v2525_v0 = vpop.xlane.xlu1 %2524 }
 0xb0f   : > { %5260 = vrcp.f32 %v2525_v0  ;;  %v5102_v0 = vld [vmem:[#allocation23 + $0x34] ss:$8 sps:$4 sm:$0xff]  }
 0xb10   : > { %5262 = vrcp.f32 %v2522_v63  ;;  %v5099_v63 = vld [vmem:[#allocation22 + $0x30] sm:$0xff]  }
 0xb13   : > { %v5257_v49 = vpop.eup %5256 }
 0xb14   : > { %v2530_v6 = vmul.f32 %v5257_v49, %v5249_v56  ;;  %v5100_v49 = vld [vmem:[#allocation23 + $0x30] ss:$8 sps:$4 sm:$0xff]  }
 0xb18   : > { %v5259_v3 = vpop.eup %5258 }
 0xb19   : > { %v2531_v48 = vmul.f32 %v5259_v3, %v5253_v27  ;;  %v5103_v3 = vld [vmem:[#allocation22 + $0x28] sm:$0xff]  }
 0xb1b   : > { %v2534_v7 = vpack.c.bf16 %v2531_v48, %v2530_v6  ;;  %v5104_v6 = vld [vmem:[#allocation23 + $0x20] ss:$8 sps:$4 sm:$0xff]  }
 0xb1c   : > { %v5261_v8 = vpop.eup %5260  ;;  %v5107_v48 = vld [vmem:[#allocation22 + $0x20] sm:$0xff]  }
 0xb1d   : > { %4668 = vmatmul.mubr.msk.bf16.vlgmr.msra.gmra.mxu0 %vm2489_vm7, %v2534_v7  ;;  %v5263_v55 = vpop.eup %5262  ;;  %v2533_v12 = vmul.f32 %v5261_v8, %v5255_v1  ;;  %v5088_v1 = vld [vmem:[#allocation23 + $0x74] ss:$8 sps:$4 sm:$0xff]   ;;  %v5108_v7 = vld [vmem:[#allocation23 + $0x10] ss:$8 sps:$4 sm:$0xff]  }
 0xb1e   : > { %4672 = vmatpush3.bf16.msra.mxu0 %v2590_v23  ;;  %4673 = vmatprep.mubr.msk.bf16.mxu0 %vm5829_vm8, %v5828_v10  ;;  %v2532_v57 = vmul.f32 %v5263_v55, %v5251_v20  ;;  %v5110_v8 = vld [vmem:[#allocation23 + $0x14] ss:$8 sps:$4 sm:$0xff]   ;;  %v5114_v55 = vld [vmem:[#allocation23 + $0x4] ss:$8 sps:$4 sm:$0xff]  }
 0xb1f   : > { %3073 = vmatprep.subr.bf16.mxu1 %v5088_v1  ;;  %4697 = vmatprep.subr.bf16.mxu0 %v5095_v41  ;;  %v5111_v23 = vld [vmem:[#allocation22 + $0x18] sm:$0xff]  }
 0xb20   : > { %v2535_v52 = vpack.c.bf16 %v2533_v12, %v2532_v57  ;;  %v5112_v12 = vld [vmem:[#allocation23] ss:$8 sps:$4 sm:$0xff]   ;;  %v5115_v57 = vld [vmem:[#allocation22 + $0x10] sm:$0xff]  }
 0xb25   : > { %4674 = vmatmul.mubr.msk.bf16.vlgmr.msra.gmra.mxu0 %vm2489_vm7, %v2535_v52  ;;  %v5116_v52 = vld [vmem:[#allocation11] sm:$0xff]  }
 0xb26   : > { %4698 = vmatpush3.bf16.msra.mxu0 %v5095_v41  ;;  %v4345_v41 = vld [vmem:[%s6799_s10] ss:$0 sm:$0xff] }
 0xb27   : > { %4699 = vmatprep.subr.bf16.mxu0 %v5099_v63 }
 0xb2a   : > { %4700 = vmatpush3.bf16.msra.mxu0 %v5099_v63 }
 0xb2b   : > { %4701 = vmatprep.subr.bf16.mxu0 %v5103_v3 }
 0xb2e   : > { %4702 = vmatpush3.bf16.msra.mxu0 %v5103_v3 }
 0xb2f   : > { %4703 = vmatprep.subr.bf16.mxu0 %v5107_v48 }
 0xb32   : > { %4704 = vmatpush3.bf16.msra.mxu0 %v5107_v48 }
 0xb33   : > { %4705 = vmatprep.subr.bf16.mxu0 %v5111_v23 }
 0xb36   : > { %4706 = vmatpush3.bf16.msra.mxu0 %v5111_v23 }
 0xb37   : > { %4707 = vmatprep.subr.bf16.mxu0 %v5115_v57 }
 0xb3a   : > { %4708 = vmatpush3.bf16.msra.mxu0 %v5115_v57 }
 0xb3b   : > { %4709 = vmatprep.subr.bf16.mxu0 %v5117_v13 }
 0xb3e   : > { %4710 = vmatpush3.bf16.msra.mxu0 %v5117_v13 }
 0xb3f   : > { %4711 = vmatprep.subr.bf16.mxu0 %v5118_v5 }
 0xb42   : > { %4712 = vmatpush3.bf16.msra.mxu0 %v5118_v5 }
 0xb43   : > { %4717 = vmatprep.subr.bf16.mxu0 %v5828_v10 }
 0xbdd   : > { %v2579_v9 = vpop.f32.mrf.mxu0 }
 0xbdf   : > { %v4669_v18 = vpop.f32.mrf.mxu0 }
 0xbe1   : > { %v2582_v21 = vpop.f32.mrf.mxu0 }
 0xbe2   : > { %v2633_v22 = vpack.c.bf16 %v2582_v21, %v2579_v9 }
 0xbe3   : > { %v4670_v26 = vpop.f32.mrf.mxu0 }
 0xbe4   : > { %4693 = vmatprep.mubr.bf16.mxu1 %v2633_v22 }
 0xbe5   : > { %v2626_v25 = vpop.f32.mrf.mxu0 }
 0xbe7   : > { %v4675_v30 = vpop.f32.mrf.mxu0 }
 0xbe9   : > { %v2629_v33 = vpop.f32.mrf.mxu0 }
 0xbea   : > { %v2634_v34 = vpack.c.bf16 %v2629_v33, %v2626_v25 }
 0xbeb   : > { %v4676_v35 = vpop.f32.mrf.mxu0 }
 0xbec   : > { %4694 = vmatmul.mubr.bf16.vlgmr.msra.gmra.mxu1 %v2634_v34 }
 0xbed   : > { %3105 = vmatprep.mubr.bf16.mxu1 %v5827_v19  ;;  %3074 = vmatpush1.bf16.msra.mxu1 %v5086_v59 }
 0xbee   : > { %3075 = vmatprep.subr.bf16.mxu1 %v5091_v15 }
 0xbf1   : > { %3076 = vmatpush1.bf16.msra.mxu1 %v5089_v29 }
 0xbf2   : > { %3077 = vmatprep.subr.bf16.mxu1 %v5094_v24 }
 0xbf5   : > { %3078 = vmatpush1.bf16.msra.mxu1 %v5092_v60 }
 0xbf6   : > { %3079 = vmatprep.subr.bf16.mxu1 %v5098_v61 }
 0xbf9   : > { %3080 = vmatpush1.bf16.msra.mxu1 %v5096_v62 }
 0xbfa   : > { %3081 = vmatprep.subr.bf16.mxu1 %v5102_v0 }
 0xbfd   : > { %3082 = vmatpush1.bf16.msra.mxu1 %v5100_v49 }
 0xbfe   : > { %3083 = vmatprep.subr.bf16.mxu1 %v5106_v4  ;;  %v4346_v4 = vld [vmem:[%s6800_s16] ss:$0 sm:$0xff] }
 0xc01   : > { %3084 = vmatpush1.bf16.msra.mxu1 %v5104_v6 }
 0xc02   : > { %3085 = vmatprep.subr.bf16.mxu1 %v5110_v8 }
 0xc05   : > { %3086 = vmatpush1.bf16.msra.mxu1 %v5108_v7 }
 0xc06   : > { %3087 = vmatprep.subr.bf16.mxu1 %v5114_v55 }
 0xc09   : > { %3088 = vmatpush1.bf16.msra.mxu1 %v5112_v12 }
 0xc0c   : > { %3106 = vmatmul.mubr.bf16.vlgmr.msra.gmra.mxu1 %v5116_v52 }
 0xc0d   : > { %3115 = vmatprep.mubr.bf16.mxu1 %v5827_v19 }
 0xc14   : > { %3116 = vmatmul.mubr.bf16.gmra.mxu1 %v5119_v14 }
 0xcac   : > { %v4695_v36 = vpop.f32.mrf.mxu1 }
 0xcad   : > { %v6570_v44 = vadd.f32 %v4695_v36, %v6481_v50 }
 0xcae   : > { %v2733_v37 = vpop.f32.mrf.mxu1 }
 0xcaf   : > { %v6566_v38 = vadd.f32 %v2733_v37, %v6477_v47 }
 0xcb0   : > { %v4696_v31 = vpop.f32.mrf.mxu1 }
 0xcb1   : > { %2754 = vadd.xlane.f32.xlu0 %v6566_v38  ;;  %v6578_v51 = vadd.f32 %v4696_v31, %v6489_v17 }
 0xcb2   : > { %v2736_v32 = vpop.f32.mrf.mxu1 }
 0xcb3   : > { %v6573_v45 = vadd.f32 %v2736_v32, %v6484_v16 }
 0xcb5   : > { %2758 = vadd.xlane.f32.xlu0 %v6570_v44  ;;  %2756 = vadd.xlane.f32.xlu1 %v6573_v45 }
 0xcb9   : > { %2760 = vadd.xlane.f32.xlu1 %v6578_v51 }
 0xd3a   : > { %v2755_v47 = vpop.xlane.xlu0 %2754 }
 0xd3b   : > { %v2762_v53 = vmul.f32 0.0078125, %v2755_v47 }
 0xd3d   : > { %v6582_v39 = vsub.f32 %v6566_v38, %v2762_v53 }
 0xd3e   : > { %v2759_v40 = vpop.xlane.xlu0 %2758  ;;  %v2757_v50 = vpop.xlane.xlu1 %2756 }
 0xd3f   : > { %v2764_v54 = vmul.f32 0.0078125, %v2759_v40  ;;  %v2763_v2 = vmul.f32 0.0078125, %v2757_v50  ;;  %v2770_v16 = vmul.f32 %v6582_v39, %v6582_v39  ;;  %v2820_v62 = vmul.f32 %v4345_v41, %v6582_v39 }
 0xd41   : > { %v6587_v42 = vsub.f32 %v6570_v44, %v2764_v54  ;;  %v6590_v17 = vsub.f32 %v6573_v45, %v2763_v2  ;;  %2774 = vadd.xlane.f32.xlu0 %v2770_v16 }
 0xd42   : > { %v2761_v56 = vpop.xlane.xlu1 %2760 }
 0xd43   : > { %v2765_v58 = vmul.f32 0.0078125, %v2761_v56  ;;  %v2772_v20 = vmul.f32 %v6587_v42, %v6587_v42  ;;  %v2771_v27 = vmul.f32 %v6590_v17, %v6590_v17  ;;  %v2821_v0 = vmul.f32 %v4345_v41, %v6590_v17  ;;  %v3107_v17 = vpop.f32.mrf.mxu1 }
 0xd44   : > { %v2822_v6 = vmul.f32 %v4345_v41, %v6587_v42 }
 0xd45   : > { %v6597_v11 = vsub.f32 %v6578_v51, %v2765_v58  ;;  %2778 = vadd.xlane.f32.xlu0 %v2772_v20  ;;  %2776 = vadd.xlane.f32.xlu1 %v2771_v27  ;;  %v3109_v14 = vpop.f32.mrf.mxu1 }
 0xd47   : > { %v2773_v28 = vmul.f32 %v6597_v11, %v6597_v11  ;;  %v2823_v7 = vmul.f32 %v4345_v41, %v6597_v11  ;;  %v3111_v42 = vpop.f32.mrf.mxu1 }
 0xd49   : > { %2780 = vadd.xlane.f32.xlu1 %v2773_v28  ;;  %v3113_v11 = vpop.f32.mrf.mxu1 }
 0xdca   : > { %v2775_v9 = vpop.xlane.xlu0 %2774 }
 0xdcb   : > { %v2782_v18 = vmul.f32 0.007874016, %v2775_v9  ;;  %v3128_v9 = vpack.c.bf16 %v3111_v42, %v3107_v17  ;;  %v5121_v42 = vld [vmem:[#allocation25 + $0x30] sm:$0xff]  }
 0xdcd   : > { %5264 = vrsqrt.f32 %v2782_v18  ;;  %vm2788_vm9 = vcmp.eq.f32.partialorder %v2782_v18, inf  ;;  %v2791_v36 = vand.u32 2147483648, %v2782_v18  ;;  %vm2790_vm10 = vcmp.eq.f32.partialorder %v2782_v18, 0.0 }
 0xdce   : > { %v2779_v21 = vpop.xlane.xlu0 %2778  ;;  %v2777_v26 = vpop.xlane.xlu1 %2776 }
 0xdcf   : > { %v2784_v22 = vmul.f32 0.007874016, %v2779_v21  ;;  %v2783_v25 = vmul.f32 0.007874016, %v2777_v26 }
 0xdd1   : > { %5266 = vrsqrt.f32 %v2784_v22  ;;  %vm2802_vm11 = vcmp.eq.f32.partialorder %v2784_v22, inf  ;;  %v2805_v50 = vand.u32 2147483648, %v2784_v22  ;;  %vm2804_vm12 = vcmp.eq.f32.partialorder %v2784_v22, 0.0 }
 0xdd2   : > { %5268 = vrsqrt.f32 %v2783_v25  ;;  %v2781_v30 = vpop.xlane.xlu1 %2780  ;;  %vm2795_vm13 = vcmp.eq.f32.partialorder %v2783_v25, inf  ;;  %v2798_v16 = vand.u32 2147483648, %v2783_v25  ;;  %vm2797_vm14 = vcmp.eq.f32.partialorder %v2783_v25, 0.0 }
 0xdd3   : > { %v2785_v33 = vmul.f32 0.007874016, %v2781_v30 }
 0xdd5   : > { %5270 = vrsqrt.f32 %v2785_v33  ;;  %vm2809_vm15 = vcmp.eq.f32.partialorder %v2785_v33, inf  ;;  %v2812_v15 = vand.u32 2147483648, %v2785_v33  ;;  %vm2811_vm0 = vcmp.eq.f32.partialorder %v2785_v33, 0.0 }
 0xdda   : > { %v5265_v34 = vpop.eup %5264 }
 0xddb   : > { %v2787_v35 = vmul.f32 %v5265_v34, %v2782_v18 }
 0xddd   : > { %v2789_v37 = vsel %vm2788_vm9, %v2782_v18, %v2787_v35  ;;  %v3117_v18 = vpop.f32.mrf.mxu1 }
 0xdde   : > { %v5267_v31 = vpop.eup %5266  ;;  %v2792_v32 = vsel %vm2790_vm10, %v2791_v36, %v2789_v37  ;;  %v3273_v37 = vpack.c.bf16 %v3113_v11, %v3109_v14  ;;  %v5120_v14 = vld [vmem:[#allocation25 + $0x38] sm:$0xff]   ;;  %v5123_v11 = vld [vmem:[#allocation25 + $0x20] sm:$0xff]  }
 0xddf   : > { %v5269_v47 = vpop.eup %5268  ;;  %v2824_v53 = vadd.f32 1e-06, %v2792_v32  ;;  %v2801_v40 = vmul.f32 %v5267_v31, %v2784_v22  ;;  %v6612_v26 = vpop.f32.mrf.mxu1  ;;  %v3217_v31 = vstv %s3216_s23  ;;  %4741 = vmatprep.subr.bf16.mxu1 %v5120_v14 }
 0xde0   : > { %v2794_v54 = vmul.f32 %v5269_v47, %v2783_v25  ;;  %vm3218_vm1 = vcmp.lt.s32.totalorder %v6445_v46, %v3217_v31  ;;  %4742 = vmatpush3.bf16.msra.mxu1 %v5120_v14  ;;  %v5136_v14 = vld [vmem:[#allocation26 + $0x54] ss:$8 sps:$4 sm:$0xff]  }
 0xde1   : > { %v2803_v2 = vsel %vm2802_vm11, %v2784_v22, %v2801_v40  ;;  %5272 = vrcp.f32 %v2824_v53  ;;  %4743 = vmatprep.subr.bf16.mxu1 %v5121_v42 }
 0xde2   : > { %v2806_v56 = vsel %vm2804_vm12, %v2805_v50, %v2803_v2  ;;  %v2796_v58 = vsel %vm2795_vm13, %v2783_v25, %v2794_v54  ;;  %v5271_v20 = vpop.eup %5270 }
 0xde3   : > { %v2826_v27 = vadd.f32 1e-06, %v2806_v56  ;;  %v2799_v28 = vsel %vm2797_vm14, %v2798_v16, %v2796_v58  ;;  %v2808_v59 = vmul.f32 %v5271_v20, %v2785_v33  ;;  %v3222_v16 = vstv %s4373_s7 }
 0xde4   : > { %v2825_v1 = vadd.f32 1e-06, %v2799_v28  ;;  %vm3223_vm3 = vcmp.lt.s32.totalorder %v6445_v46, %v3222_v16  ;;  %4744 = vmatpush3.bf16.msra.mxu1 %v5121_v42  ;;  %v5126_v16 = vld [vmem:[#allocation25 + $0x8] sm:$0xff]   ;;  %v5134_v42 = vld [vmem:[#allocation26 + $0x50] ss:$8 sps:$4 sm:$0xff]  }
 0xde5   : > { %5274 = vrcp.f32 %v2826_v27  ;;  %v2810_v29 = vsel %vm2809_vm15, %v2785_v33, %v2808_v59  ;;  %v3121_v33 = vpop.f32.mrf.mxu1 }
 0xde6   : > { %5276 = vrcp.f32 %v2825_v1  ;;  %v2813_v24 = vsel %vm2811_vm0, %v2812_v15, %v2810_v29  ;;  %v3129_v35 = vpack.c.bf16 %v3121_v33, %v3117_v18  ;;  %v5124_v18 = vld [vmem:[#allocation25 + $0x18] sm:$0xff]  }
 0xde7   : > { %v2827_v60 = vadd.f32 1e-06, %v2813_v24 }
 0xde9   : > { %5278 = vrcp.f32 %v2827_v60 }
 0xdee   : > { %v5273_v61 = vpop.eup %5272 }
 0xdef   : > { %v2829_v49 = vmul.f32 %v5273_v61, %v2820_v62 }
 0xdf1   : > { %v2842_v8 = vadd.f32 %v4346_v4, %v2829_v49 }
 0xdf2   : > { %v5275_v63 = vpop.eup %5274 }
 0xdf3   : > { %v5277_v3 = vpop.eup %5276  ;;  %v2833_v55 = vmul.f32 %v5275_v63, %v2822_v6 }
 0xdf4   : > { %v2831_v48 = vmul.f32 %v5277_v3, %v2821_v0 }
 0xdf5   : > { %v2844_v13 = vadd.f32 %v4346_v4, %v2833_v55 }
 0xdf6   : > { %v2843_v23 = vadd.f32 %v4346_v4, %v2831_v48  ;;  %v5279_v12 = vpop.eup %5278 }
 0xdf7   : > { %v2835_v52 = vmul.f32 %v5279_v12, %v2823_v7 }
 0xdf8   : > { %v2846_v57 = vpack.c.bf16 %v2843_v23, %v2842_v8 }
 0xdf9   : > { %v2845_v39 = vadd.f32 %v4346_v4, %v2835_v52 }
 0xdfa   : > { %4713 = vmatprep.mubr.bf16.mxu0 %v2846_v57 }
 0xdfb   : > { %v2847_v5 = vpack.c.bf16 %v2845_v39, %v2844_v13 }
 0xdfd   : > { %4714 = vmatmul.mubr.bf16.vlgmr.msra.gmra.mxu0 %v2847_v5 }
 0xdfe   : > { %4719 = vmatprep.mubr.msk.bf16.mxu0 %vm5829_vm8, %v5828_v10  ;;  %4718 = vmatpush3.bf16.xpose.msra.mxu0 %v3128_v9  ;;  %v5122_v9 = vld [vmem:[#allocation25 + $0x28] sm:$0xff]  }
 0xdff   : > { %4723 = vmatprep.subr.bf16.mxu0 %v5828_v10  ;;  %4745 = vmatprep.subr.bf16.mxu1 %v5122_v9 }
 0xe00   : > { %4746 = vmatpush3.bf16.msra.mxu1 %v5122_v9  ;;  %v5139_v9 = vld [vmem:[#allocation26 + $0x44] ss:$8 sps:$4 sm:$0xff]  }
 0xe01   : > { %4747 = vmatprep.subr.bf16.mxu1 %v5123_v11 }
 0xe04   : > { %4748 = vmatpush3.bf16.msra.mxu1 %v5123_v11  ;;  %v5137_v11 = vld [vmem:[#allocation26 + $0x40] ss:$8 sps:$4 sm:$0xff]  }
 0xe05   : > { %4749 = vmatprep.subr.bf16.mxu1 %v5124_v18 }
 0xe08   : > { %4750 = vmatpush3.bf16.msra.mxu1 %v5124_v18  ;;  %v5142_v18 = vld [vmem:[#allocation26 + $0x34] ss:$8 sps:$4 sm:$0xff]  }
 0xebd   : > { %v4715_v21 = vpop.f32.mrf.mxu0 }
 0xebf   : > { %v2946_v22 = vpop.f32.mrf.mxu0 }
 0xec1   : > { %v4716_v25 = vpop.f32.mrf.mxu0 }
 0xec2   : > { %v3127_v36 = vpack.c.bf16 %v4716_v25, %v4715_v21 }
 0xec3   : > { %v2949_v30 = vpop.f32.mrf.mxu0 }
 0xec4   : > { %v3126_v34 = vpack.c.bf16 %v2949_v30, %v2946_v22 }
 0xec6   : > { %4720 = vmatmul.mubr.bf16.vlgmr.msra.gmra.mxu0 %v3126_v34 }
 0xec7   : > { %4724 = vmatpush3.bf16.xpose.msra.mxu0 %v3129_v35  ;;  %4725 = vmatprep.mubr.msk.bf16.mxu0 %vm5829_vm8, %v5828_v10  ;;  %v3123_v35 = vpop.f32.mrf.mxu1 }
 0xec8   : > { %4729 = vmatprep.subr.bf16.mxu0 %v5828_v10 }
 0xece   : > { %4726 = vmatmul.mubr.bf16.vlgmr.msra.gmra.mxu0 %v3127_v36 }
 0xecf   : > { %4730 = vmatpush3.bf16.msra.mxu0 %v3273_v37  ;;  %4731 = vmatprep.mubr.msk.bf16.mxu0 %vm5829_vm8, %v5828_v10 }
 0xed0   : > { %4735 = vmatprep.subr.bf16.mxu0 %v5828_v10 }
 0xf86   : > { %v3164_v32 = vpop.f32.mrf.mxu0 }
 0xf87   : > { %v3212_v47 = vmul.f32 0.088388346, %v3164_v32  ;;  %v3274_v32 = vpack.c.bf16 %v3123_v35, %v6612_v26  ;;  %v5127_v26 = vld [vmem:[#allocation25] sm:$0xff]  }
 0xf88   : > { %v4721_v53 = vpop.f32.mrf.mxu0  ;;  %v5149_v35 = vld [vmem:[#allocation26] ss:$8 sps:$4 sm:$0xff]  }
 0xf89   : > { %v3219_v40 = vsel %vm3218_vm1, %v3212_v47, -1e+09 }
 0xf8a   : > { %v3167_v50 = vpop.f32.mrf.mxu0  ;;  %v3227_v54 = vsel %vm3226_vm2, %v3219_v40, -inf }
 0xf8b   : > { %v3213_v2 = vmul.f32 0.088388346, %v3167_v50  ;;  %3228 = vmax.xlane.f32.xlu0 %v3227_v54 }
 0xf8c   : > { %v4722_v56 = vpop.f32.mrf.mxu0 }
 0xf8d   : > { %v3220_v58 = vsel %vm3218_vm1, %v3213_v2, -1e+09  ;;  %v5125_v2 = vld [vmem:[#allocation25 + $0x10] sm:$0xff]  }
 0xf8e   : > { %v3205_v20 = vpop.f32.mrf.mxu0  ;;  %v3230_v27 = vsel %vm3226_vm2, %v3220_v58, -inf  ;;  %4751 = vmatprep.subr.bf16.mxu1 %v5125_v2 }
 0xf8f   : > { %v3214_v28 = vmul.f32 0.088388346, %v3205_v20  ;;  %3231 = vmax.xlane.f32.xlu1 %v3230_v27  ;;  %4752 = vmatpush3.bf16.msra.mxu1 %v5125_v2  ;;  %v5161_v2 = vld [vmem:[#allocation28 + $0x18] sm:$0xff]  }
 0xf90   : > { %v4727_v1 = vpop.f32.mrf.mxu0  ;;  %4753 = vmatprep.subr.bf16.mxu1 %v5126_v16 }
 0xf91   : > { %v3224_v59 = vsel %vm3223_vm3, %v3214_v28, -1e+09 }
 0xf92   : > { %v3208_v15 = vpop.f32.mrf.mxu0  ;;  %v3233_v29 = vsel %vm3226_vm2, %v3224_v59, -inf }
 0xf93   : > { %v3215_v24 = vmul.f32 0.088388346, %v3208_v15  ;;  %3234 = vmax.xlane.f32.xlu0 %v3233_v29  ;;  %4754 = vmatpush3.bf16.msra.mxu1 %v5126_v16 }
 0xf94   : > { %v4728_v60 = vpop.f32.mrf.mxu0  ;;  %4755 = vmatprep.subr.bf16.mxu1 %v5127_v26 }
 0xf95   : > { %v3225_v41 = vsel %vm3223_vm3, %v3215_v24, -1e+09 }
 0xf96   : > { %v3236_v61 = vsel %vm3226_vm2, %v3225_v41, -inf }
 0xf97   : > { %3237 = vmax.xlane.f32.xlu1 %v3236_v61  ;;  %4756 = vmatpush3.bf16.msra.mxu1 %v5127_v26 }
0x1014   : > { %v3229_v62 = vpop.xlane.xlu0 %3228 }
0x1015   : > { %v3239_v63 = vsub.f32 %v3219_v40, %v3229_v62 }
0x1017   : > { %v3243_v0 = vmul.f32 1.442695, %v3239_v63 }
0x1018   : > { %v3232_v49 = vpop.xlane.xlu1 %3231 }
0x1019   : > { %5280 = vpow2.f32 %v3243_v0  ;;  %v3240_v46 = vsub.f32 %v3220_v58, %v3232_v49 }
0x101b   : > { %v3245_v3 = vmul.f32 1.442695, %v3240_v46 }
0x101c   : > { %v3235_v4 = vpop.xlane.xlu0 %3234 }
0x101d   : > { %5282 = vpow2.f32 %v3245_v3  ;;  %v3241_v6 = vsub.f32 %v3224_v59, %v3235_v4 }
0x101f   : > { %v3247_v48 = vmul.f32 1.442695, %v3241_v6 }
0x1020   : > { %v3238_v7 = vpop.xlane.xlu1 %3237 }
0x1021   : > { %5284 = vpow2.f32 %v3247_v48  ;;  %v3242_v8 = vsub.f32 %v3225_v41, %v3238_v7 }
0x1023   : > { %v3249_v23 = vmul.f32 1.442695, %v3242_v8 }
0x1025   : > { %5286 = vpow2.f32 %v3249_v23 }
0x1026   : > { %v5281_v55 = vpop.eup %5280 }
0x1027   : > { %v3251_v12 = vsel %vm3226_vm2, %v5281_v55, 0.0 }
0x1028   : > { %3252 = vadd.xlane.f32.xlu0 %v3251_v12 }
0x102a   : > { %v5283_v57 = vpop.eup %5282 }
0x102b   : > { %v3254_v52 = vsel %vm3226_vm2, %v5283_v57, 0.0 }
0x102c   : > { %3255 = vadd.xlane.f32.xlu1 %v3254_v52 }
0x102e   : > { %v5285_v13 = vpop.eup %5284 }
0x102f   : > { %v3257_v39 = vsel %vm3226_vm2, %v5285_v13, 0.0 }
0x1030   : > { %3258 = vadd.xlane.f32.xlu0 %v3257_v39  ;;  %v5128_v39 = vld [vmem:[#allocation26 + $0x70] ss:$8 sps:$4 sm:$0xff]  }
0x1032   : > { %v5287_v5 = vpop.eup %5286 }
0x1033   : > { %v3260_v17 = vsel %vm3226_vm2, %v5287_v5, 0.0 }
0x1034   : > { %3261 = vadd.xlane.f32.xlu1 %v3260_v17  ;;  %v5131_v17 = vld [vmem:[#allocation26 + $0x60] ss:$8 sps:$4 sm:$0xff]  }
0x10b1   : > { %v3253_v21 = vpop.xlane.xlu0 %3252 }
0x10b2   : > { %5288 = vrcp.f32 %v3253_v21  ;;  %v5140_v21 = vld [vmem:[#allocation26 + $0x30] ss:$8 sps:$4 sm:$0xff]  }
0x10b5   : > { %v3256_v22 = vpop.xlane.xlu1 %3255 }
0x10b6   : > { %5290 = vrcp.f32 %v3256_v22  ;;  %v5145_v22 = vld [vmem:[#allocation26 + $0x24] ss:$8 sps:$4 sm:$0xff]  }
0x10b9   : > { %v3259_v25 = vpop.xlane.xlu0 %3258 }
0x10ba   : > { %5292 = vrcp.f32 %v3259_v25  ;;  %v5143_v25 = vld [vmem:[#allocation26 + $0x20] ss:$8 sps:$4 sm:$0xff]  }
0x10bd   : > { %v3262_v30 = vpop.xlane.xlu1 %3261 }
0x10be   : > { %5294 = vrcp.f32 %v3262_v30  ;;  %v5148_v30 = vld [vmem:[#allocation26 + $0x14] ss:$8 sps:$4 sm:$0xff]  }
0x10bf   : > { %v5289_v33 = vpop.eup %5288 }
0x10c0   : > { %v3267_v36 = vmul.f32 %v5289_v33, %v5281_v55  ;;  %v5146_v33 = vld [vmem:[#allocation26 + $0x10] ss:$8 sps:$4 sm:$0xff]  }
0x10c3   : > { %v5291_v34 = vpop.eup %5290 }
0x10c4   : > { %v3268_v37 = vmul.f32 %v5291_v34, %v5283_v57  ;;  %v5151_v34 = vld [vmem:[#allocation26 + $0x4] ss:$8 sps:$4 sm:$0xff]  }
0x10c6   : > { %v3271_v31 = vpack.c.bf16 %v3268_v37, %v3267_v36  ;;  %v5152_v36 = vld [vmem:[#allocation28 + $0x78] sm:$0xff]  }
0x10c7   : > { %v5293_v47 = vpop.eup %5292  ;;  %v5153_v37 = vld [vmem:[#allocation28 + $0x38] sm:$0xff]   ;;  %4533 = vmatprep.subr.bf16.mxu1 %v5152_v36 }
0x10c8   : > { %4732 = vmatmul.mubr.msk.bf16.vlgmr.msra.gmra.mxu0 %vm3226_vm2, %v3271_v31  ;;  %v3269_v40 = vmul.f32 %v5293_v47, %v5285_v13  ;;  %v5130_v13 = vld [vmem:[#allocation26 + $0x74] ss:$8 sps:$4 sm:$0xff]   ;;  %v5156_v47 = vld [vmem:[#allocation28 + $0x68] sm:$0xff]  }
0x10c9   : > { %4736 = vmatpush3.bf16.msra.mxu0 %v3274_v32  ;;  %4737 = vmatprep.mubr.msk.bf16.mxu0 %vm5829_vm8, %v5828_v10  ;;  %v5154_v31 = vld [vmem:[#allocation28 + $0x70] sm:$0xff]  }
0x10ca   : > { %3686 = vmatprep.subr.bf16.mxu0 %v5130_v13  ;;  %v5155_v32 = vld [vmem:[#allocation28 + $0x30] sm:$0xff]  }
0x10cb   : > { %v5295_v53 = vpop.eup %5294 }
0x10cc   : > { %v3270_v50 = vmul.f32 %v5295_v53, %v5287_v5  ;;  %v5133_v5 = vld [vmem:[#allocation26 + $0x64] ss:$8 sps:$4 sm:$0xff]  }
0x10cd   : > { %v5157_v53 = vld [vmem:[#allocation28 + $0x28] sm:$0xff]  }
0x10ce   : > { %v3272_v54 = vpack.c.bf16 %v3270_v50, %v3269_v40  ;;  %v5158_v40 = vld [vmem:[#allocation28 + $0x60] sm:$0xff]  }
0x10cf   : > { %v5159_v50 = vld [vmem:[#allocation28 + $0x20] sm:$0xff]  }
0x10d0   : > { %4738 = vmatmul.mubr.msk.bf16.vlgmr.msra.gmra.mxu0 %vm3226_vm2, %v3272_v54  ;;  %v5160_v54 = vld [vmem:[#allocation28 + $0x58] sm:$0xff]  }
0x10d1   : > { %3718 = vmatprep.mubr.bf16.mxu0 %v5827_v19  ;;  %3687 = vmatpush1.bf16.msra.mxu0 %v5128_v39 }
0x10d2   : > { %3688 = vmatprep.subr.bf16.mxu0 %v5133_v5 }
0x10d5   : > { %3689 = vmatpush1.bf16.msra.mxu0 %v5131_v17 }
0x10d6   : > { %3690 = vmatprep.subr.bf16.mxu0 %v5136_v14  ;;  %v4384_v14 = vld [vmem:[%s6801_s20] ss:$0 sm:$0xff] }
0x10d9   : > { %3691 = vmatpush1.bf16.msra.mxu0 %v5134_v42 }
0x10da   : > { %3692 = vmatprep.subr.bf16.mxu0 %v5139_v9 }
0x10dd   : > { %3693 = vmatpush1.bf16.msra.mxu0 %v5137_v11 }
0x10de   : > { %3694 = vmatprep.subr.bf16.mxu0 %v5142_v18 }
0x10e1   : > { %3695 = vmatpush1.bf16.msra.mxu0 %v5140_v21 }
0x10e2   : > { %3696 = vmatprep.subr.bf16.mxu0 %v5145_v22 }
0x10e5   : > { %3697 = vmatpush1.bf16.msra.mxu0 %v5143_v25  ;;  %v4385_v25 = vld [vmem:[%s6802_s11] ss:$0 sm:$0xff] }
0x10e6   : > { %3698 = vmatprep.subr.bf16.mxu0 %v5148_v30 }
0x10e9   : > { %3699 = vmatpush1.bf16.msra.mxu0 %v5146_v33 }
0x10ea   : > { %3700 = vmatprep.subr.bf16.mxu0 %v5151_v34 }
0x10ed   : > { %3701 = vmatpush1.bf16.msra.mxu0 %v5149_v35 }
0x1188   : > { %v3312_v56 = vpop.f32.mrf.mxu0 }
0x118a   : > { %v4733_v58 = vpop.f32.mrf.mxu0 }
0x118c   : > { %v3315_v10 = vpop.f32.mrf.mxu0 }
0x118d   : > { %v3363_v20 = vpack.c.bf16 %v3315_v10, %v3312_v56 }
0x118e   : > { %v4734_v27 = vpop.f32.mrf.mxu0 }
0x118f   : > { %4757 = vmatprep.mubr.bf16.mxu1 %v3363_v20 }
0x1190   : > { %v3356_v28 = vpop.f32.mrf.mxu0 }
0x1192   : > { %v4739_v1 = vpop.f32.mrf.mxu0 }
0x1194   : > { %v3359_v59 = vpop.f32.mrf.mxu0 }
0x1195   : > { %v3364_v15 = vpack.c.bf16 %v3359_v59, %v3356_v28 }
0x1196   : > { %v4740_v29 = vpop.f32.mrf.mxu0 }
0x1197   : > { %4758 = vmatmul.mubr.bf16.vlgmr.msra.gmra.mxu1 %v3364_v15 }
0x1198   : > { %4534 = vmatpush3.bf16.msra.mxu1 %v5153_v37 }
0x1199   : > { %4535 = vmatprep.subr.bf16.mxu1 %v5154_v31 }
0x119c   : > { %4536 = vmatpush3.bf16.msra.mxu1 %v5155_v32 }
0x119d   : > { %4537 = vmatprep.subr.bf16.mxu1 %v5156_v47 }
0x11a0   : > { %4538 = vmatpush3.bf16.msra.mxu1 %v5157_v53 }
0x11a1   : > { %4539 = vmatprep.subr.bf16.mxu1 %v5158_v40  ;;  %v5162_v40 = vld [vmem:[#allocation28 + $0x50] sm:$0xff]  }
0x11a4   : > { %4540 = vmatpush3.bf16.msra.mxu1 %v5159_v50  ;;  %v5163_v50 = vld [vmem:[#allocation28 + $0x10] sm:$0xff]  }
0x11a5   : > { %4541 = vmatprep.subr.bf16.mxu1 %v5160_v54  ;;  %v5166_v54 = vld [vmem:[#allocation28 + $0x40] sm:$0xff]  }
0x11a8   : > { %4542 = vmatpush3.bf16.msra.mxu1 %v5161_v2  ;;  %v5167_v2 = vld [vmem:[#allocation28] sm:$0xff]  }
0x11a9   : > { %4543 = vmatprep.subr.bf16.mxu1 %v5162_v40 }
0x11ac   : > { %4544 = vmatpush3.bf16.msra.mxu1 %v5163_v50 }
0x1257   : > { %v4759_v24 = vpop.f32.mrf.mxu1 }
0x1258   : > { %v6641_v63 = vadd.f32 %v4759_v24, %v6570_v44 }
0x1259   : > { %v3463_v60 = vpop.f32.mrf.mxu1 }
0x125a   : > { %v6637_v41 = vadd.f32 %v3463_v60, %v6566_v38 }
0x125b   : > { %v4760_v61 = vpop.f32.mrf.mxu1 }
0x125c   : > { %3484 = vadd.xlane.f32.xlu0 %v6637_v41  ;;  %v6649_v49 = vadd.f32 %v4760_v61, %v6578_v51 }
0x125d   : > { %v3466_v62 = vpop.f32.mrf.mxu1 }
0x125e   : > { %v6644_v0 = vadd.f32 %v3466_v62, %v6573_v45 }
0x1260   : > { %3488 = vadd.xlane.f32.xlu0 %v6641_v63  ;;  %3486 = vadd.xlane.f32.xlu1 %v6644_v0 }
0x1264   : > { %3490 = vadd.xlane.f32.xlu1 %v6649_v49 }
0x12e5   : > { %v3485_v38 = vpop.xlane.xlu0 %3484 }
0x12e6   : > { %v3492_v46 = vmul.f32 0.0078125, %v3485_v38 }
0x12e8   : > { %v6653_v3 = vsub.f32 %v6637_v41, %v3492_v46 }
0x12e9   : > { %v3489_v4 = vpop.xlane.xlu0 %3488  ;;  %v3487_v44 = vpop.xlane.xlu1 %3486 }
0x12ea   : > { %v3494_v6 = vmul.f32 0.0078125, %v3489_v4  ;;  %v3493_v48 = vmul.f32 0.0078125, %v3487_v44  ;;  %v3500_v45 = vmul.f32 %v6653_v3, %v6653_v3  ;;  %v3550_v9 = vmul.f32 %v4384_v14, %v6653_v3 }
0x12ec   : > { %v6658_v7 = vsub.f32 %v6641_v63, %v3494_v6  ;;  %v6661_v51 = vsub.f32 %v6644_v0, %v3493_v48  ;;  %3504 = vadd.xlane.f32.xlu0 %v3500_v45 }
0x12ed   : > { %v3491_v8 = vpop.xlane.xlu1 %3490 }
0x12ee   : > { %v3495_v23 = vmul.f32 0.0078125, %v3491_v8  ;;  %v3502_v55 = vmul.f32 %v6658_v7, %v6658_v7  ;;  %v3501_v12 = vmul.f32 %v6661_v51, %v6661_v51  ;;  %v3551_v18 = vmul.f32 %v4384_v14, %v6661_v51 }
0x12ef   : > { %v3552_v30 = vmul.f32 %v4384_v14, %v6658_v7  ;;  %v5164_v7 = vld [vmem:[#allocation28 + $0x48] sm:$0xff]  }
0x12f0   : > { %v6668_v57 = vsub.f32 %v6649_v49, %v3495_v23  ;;  %3508 = vadd.xlane.f32.xlu0 %v3502_v55  ;;  %3506 = vadd.xlane.f32.xlu1 %v3501_v12 }
0x12f1   : > { %4545 = vmatprep.subr.bf16.mxu1 %v5164_v7 }
0x12f2   : > { %v3503_v52 = vmul.f32 %v6668_v57, %v6668_v57  ;;  %v3553_v34 = vmul.f32 %v4384_v14, %v6668_v57  ;;  %v5165_v57 = vld [vmem:[#allocation28 + $0x8] sm:$0xff]  }
0x12f3   : > { %4546 = vmatpush3.bf16.msra.mxu1 %v5165_v57 }
0x12f4   : > { %3510 = vadd.xlane.f32.xlu1 %v3503_v52  ;;  %4547 = vmatprep.subr.bf16.mxu1 %v5166_v54 }
0x12f7   : > { %4548 = vmatpush3.bf16.msra.mxu1 %v5167_v2 }
0x1375   : > { %v3505_v16 = vpop.xlane.xlu0 %3504 }
0x1376   : > { %v3512_v26 = vmul.f32 0.007874016, %v3505_v16  ;;  %v3602_v16 = vsub.s32 1, %v6442_v43 }
0x1378   : > { %5296 = vrsqrt.f32 %v3512_v26  ;;  %vm3518_vm8 = vcmp.eq.f32.partialorder %v3512_v26, inf  ;;  %v3521_v15 = vand.u32 2147483648, %v3512_v26  ;;  %vm3520_vm4 = vcmp.eq.f32.partialorder %v3512_v26, 0.0 }
0x1379   : > { %v3509_v56 = vpop.xlane.xlu0 %3508  ;;  %v3507_v10 = vpop.xlane.xlu1 %3506 }
0x137a   : > { %v3514_v58 = vmul.f32 0.007874016, %v3509_v56  ;;  %v3513_v20 = vmul.f32 0.007874016, %v3507_v10 }
0x137c   : > { %5298 = vrsqrt.f32 %v3514_v58  ;;  %vm3532_vm5 = vcmp.eq.f32.partialorder %v3514_v58, inf  ;;  %v3535_v46 = vand.u32 2147483648, %v3514_v58  ;;  %vm3534_vm6 = vcmp.eq.f32.partialorder %v3514_v58, 0.0 }
0x137d   : > { %5300 = vrsqrt.f32 %v3513_v20  ;;  %v3511_v27 = vpop.xlane.xlu1 %3510  ;;  %vm3525_vm7 = vcmp.eq.f32.partialorder %v3513_v20, inf  ;;  %v3528_v6 = vand.u32 2147483648, %v3513_v20  ;;  %vm3527_vm9 = vcmp.eq.f32.partialorder %v3513_v20, 0.0 }
0x137e   : > { %v3515_v28 = vmul.f32 0.007874016, %v3511_v27 }
0x1380   : > { %5302 = vrsqrt.f32 %v3515_v28  ;;  %vm3539_vm10 = vcmp.eq.f32.partialorder %v3515_v28, inf  ;;  %v3542_v13 = vand.u32 2147483648, %v3515_v28  ;;  %vm3541_vm11 = vcmp.eq.f32.partialorder %v3515_v28, 0.0 }
0x1385   : > { %v5297_v1 = vpop.eup %5296 }
0x1386   : > { %v3517_v59 = vmul.f32 %v5297_v1, %v3512_v26 }
0x1388   : > { %v3519_v29 = vsel %vm3518_vm8, %v3512_v26, %v3517_v59  ;;  %v3598_v26 = vsub.s32 0, %v6442_v43 }
0x1389   : > { %v5299_v24 = vpop.eup %5298  ;;  %v3522_v60 = vsel %vm3520_vm4, %v3521_v15, %v3519_v29 }
0x138a   : > { %v5301_v61 = vpop.eup %5300  ;;  %v3554_v62 = vadd.f32 1e-06, %v3522_v60  ;;  %v3531_v38 = vmul.f32 %v5299_v24, %v3514_v58 }
0x138b   : > { %v3524_v4 = vmul.f32 %v5301_v61, %v3513_v20 }
0x138c   : > { %v3533_v44 = vsel %vm3532_vm5, %v3514_v58, %v3531_v38  ;;  %5304 = vrcp.f32 %v3554_v62 }
0x138d   : > { %v3536_v48 = vsel %vm3534_vm6, %v3535_v46, %v3533_v44  ;;  %v3526_v45 = vsel %vm3525_vm7, %v3513_v20, %v3524_v4  ;;  %v5303_v8 = vpop.eup %5302 }
0x138e   : > { %v3556_v23 = vadd.f32 1e-06, %v3536_v48  ;;  %v3529_v55 = vsel %vm3527_vm9, %v3528_v6, %v3526_v45  ;;  %v3538_v52 = vmul.f32 %v5303_v8, %v3515_v28 }
0x138f   : > { %v3555_v12 = vadd.f32 1e-06, %v3529_v55 }
0x1390   : > { %5306 = vrcp.f32 %v3556_v23  ;;  %v3540_v39 = vsel %vm3539_vm10, %v3515_v28, %v3538_v52 }
0x1391   : > { %5308 = vrcp.f32 %v3555_v12  ;;  %v3543_v5 = vsel %vm3541_vm11, %v3542_v13, %v3540_v39 }
0x1392   : > { %v3557_v17 = vadd.f32 1e-06, %v3543_v5 }
0x1394   : > { %5310 = vrcp.f32 %v3557_v17 }
0x1399   : > { %v5305_v42 = vpop.eup %5304 }
0x139a   : > { %v3559_v21 = vmul.f32 %v5305_v42, %v3550_v9  ;;  %v4402_v9 = vld [vmem:[%s6804_s1] ss:$0 sm:$0xff] }
0x139c   : > { %v3572_v35 = vadd.f32 %v4385_v25, %v3559_v21 }
0x139d   : > { %v5307_v11 = vpop.eup %5306 }
0x139e   : > { %v5309_v22 = vpop.eup %5308  ;;  %v3563_v37 = vmul.f32 %v5307_v11, %v3552_v30 }
0x139f   : > { %v3561_v33 = vmul.f32 %v5309_v22, %v3551_v18 }
0x13a0   : > { %v3574_v53 = vadd.f32 %v4385_v25, %v3563_v37 }
0x13a1   : > { %v3573_v36 = vadd.f32 %v4385_v25, %v3561_v33  ;;  %v5311_v31 = vpop.eup %5310 }
0x13a2   : > { %v3565_v47 = vmul.f32 %v5311_v31, %v3553_v34 }
0x13a3   : > { %v3576_v32 = vpack.c.bf16 %v3573_v36, %v3572_v35 }
0x13a4   : > { %v3575_v3 = vadd.f32 %v4385_v25, %v3565_v47 }
0x13a5   : > { %3719 = vmatmul.mubr.bf16.vlgmr.msra.gmra.mxu0 %v3576_v32 }
0x13a6   : > { %3728 = vmatprep.mubr.bf16.mxu0 %v5827_v19  ;;  %v3577_v51 = vpack.c.bf16 %v3575_v3, %v3574_v53  ;;  %v3594_v19 = vld [vmem:[%s6803_s18] sm:$0x3] }
0x13a7   : > { %v3603_v58 = vrot.slane %v3594_v19, %v3602_v16  ;;  %v3599_v10 = vrot.slane %v3594_v19, %v3598_v26 }
0x13ad   : > { %3729 = vmatmul.mubr.bf16.gmra.mxu0 %v3577_v51 }
0x1465   : > { %v3720_v56 = vpop.f32.mrf.mxu0 }
0x1466   : > { %v3721_v59 = vadd.f32 %v3720_v56, %v3599_v10 }
0x1467   : > { %v3722_v20 = vpop.f32.mrf.mxu0 }
0x1468   : > { %v3723_v28 = vadd.f32 %v3722_v20, %v3603_v58  ;;  %v3739_v38 = vmax.f32 %v3721_v59, 0.0 }
0x1469   : > { %v3724_v27 = vpop.f32.mrf.mxu0 }
0x146a   : > { %v3725_v1 = vadd.f32 %v3724_v27, %v3599_v10  ;;  %v3740_v61 = vmax.f32 %v3723_v28, 0.0 }
0x146b   : > { %v3726_v15 = vpop.f32.mrf.mxu0 }
0x146c   : > { %v3727_v29 = vadd.f32 %v3726_v15, %v3603_v58  ;;  %v3741_v24 = vmax.f32 %v3725_v1, 0.0 }
0x146d   : > { %v3730_v60 = vpop.f32.mrf.mxu0 }
0x146e   : > { %v3742_v62 = vmax.f32 %v3727_v29, 0.0  ;;  %v3747_v44 = vpack.c.bf16 %v3741_v24, %v3739_v38  ;;  %v3731_v45 = vadd.f32 %v3730_v60, %v3599_v10 }
0x146f   : > { %v3732_v46 = vpop.f32.mrf.mxu0 }
0x1470   : > { %v3748_v4 = vpack.c.bf16 %v3742_v62, %v3740_v61  ;;  %v3733_v6 = vadd.f32 %v3732_v46, %v3603_v58  ;;  %v3743_v13 = vmax.f32 %v3731_v45, 0.0 }
0x1471   : > { %v3734_v43 = vpop.f32.mrf.mxu0 }
0x1472   : > { %v3735_v48 = vadd.f32 %v3734_v43, %v3599_v10  ;;  %3918 = vmatprep.mubr.bf16.mxu1 %v3748_v4  ;;  %v3744_v12 = vmax.f32 %v3733_v6, 0.0 }
0x1473   : > { %v3736_v8 = vpop.f32.mrf.mxu0  ;;  %3919 = vmatmul.mubr.bf16.vlgmr.msra.gmra.mxu1 %v3747_v44 }
0x1474   : > { %v3737_v23 = vadd.f32 %v3736_v8, %v3603_v58  ;;  %v3745_v55 = vmax.f32 %v3735_v48, 0.0 }
0x1476   : > { %v3746_v52 = vmax.f32 %v3737_v23, 0.0  ;;  %v3749_v5 = vpack.c.bf16 %v3745_v55, %v3743_v13 }
0x1478   : > { %v3750_v39 = vpack.c.bf16 %v3746_v52, %v3744_v12 }
0x147a   : > { %3926 = vmatprep.mubr.bf16.mxu1 %v3750_v39 }
0x147b   : > { %3927 = vmatmul.mubr.bf16.gmra.mxu1 %v3749_v5 }
0x1533   : > { %v4549_v17 = vpop.f32.mrf.mxu1 }
0x1535   : > { %v4550_v14 = vpop.f32.mrf.mxu1 }
0x1536   : > { %v4551_v42 = vadd.f32 %v4550_v14, %v4549_v17 }
0x1537   : > { %v4552_v11 = vpop.f32.mrf.mxu1 }
0x1538   : > { %v3921_v21 = vadd.f32 %v4551_v42, %v4402_v9 }
0x1539   : > { %v4553_v18 = vpop.f32.mrf.mxu1 }
0x153a   : > { %v4554_v22 = vadd.f32 %v4553_v18, %v4552_v11  ;;  %v3935_v34 = vadd.f32 %v3921_v21, %v6637_v41 }
0x153b   : > { %v4555_v25 = vpop.f32.mrf.mxu1 }
0x153c   : > { %v3924_v30 = vadd.f32 %v4554_v22, %v4402_v9 }
0x153d   : > { %v4556_v33 = vpop.f32.mrf.mxu1 }
0x153e   : > { %v3936_v35 = vadd.f32 %v3924_v30, %v6644_v0  ;;  %v4557_v36 = vadd.f32 %v4556_v33, %v4555_v25 }
0x153f   : > { %v4558_v37 = vpop.f32.mrf.mxu1 }
0x1540   : > { %v4437_v31 = vpack.c.bf16 %v3936_v35, %v3935_v34  ;;  %v3929_v47 = vadd.f32 %v4557_v36, %v4402_v9 }
0x1541   : > { %v4559_v32 = vpop.f32.mrf.mxu1 }
0x1542   : > { %4438 = vst [vmem:[%s1104_s4] sm:$0xff] %v4437_v31   ;;  %v4560_v53 = vadd.f32 %v4559_v32, %v4558_v37  ;;  %v3937_v51 = vadd.f32 %v3929_v47, %v6641_v63 }
0x1544   : > { %v3932_v3 = vadd.f32 %v4560_v53, %v4402_v9 }
0x1546   : > { %v3938_v40 = vadd.f32 %v3932_v3, %v6649_v49 }
0x1548   : > { %v4442_v50 = vpack.c.bf16 %v3938_v40, %v3937_v51 }
0x154a   : > { %4444 = vst [vmem:[%s1104_s4 + $0x8] sm:$0xff] %v4442_v50  }
0x154b   : > { %s6805_s21 = sld [smem:[#allocation60_spill]]  ;;  %s4433_s13 = sshll.u32 %s6002_s2, 7 }
0x154c   : > { %s6806_s0 = sld [smem:[#allocation64_spill]]  ;;  %s3983_s26 = sshll.u32 %s1104_s4, 4  ;;  %s3984_s26 = int_to_ptr.vmem [resolvable:$true] %s3983_s26 }
0x154d   : > { %s5830_s16 = smov 128   ;;  %s5831_s23 = smov 256  }
0x154e   : > { %s5832_s8 = smov 2   ;;  %s5833_s7 = smov 64  }
0x154f   : > { %s5834_s20 = smov 4   ;;  %s5835_s2 = smov 131072  }
0x1550   : > { %s5836_s11 = smov 0  }
0x1551   : > { %s3972_s10 = scalar_lea.hbm %s6805_s21, %s4433_s13 }
0x1552   : > { %p6807_p9 = scmp.ne.s32.totalorder %s6806_s0, 0 }
0x1554   : > { %4826 = sst [smem:[#allocation33]] (%p6807_p9), %s5830_s16 }
0x1555   : > { %4827 = sst [smem:[#allocation33 + $0x1]] (%p6807_p9), %s5831_s23 }
0x1556   : > { %4828 = sst [smem:[#allocation33 + $0x2]] (%p6807_p9), %s5832_s8 }
0x1557   : > { %4829 = sst [smem:[#allocation33 + $0x3]] (%p6807_p9), %s5833_s7 }
0x1558   : > { %4830 = sst [smem:[#allocation33 + $0x4]] (%p6807_p9), %s5833_s7 }
0x1559   : > { %4831 = sst [smem:[#allocation33 + $0x5]] (%p6807_p9), %s5834_s20 }
0x155a   : > { %4832 = dma.general (%p6807_p9), %s3984_s26, 256, %s3972_s10, %s3960_s15, %s5835_s2, [#allocation33], %s5836_s11, 0  }
0x155b PF: > { %s6808_s18 = sld [smem:[#allocation61_spill]] }
0x155c   : > { %s6809_s1 = sld [smem:[#allocation65_spill]] }
0x1561   : > { %s4011_s22 = sand.u32 1, %s6808_s18  }
0x1562   : > { %p6810_p2 = scmp.ne.s32.totalorder %s6809_s1, 0  ;;  %s4012_s4 = scalar_lea.sflag [#allocation7], %s4011_s22 }
0x1564   : > { %p4878_p3 = pnand %p4247_p11, %p6810_p2 }
0x1566   : > { %p4879_p6 = pneg %p4878_p3 }
0x1568   : > { %5755 = dma.done.wait (%p4879_p6), %s4012_s4, 256  }
0x1569   : > { %5757 = vsyncadd (%p4879_p6), %s4012_s4, 4294967040  ;;  %s6811_s28 = sld [smem:[#allocation62_spill]]  ;;  %s6813_s0 = smov %s5764_s5 }
0x156a   : > { %s6812_s21 = sld [smem:[#allocation63_spill]]  ;;  %s6814_s5 = smov %s5768_s27 }
0x156f   : > { %p87_p8 = scmp.ge.s32.totalorder %s6811_s28, 4  }
0x1570   : > { %s6815_s27 = smov %s6812_s21 }
0x1571   :  { %89 = sbr.rel (!%p87_p8) target bundleno = 75 (0x4b), region = 269 }
0x1576   :  { %4017 = vsyncpa [#allocation6], 1 }
0x1577   :  { %4019 = vsyncpa [#allocation6 + $0x1], 1 }
0x1578   :  { %4020 = vsyncpa [#allocation9], 1 }
0x1579   :  { %4022 = vsyncpa [#allocation9 + $0x1], 1 }
0x157a   :  { %4023 = vsyncpa [#allocation12], 1 }
0x157b   :  { %4024 = vsyncpa [#allocation15], 1 }
0x157c   :  { %4025 = vsyncpa [#allocation18], 1 }
0x157d   :  { %4026 = vsyncpa [#allocation21], 1 }
0x157e   :  { %4027 = vsyncpa [#allocation24], 1 }
0x157f   :  { %4028 = vsyncpa [#allocation27], 1 }
0x1580   :  { %4029 = vsyncpa [#allocation7], 1 }
0x1581   :  { %4031 = vsyncpa [#allocation7 + $0x1], 1 }

</bundles_post_ra>
